<compile_context>
chip_gen: v6e
topology: v6e:2x2x1
jax: 0.10.0
libtpu: 0.0.40
codegen_flags: <defaults>
</compile_context>

<pallas_src>
import functools

import jax
import jax.numpy as jnp
from jax import lax
from jax.experimental import pallas as pl
from jax.experimental.pallas import tpu as pltpu


def _round_up(x, m):
    return ((x + m - 1) // m) * m


# ---------------------------------------------------------------------------
# Fused ConvStack kernel: one (batch, time-tile) per grid step
# ---------------------------------------------------------------------------
def _conv_stack_kernel(x_ref, w1_ref, s1_ref, b1_ref,
                       w2_ref, s2_ref, b2_ref,
                       w3_ref, s3_ref, b3_ref,
                       wfc_ref, bfc_ref,
                       o_ref,
                       y1p_ref, y2u_ref, y2p_ref, y3u_ref,
                       *, TT, F, C1, C2, Dout, T_total):
    """3x(conv3x3+BN+ReLU) + 2x maxpool(1,2) + Linear, all in VMEM.

    x_ref   : (TT+6, F+2)      zero-padded input tile (Cin == 1), 3-row time halo
    w1_ref  : (3, 3, C1)       conv1 weights (Cin squeezed)
    w2_ref  : (3, 3, C1, C1)   conv2 weights
    w3_ref  : (3, 3, C1, C2)   conv3 weights
    s*_ref  : (1, C)           folded BN scale = gamma / sqrt(var + eps)
    b*_ref  : (1, C)           folded (conv_bias - mean) * scale + beta
    wfc_ref : (F//4, C2, Dout) fc weight, pre-permuted to freq-major order
    bfc_ref : (1, Dout)
    o_ref   : (TT, Dout)
    scratch : y1p (TT+4, F+2, C1), y2u (TT+2, F, C1),
              y2p (TT+2, F//2+2, C1), y3u (TT, F//2, C2)
    """
    F2, F4 = F // 2, F // 4
    T1, T2, T3 = TT + 4, TT + 2, TT
    g0 = pl.program_id(1) * TT          # global time index of this tile's row 0

    # ---- layer 1: Conv(1 -> C1) + BN + ReLU (9 VPU broadcast MACs) ---------
    x3 = x_ref[...][:, :, None]         # (TT+6, F+2, 1); single relayout, reused 9x
    w1v = w1_ref[...]
    acc1 = jnp.zeros((T1, F, C1), jnp.float32)
    for dh in range(3):
        for dw in range(3):
            acc1 = acc1 + x3[dh:dh + T1, dw:dw + F, :] * w1v[dh, dw]
    y1 = jnp.maximum(acc1 * s1_ref[...] + b1_ref[...], 0.0)
    # PyTorch zero-pads each conv's *input*: halo rows outside [0, T) must be 0.
    r1 = g0 - 2 + lax.broadcasted_iota(jnp.int32, (T1, 1, 1), 0)
    y1 = jnp.where((r1 >= 0) & (r1 < T_total), y1, 0.0)

    zc1 = jnp.zeros((T1, 1, C1), jnp.float32)
    y1p_ref[:, 0:1, :] = zc1
    y1p_ref[:, F + 1:F + 2, :] = zc1
    y1p_ref[:, 1:F + 1, :] = y1

    # ---- layer 2: Conv(C1 -> C1) + BN + ReLU + MaxPool(1,2)  (MXU) ---------
    acc2 = jnp.zeros((T2 * F, C1), jnp.float32)
    for dh in range(3):
        for dw in range(3):
            patch = y1p_ref[dh:dh + T2, dw:dw + F, :].reshape(T2 * F, C1)
            acc2 = acc2 + jnp.dot(patch, w2_ref[dh, dw],
                                  preferred_element_type=jnp.float32)
    y2 = jnp.maximum(acc2 * s2_ref[...] + b2_ref[...], 0.0)
    y2u_ref[...] = y2.reshape(T2, F, C1)
    # vectorized (1,2) max-pool along freq: two strided reads + one maximum
    y2 = jnp.maximum(y2u_ref[:, pl.ds(0, F2, 2), :],
                     y2u_ref[:, pl.ds(1, F2, 2), :])          # (T2, F2, C1)
    r2 = g0 - 1 + lax.broadcasted_iota(jnp.int32, (T2, 1, 1), 0)
    y2 = jnp.where((r2 >= 0) & (r2 < T_total), y2, 0.0)

    zc2 = jnp.zeros((T2, 1, C1), jnp.float32)
    y2p_ref[:, 0:1, :] = zc2
    y2p_ref[:, F2 + 1:F2 + 2, :] = zc2
    y2p_ref[:, 1:F2 + 1, :] = y2

    # ---- layer 3: Conv(C1 -> C2) + BN + ReLU  (MXU) ------------------------
    acc3 = jnp.zeros((T3 * F2, C2), jnp.float32)
    for dh in range(3):
        for dw in range(3):
            patch = y2p_ref[dh:dh + T3, dw:dw + F2, :].reshape(T3 * F2, C1)
            acc3 = acc3 + jnp.dot(patch, w3_ref[dh, dw],
                                  preferred_element_type=jnp.float32)
    y3u_ref[...] = jnp.maximum(acc3 * s3_ref[...] + b3_ref[...],
                               0.0).reshape(T3, F2, C2)

    # ---- MaxPool(1,2) + Linear, fused (features never leave VMEM) ----------
    # Feature order is freq-major / channel-minor; wfc was pre-permuted to
    # match, so no runtime transpose of the activations is needed.
    acc = jnp.zeros((T3, Dout), jnp.float32)
    for f in range(F4):
        xf = jnp.maximum(y3u_ref[:, 2 * f, :], y3u_ref[:, 2 * f + 1, :])  # (T3, C2)
        acc = acc + jnp.dot(xf, wfc_ref[f], preferred_element_type=jnp.float32)
    o_ref[...] = acc + bfc_ref[...]


# ---------------------------------------------------------------------------
# Wrapper: halo tiling, parameter folding, pallas_call
# ---------------------------------------------------------------------------
def conv_stack_forward(mel, p, *, time_tile=64):
    """mel: (B, T, F) float. Returns (B, T, output_features)."""
    B, T, F = mel.shape
    assert F % 4 == 0, "input_features must be divisible by 4"
    C1 = p["w1"].shape[-1]
    C2 = p["w3"].shape[-1]
    Dout = p["bfc"].shape[-1]
    F2, F4 = F // 2, F // 4

    # Time tile: multiple of 8, capped so per-step VMEM (scratch + blocks)
    # stays well under the scoped limit on all of v5e/v6e/v7x.
    TT = _round_up(min(time_tile, _round_up(T, 8)), 8)
    Tpad = _round_up(T, TT)
    NT = Tpad // TT

    x = mel.astype(jnp.float32)
    # zero-pad: 1 col each side (freq), 3-row halo each side (time) + pad T up
    # to a multiple of TT (extra rows are masked/discarded).
    xp = jnp.pad(x, ((0, 0), (3, 3 + (Tpad - T)), (1, 1)))          # (B, Tpad+6, F+2)
    # overlapping time tiles with halo (input is tiny — 1 channel — so the
    # duplicated halo rows are cheap vs. the activation HBM traffic we avoid).
    x_tiles = jnp.stack([xp[:, i * TT:i * TT + TT + 6, :] for i in range(NT)],
                        axis=1)                                      # (B, NT, TT+6, F+2)

    w1 = p["w1"][:, :, 0, :]                                         # (3, 3, C1)
    # fold PyTorch's channel-major flatten (transpose(1,2).flatten(-2)) into the
    # fc weight once: row (c*F4 + f)  ->  wfc[f, c, :]
    wfc = p["wfc"].reshape(C2, F4, Dout).transpose(1, 0, 2)          # (F4, C2, Dout)

    kernel = functools.partial(_conv_stack_kernel, TT=TT, F=F, C1=C1, C2=C2,
                               Dout=Dout, T_total=T)

    out = pl.pallas_call(
        kernel,
        out_shape=jax.ShapeDtypeStruct((B, Tpad, Dout), jnp.float32),
        grid=(B, NT),
        in_specs=[
            pl.BlockSpec((None, None, TT + 6, F + 2), lambda b, t: (b, t, 0, 0)),
            pl.BlockSpec((3, 3, C1), lambda b, t: (0, 0, 0)),
            pl.BlockSpec((1, C1), lambda b, t: (0, 0)),
            pl.BlockSpec((1, C1), lambda b, t: (0, 0)),
            pl.BlockSpec((3, 3, C1, C1), lambda b, t: (0, 0, 0, 0)),
            pl.BlockSpec((1, C1), lambda b, t: (0, 0)),
            pl.BlockSpec((1, C1), lambda b, t: (0, 0)),
            pl.BlockSpec((3, 3, C1, C2), lambda b, t: (0, 0, 0, 0)),
            pl.BlockSpec((1, C2), lambda b, t: (0, 0)),
            pl.BlockSpec((1, C2), lambda b, t: (0, 0)),
            pl.BlockSpec((F4, C2, Dout), lambda b, t: (0, 0, 0)),
            pl.BlockSpec((1, Dout), lambda b, t: (0, 0)),
        ],
        out_specs=pl.BlockSpec((None, TT, Dout), lambda b, t: (b, t, 0)),
        scratch_shapes=[
            pltpu.VMEM((TT + 4, F + 2, C1), jnp.float32),   # layer-1 out, F-padded
            pltpu.VMEM((TT + 2, F, C1), jnp.float32),       # layer-2 out, unpooled
            pltpu.VMEM((TT + 2, F2 + 2, C1), jnp.float32),  # layer-2 pooled, F-padded
            pltpu.VMEM((TT, F2, C2), jnp.float32),          # layer-3 out, unpooled
        ],
        compiler_params=pltpu.CompilerParams(
            dimension_semantics=("parallel", "parallel"),
            vmem_limit_bytes=64 * 1024 * 1024),
    )(x_tiles, w1, p["s1"], p["b1"], p["w2"], p["s2"], p["b2"],
      p["w3"], p["s3"], p["b3"], wfc, p["bfc"])

    return out[:, :T, :]


# ---------------------------------------------------------------------------
# Parameters (eval-mode BatchNorm folded into per-channel scale/bias)
# ---------------------------------------------------------------------------
def make_params(key, input_features, output_features):
    C1 = output_features // 16
    C2 = output_features // 8
    F4 = input_features // 4
    ks = iter(jax.random.split(key, 24))

    def conv_bn(cin, cout):
        w = 0.1 * jax.random.normal(next(ks), (3, 3, cin, cout), jnp.float32)
        cb = 0.1 * jax.random.normal(next(ks), (cout,), jnp.float32)   # conv bias
        gamma = 1.0 + 0.1 * jax.random.normal(next(ks), (cout,), jnp.float32)
        beta = 0.1 * jax.random.normal(next(ks), (cout,), jnp.float32)
        mean = 0.1 * jax.random.normal(next(ks), (cout,), jnp.float32)
        var = 1.0 + 0.5 * jnp.abs(jax.random.normal(next(ks), (cout,), jnp.float32))
        scale = gamma / jnp.sqrt(var + 1e-5)
        bias = (cb - mean) * scale + beta
        return w, scale.reshape(1, cout), bias.reshape(1, cout)

    w1, s1, b1 = conv_bn(1, C1)
    w2, s2, b2 = conv_bn(C1, C1)
    w3, s3, b3 = conv_bn(C1, C2)
    # fc weight stored in the PyTorch feature order: row index = channel*F4 + freq
    wfc = 0.1 * jax.random.normal(next(ks), (C2 * F4, output_features), jnp.float32)
    bfc = 0.1 * jax.random.normal(next(ks), (1, output_features), jnp.float32)
    return dict(w1=w1, s1=s1, b1=b1, w2=w2, s2=s2, b2=b2,
                w3=w3, s3=s3, b3=b3, wfc=wfc, bfc=bfc)


# ---------------------------------------------------------------------------
# Pure-JAX reference (mirrors the PyTorch module exactly) for verification
# ---------------------------------------------------------------------------
def _ref_conv_bn_relu(x, w, scale, bias, pool):
    B, T, F, Cin = x.shape
    Cout = w.shape[-1]
    xp = jnp.pad(x, ((0, 0), (1, 1), (1, 1), (0, 0)))
    acc = jnp.zeros((B, T, F, Cout), jnp.float32)
    for dh in range(3):
        for dw in range(3):
            acc = acc + jnp.einsum("btfc,cd->btfd",
                                   xp[:, dh:dh + T, dw:dw + F, :], w[dh, dw],
                                   precision=lax.Precision.HIGHEST)
    y = jnp.maximum(acc * scale + bias, 0.0)
    if pool:
        y = jnp.max(y.reshape(B, T, F // 2, 2, Cout), axis=3)
    return y


def ref_forward(mel, p):
    x = mel[..., None].astype(jnp.float32)
    x = _ref_conv_bn_relu(x, p["w1"], p["s1"], p["b1"], False)
    x = _ref_conv_bn_relu(x, p["w2"], p["s2"], p["b2"], True)
    x = _ref_conv_bn_relu(x, p["w3"], p["s3"], p["b3"], True)
    B, T, F4, C2 = x.shape
    # PyTorch: x.transpose(1, 2).flatten(-2) -> channel-major, freq-minor
    feats = jnp.transpose(x, (0, 1, 3, 2)).reshape(B, T, C2 * F4)
    return jnp.einsum("btd,de->bte", feats, p["wfc"],
                      precision=lax.Precision.HIGHEST) + p["bfc"][0]


if __name__ == "__main__":
    INPUT_FEATURES = 16     # mel bins (divisible by 4)
    OUTPUT_FEATURES = 32    # -> C1 = 2, C2 = 4, fc_in = 4 * (16 // 4) = 16
    B, T = 2, 8

    key = jax.random.PRNGKey(0)
    kx, kp, kx2 = jax.random.split(key, 3)
    params = make_params(kp, INPUT_FEATURES, OUTPUT_FEATURES)

    # Test 1: single time tile
    mel = jax.random.normal(kx, (B, T, INPUT_FEATURES), jnp.float32)
    out = jax.block_until_ready(conv_stack_forward(mel, params))
    ref = jax.block_until_ready(ref_forward(mel, params))
    assert out.shape == (B, T, OUTPUT_FEATURES), out.shape
    assert jnp.allclose(out, ref, rtol=1e-3, atol=1e-3), \
        float(jnp.max(jnp.abs(out - ref)))

    # Test 2: multiple time tiles with halo + non-multiple T (exercises masking)
    T2 = 13
    mel2 = jax.random.normal(kx2, (1, T2, INPUT_FEATURES), jnp.float32)
    out2 = jax.block_until_ready(conv_stack_forward(mel2, params, time_tile=8))
    ref2 = jax.block_until_ready(ref_forward(mel2, params))
    assert out2.shape == (1, T2, OUTPUT_FEATURES), out2.shape
    assert jnp.allclose(out2, ref2, rtol=1e-3, atol=1e-3), \
        float(jnp.max(jnp.abs(out2 - ref2)))

    print("KERNEL_OK")
</pallas_src>

<mosaic_0001>
module attributes {stable_mosaic.version = 11 : i64} {
  func.func @_conv_stack_kernel(%arg0: i32, %arg1: i32, %arg2: memref<1x1x14x18xf32, #tpu.memory_space<vmem>>, %arg3: memref<3x3x2xf32, #tpu.memory_space<vmem>>, %arg4: memref<1x2xf32, #tpu.memory_space<vmem>>, %arg5: memref<1x2xf32, #tpu.memory_space<vmem>>, %arg6: memref<3x3x2x2xf32, #tpu.memory_space<vmem>>, %arg7: memref<1x2xf32, #tpu.memory_space<vmem>>, %arg8: memref<1x2xf32, #tpu.memory_space<vmem>>, %arg9: memref<3x3x2x4xf32, #tpu.memory_space<vmem>>, %arg10: memref<1x4xf32, #tpu.memory_space<vmem>>, %arg11: memref<1x4xf32, #tpu.memory_space<vmem>>, %arg12: memref<4x4x32xf32, #tpu.memory_space<vmem>>, %arg13: memref<1x32xf32, #tpu.memory_space<vmem>>, %arg14: memref<1x8x32xf32, #tpu.memory_space<vmem>>, %arg15: memref<12x18x2xf32, #tpu.memory_space<vmem>>, %arg16: memref<10x16x2xf32, #tpu.memory_space<vmem>>, %arg17: memref<10x10x2xf32, #tpu.memory_space<vmem>>, %arg18: memref<8x8x4xf32, #tpu.memory_space<vmem>>) attributes {dimension_semantics = [#tpu.dimension_semantics<parallel>, #tpu.dimension_semantics<parallel>], iteration_bounds = array<i64: 2, 1>, scalar_prefetch = 0 : i64, scratch_operands = 4 : i64, tpu.core_type = #tpu.core_type<tc>, window_params = [{transform_indices = @transform_0, window_bounds = array<i64: 1, 1, 14, 18>}, {pipeline_mode = #tpu.pipeline_mode<synchronous>, transform_indices = @transform_1, window_bounds = array<i64: 3, 3, 2>}, {pipeline_mode = #tpu.pipeline_mode<synchronous>, transform_indices = @transform_2, window_bounds = array<i64: 1, 2>}, {pipeline_mode = #tpu.pipeline_mode<synchronous>, transform_indices = @transform_3, window_bounds = array<i64: 1, 2>}, {pipeline_mode = #tpu.pipeline_mode<synchronous>, transform_indices = @transform_4, window_bounds = array<i64: 3, 3, 2, 2>}, {pipeline_mode = #tpu.pipeline_mode<synchronous>, transform_indices = @transform_5, window_bounds = array<i64: 1, 2>}, {pipeline_mode = #tpu.pipeline_mode<synchronous>, transform_indices = @transform_6, window_bounds = array<i64: 1, 2>}, {pipeline_mode = #tpu.pipeline_mode<synchronous>, transform_indices = @transform_7, window_bounds = array<i64: 3, 3, 2, 4>}, {pipeline_mode = #tpu.pipeline_mode<synchronous>, transform_indices = @transform_8, window_bounds = array<i64: 1, 4>}, {pipeline_mode = #tpu.pipeline_mode<synchronous>, transform_indices = @transform_9, window_bounds = array<i64: 1, 4>}, {pipeline_mode = #tpu.pipeline_mode<synchronous>, transform_indices = @transform_10, window_bounds = array<i64: 4, 4, 32>}, {pipeline_mode = #tpu.pipeline_mode<synchronous>, transform_indices = @transform_11, window_bounds = array<i64: 1, 32>}, {transform_indices = @transform_12, window_bounds = array<i64: 1, 8, 32>}]} {
    %c8_i32 = arith.constant 8 : i32
    %0 = arith.muli %arg1, %c8_i32 : i32
    %c0 = arith.constant 0 : index
    %c0_0 = arith.constant 0 : index
    %c0_1 = arith.constant 0 : index
    %c0_2 = arith.constant 0 : index
    %1 = vector.load %arg2[%c0, %c0_0, %c0_1, %c0_2] : memref<1x1x14x18xf32, #tpu.memory_space<vmem>>, vector<1x1x14x18xf32>
    %2 = vector.shape_cast %1 : vector<1x1x14x18xf32> to vector<14x18xf32>
    %3 = vector.shape_cast %2 : vector<14x18xf32> to vector<14x18x1xf32>
    %c0_3 = arith.constant 0 : index
    %c0_4 = arith.constant 0 : index
    %c0_5 = arith.constant 0 : index
    %4 = vector.load %arg3[%c0_3, %c0_4, %c0_5] : memref<3x3x2xf32, #tpu.memory_space<vmem>>, vector<3x3x2xf32>
    %cst = arith.constant 0.000000e+00 : f32
    %5 = vector.broadcast %cst : f32 to vector<12x16x2xf32>
    %6 = vector.extract_strided_slice %3 {offsets = [0, 0, 0], sizes = [12, 16, 1], strides = [1, 1, 1]} : vector<14x18x1xf32> to vector<12x16x1xf32>
    %7 = vector.extract_strided_slice %4 {offsets = [0, 0, 0], sizes = [1, 1, 2], strides = [1, 1, 1]} : vector<3x3x2xf32> to vector<1x1x2xf32>
    %8 = vector.shape_cast %7 : vector<1x1x2xf32> to vector<2xf32>
    %9 = vector.shape_cast %8 : vector<2xf32> to vector<1x1x2xf32>
    %10 = vector.broadcast %6 : vector<12x16x1xf32> to vector<12x16x2xf32>
    %11 = vector.broadcast %9 : vector<1x1x2xf32> to vector<12x16x2xf32>
    %12 = arith.mulf %10, %11 : vector<12x16x2xf32>
    %13 = arith.addf %5, %12 : vector<12x16x2xf32>
    %14 = vector.extract_strided_slice %3 {offsets = [0, 1, 0], sizes = [12, 16, 1], strides = [1, 1, 1]} : vector<14x18x1xf32> to vector<12x16x1xf32>
    %15 = vector.extract_strided_slice %4 {offsets = [0, 1, 0], sizes = [1, 1, 2], strides = [1, 1, 1]} : vector<3x3x2xf32> to vector<1x1x2xf32>
    %16 = vector.shape_cast %15 : vector<1x1x2xf32> to vector<2xf32>
    %17 = vector.shape_cast %16 : vector<2xf32> to vector<1x1x2xf32>
    %18 = vector.broadcast %14 : vector<12x16x1xf32> to vector<12x16x2xf32>
    %19 = vector.broadcast %17 : vector<1x1x2xf32> to vector<12x16x2xf32>
    %20 = arith.mulf %18, %19 : vector<12x16x2xf32>
    %21 = arith.addf %13, %20 : vector<12x16x2xf32>
    %22 = vector.extract_strided_slice %3 {offsets = [0, 2, 0], sizes = [12, 16, 1], strides = [1, 1, 1]} : vector<14x18x1xf32> to vector<12x16x1xf32>
    %23 = vector.extract_strided_slice %4 {offsets = [0, 2, 0], sizes = [1, 1, 2], strides = [1, 1, 1]} : vector<3x3x2xf32> to vector<1x1x2xf32>
    %24 = vector.shape_cast %23 : vector<1x1x2xf32> to vector<2xf32>
    %25 = vector.shape_cast %24 : vector<2xf32> to vector<1x1x2xf32>
    %26 = vector.broadcast %22 : vector<12x16x1xf32> to vector<12x16x2xf32>
    %27 = vector.broadcast %25 : vector<1x1x2xf32> to vector<12x16x2xf32>
    %28 = arith.mulf %26, %27 : vector<12x16x2xf32>
    %29 = arith.addf %21, %28 : vector<12x16x2xf32>
    %30 = vector.extract_strided_slice %3 {offsets = [1, 0, 0], sizes = [12, 16, 1], strides = [1, 1, 1]} : vector<14x18x1xf32> to vector<12x16x1xf32>
    %31 = vector.extract_strided_slice %4 {offsets = [1, 0, 0], sizes = [1, 1, 2], strides = [1, 1, 1]} : vector<3x3x2xf32> to vector<1x1x2xf32>
    %32 = vector.shape_cast %31 : vector<1x1x2xf32> to vector<2xf32>
    %33 = vector.shape_cast %32 : vector<2xf32> to vector<1x1x2xf32>
    %34 = vector.broadcast %30 : vector<12x16x1xf32> to vector<12x16x2xf32>
    %35 = vector.broadcast %33 : vector<1x1x2xf32> to vector<12x16x2xf32>
    %36 = arith.mulf %34, %35 : vector<12x16x2xf32>
    %37 = arith.addf %29, %36 : vector<12x16x2xf32>
    %38 = vector.extract_strided_slice %3 {offsets = [1, 1, 0], sizes = [12, 16, 1], strides = [1, 1, 1]} : vector<14x18x1xf32> to vector<12x16x1xf32>
    %39 = vector.extract_strided_slice %4 {offsets = [1, 1, 0], sizes = [1, 1, 2], strides = [1, 1, 1]} : vector<3x3x2xf32> to vector<1x1x2xf32>
    %40 = vector.shape_cast %39 : vector<1x1x2xf32> to vector<2xf32>
    %41 = vector.shape_cast %40 : vector<2xf32> to vector<1x1x2xf32>
    %42 = vector.broadcast %38 : vector<12x16x1xf32> to vector<12x16x2xf32>
    %43 = vector.broadcast %41 : vector<1x1x2xf32> to vector<12x16x2xf32>
    %44 = arith.mulf %42, %43 : vector<12x16x2xf32>
    %45 = arith.addf %37, %44 : vector<12x16x2xf32>
    %46 = vector.extract_strided_slice %3 {offsets = [1, 2, 0], sizes = [12, 16, 1], strides = [1, 1, 1]} : vector<14x18x1xf32> to vector<12x16x1xf32>
    %47 = vector.extract_strided_slice %4 {offsets = [1, 2, 0], sizes = [1, 1, 2], strides = [1, 1, 1]} : vector<3x3x2xf32> to vector<1x1x2xf32>
    %48 = vector.shape_cast %47 : vector<1x1x2xf32> to vector<2xf32>
    %49 = vector.shape_cast %48 : vector<2xf32> to vector<1x1x2xf32>
    %50 = vector.broadcast %46 : vector<12x16x1xf32> to vector<12x16x2xf32>
    %51 = vector.broadcast %49 : vector<1x1x2xf32> to vector<12x16x2xf32>
    %52 = arith.mulf %50, %51 : vector<12x16x2xf32>
    %53 = arith.addf %45, %52 : vector<12x16x2xf32>
    %54 = vector.extract_strided_slice %3 {offsets = [2, 0, 0], sizes = [12, 16, 1], strides = [1, 1, 1]} : vector<14x18x1xf32> to vector<12x16x1xf32>
    %55 = vector.extract_strided_slice %4 {offsets = [2, 0, 0], sizes = [1, 1, 2], strides = [1, 1, 1]} : vector<3x3x2xf32> to vector<1x1x2xf32>
    %56 = vector.shape_cast %55 : vector<1x1x2xf32> to vector<2xf32>
    %57 = vector.shape_cast %56 : vector<2xf32> to vector<1x1x2xf32>
    %58 = vector.broadcast %54 : vector<12x16x1xf32> to vector<12x16x2xf32>
    %59 = vector.broadcast %57 : vector<1x1x2xf32> to vector<12x16x2xf32>
    %60 = arith.mulf %58, %59 : vector<12x16x2xf32>
    %61 = arith.addf %53, %60 : vector<12x16x2xf32>
    %62 = vector.extract_strided_slice %3 {offsets = [2, 1, 0], sizes = [12, 16, 1], strides = [1, 1, 1]} : vector<14x18x1xf32> to vector<12x16x1xf32>
    %63 = vector.extract_strided_slice %4 {offsets = [2, 1, 0], sizes = [1, 1, 2], strides = [1, 1, 1]} : vector<3x3x2xf32> to vector<1x1x2xf32>
    %64 = vector.shape_cast %63 : vector<1x1x2xf32> to vector<2xf32>
    %65 = vector.shape_cast %64 : vector<2xf32> to vector<1x1x2xf32>
    %66 = vector.broadcast %62 : vector<12x16x1xf32> to vector<12x16x2xf32>
    %67 = vector.broadcast %65 : vector<1x1x2xf32> to vector<12x16x2xf32>
    %68 = arith.mulf %66, %67 : vector<12x16x2xf32>
    %69 = arith.addf %61, %68 : vector<12x16x2xf32>
    %70 = vector.extract_strided_slice %3 {offsets = [2, 2, 0], sizes = [12, 16, 1], strides = [1, 1, 1]} : vector<14x18x1xf32> to vector<12x16x1xf32>
    %71 = vector.extract_strided_slice %4 {offsets = [2, 2, 0], sizes = [1, 1, 2], strides = [1, 1, 1]} : vector<3x3x2xf32> to vector<1x1x2xf32>
    %72 = vector.shape_cast %71 : vector<1x1x2xf32> to vector<2xf32>
    %73 = vector.shape_cast %72 : vector<2xf32> to vector<1x1x2xf32>
    %74 = vector.broadcast %70 : vector<12x16x1xf32> to vector<12x16x2xf32>
    %75 = vector.broadcast %73 : vector<1x1x2xf32> to vector<12x16x2xf32>
    %76 = arith.mulf %74, %75 : vector<12x16x2xf32>
    %77 = arith.addf %69, %76 : vector<12x16x2xf32>
    %c0_6 = arith.constant 0 : index
    %c0_7 = arith.constant 0 : index
    %78 = vector.load %arg4[%c0_6, %c0_7] : memref<1x2xf32, #tpu.memory_space<vmem>>, vector<1x2xf32>
    %79 = vector.shape_cast %78 : vector<1x2xf32> to vector<1x1x2xf32>
    %80 = vector.broadcast %79 : vector<1x1x2xf32> to vector<12x16x2xf32>
    %81 = arith.mulf %77, %80 : vector<12x16x2xf32>
    %c0_8 = arith.constant 0 : index
    %c0_9 = arith.constant 0 : index
    %82 = vector.load %arg5[%c0_8, %c0_9] : memref<1x2xf32, #tpu.memory_space<vmem>>, vector<1x2xf32>
    %83 = vector.shape_cast %82 : vector<1x2xf32> to vector<1x1x2xf32>
    %84 = vector.broadcast %83 : vector<1x1x2xf32> to vector<12x16x2xf32>
    %85 = arith.addf %81, %84 : vector<12x16x2xf32>
    %cst_10 = arith.constant 0.000000e+00 : f32
    %86 = vector.broadcast %cst_10 : f32 to vector<12x16x2xf32>
    %87 = arith.maximumf %85, %86 : vector<12x16x2xf32>
    %c2_i32 = arith.constant 2 : i32
    %88 = arith.subi %0, %c2_i32 : i32
    %89 = tpu.iota {dimensions = array<i32: 0>} : vector<12x1x1xi32>
    %90 = vector.broadcast %88 : i32 to vector<12x1x1xi32>
    %91 = arith.addi %90, %89 : vector<12x1x1xi32>
    %c0_i32 = arith.constant 0 : i32
    %92 = vector.broadcast %c0_i32 : i32 to vector<12x1x1xi32>
    %93 = arith.cmpi sge, %91, %92 : vector<12x1x1xi32>
    %c8_i32_11 = arith.constant 8 : i32
    %94 = vector.broadcast %c8_i32_11 : i32 to vector<12x1x1xi32>
    %95 = arith.cmpi slt, %91, %94 : vector<12x1x1xi32>
    %96 = arith.andi %93, %95 : vector<12x1x1xi1>
    %cst_12 = arith.constant 0.000000e+00 : f32
    %97 = vector.shape_cast %96 : vector<12x1x1xi1> to vector<12x1x1xi1>
    %98 = vector.broadcast %97 : vector<12x1x1xi1> to vector<12x16x2xi1>
    %99 = vector.broadcast %cst_12 : f32 to vector<12x16x2xf32>
    %100 = arith.select %98, %87, %99 : vector<12x16x2xi1>, vector<12x16x2xf32>
    %cst_13 = arith.constant 0.000000e+00 : f32
    %101 = vector.broadcast %cst_13 : f32 to vector<12x1x2xf32>
    %c0_14 = arith.constant 0 : index
    %c0_15 = arith.constant 0 : index
    %c0_16 = arith.constant 0 : index
    %102 = vector.load %arg15[%c0_14, %c0_15, %c0_16] : memref<12x18x2xf32, #tpu.memory_space<vmem>>, vector<12x1x2xf32>
    tpu.vector_store %arg15[%c0_14, %c0_15, %c0_16], %101 {strides = array<i32>} : memref<12x18x2xf32, #tpu.memory_space<vmem>>, vector<12x1x2xf32>,
    %c0_17 = arith.constant 0 : index
    %c17 = arith.constant 17 : index
    %c0_18 = arith.constant 0 : index
    %103 = vector.load %arg15[%c0_17, %c17, %c0_18] : memref<12x18x2xf32, #tpu.memory_space<vmem>>, vector<12x1x2xf32>
    tpu.vector_store %arg15[%c0_17, %c17, %c0_18], %101 {strides = array<i32>} : memref<12x18x2xf32, #tpu.memory_space<vmem>>, vector<12x1x2xf32>,
    %c0_19 = arith.constant 0 : index
    %c1 = arith.constant 1 : index
    %c0_20 = arith.constant 0 : index
    %104 = vector.load %arg15[%c0_19, %c1, %c0_20] : memref<12x18x2xf32, #tpu.memory_space<vmem>>, vector<12x16x2xf32>
    tpu.vector_store %arg15[%c0_19, %c1, %c0_20], %100 {strides = array<i32>} : memref<12x18x2xf32, #tpu.memory_space<vmem>>, vector<12x16x2xf32>,
    %cst_21 = arith.constant 0.000000e+00 : f32
    %105 = vector.broadcast %cst_21 : f32 to vector<160x2xf32>
    %c0_22 = arith.constant 0 : index
    %c0_23 = arith.constant 0 : index
    %c0_24 = arith.constant 0 : index
    %106 = vector.load %arg15[%c0_22, %c0_23, %c0_24] : memref<12x18x2xf32, #tpu.memory_space<vmem>>, vector<10x16x2xf32>
    %107 = vector.shape_cast %106 : vector<10x16x2xf32> to vector<160x2xf32>
    %c0_25 = arith.constant 0 : index
    %c0_26 = arith.constant 0 : index
    %c0_27 = arith.constant 0 : index
    %c0_28 = arith.constant 0 : index
    %108 = vector.load %arg6[%c0_25, %c0_26, %c0_27, %c0_28] : memref<3x3x2x2xf32, #tpu.memory_space<vmem>>, vector<1x1x2x2xf32>
    %109 = vector.shape_cast %108 : vector<1x1x2x2xf32> to vector<2x2xf32>
    %cst_29 = arith.constant dense<0.000000e+00> : vector<160x2xf32>
    %110 = tpu.matmul %107, %109, %cst_29 {dimension_numbers = #tpu.dot_dimension_numbers<[1], [0], [0], [1], [0, 0, 1, 1], [], []>} : vector<160x2xf32>, vector<2x2xf32>, vector<160x2xf32> -> vector<160x2xf32>
    %111 = arith.addf %105, %110 : vector<160x2xf32>
    %c0_30 = arith.constant 0 : index
    %c1_31 = arith.constant 1 : index
    %c0_32 = arith.constant 0 : index
    %112 = vector.load %arg15[%c0_30, %c1_31, %c0_32] : memref<12x18x2xf32, #tpu.memory_space<vmem>>, vector<10x16x2xf32>
    %113 = vector.shape_cast %112 : vector<10x16x2xf32> to vector<160x2xf32>
    %c0_33 = arith.constant 0 : index
    %c1_34 = arith.constant 1 : index
    %c0_35 = arith.constant 0 : index
    %c0_36 = arith.constant 0 : index
    %114 = vector.load %arg6[%c0_33, %c1_34, %c0_35, %c0_36] : memref<3x3x2x2xf32, #tpu.memory_space<vmem>>, vector<1x1x2x2xf32>
    %115 = vector.shape_cast %114 : vector<1x1x2x2xf32> to vector<2x2xf32>
    %cst_37 = arith.constant dense<0.000000e+00> : vector<160x2xf32>
    %116 = tpu.matmul %113, %115, %cst_37 {dimension_numbers = #tpu.dot_dimension_numbers<[1], [0], [0], [1], [0, 0, 1, 1], [], []>} : vector<160x2xf32>, vector<2x2xf32>, vector<160x2xf32> -> vector<160x2xf32>
    %117 = arith.addf %111, %116 : vector<160x2xf32>
    %c0_38 = arith.constant 0 : index
    %c2 = arith.constant 2 : index
    %c0_39 = arith.constant 0 : index
    %118 = vector.load %arg15[%c0_38, %c2, %c0_39] : memref<12x18x2xf32, #tpu.memory_space<vmem>>, vector<10x16x2xf32>
    %119 = vector.shape_cast %118 : vector<10x16x2xf32> to vector<160x2xf32>
    %c0_40 = arith.constant 0 : index
    %c2_41 = arith.constant 2 : index
    %c0_42 = arith.constant 0 : index
    %c0_43 = arith.constant 0 : index
    %120 = vector.load %arg6[%c0_40, %c2_41, %c0_42, %c0_43] : memref<3x3x2x2xf32, #tpu.memory_space<vmem>>, vector<1x1x2x2xf32>
    %121 = vector.shape_cast %120 : vector<1x1x2x2xf32> to vector<2x2xf32>
    %cst_44 = arith.constant dense<0.000000e+00> : vector<160x2xf32>
    %122 = tpu.matmul %119, %121, %cst_44 {dimension_numbers = #tpu.dot_dimension_numbers<[1], [0], [0], [1], [0, 0, 1, 1], [], []>} : vector<160x2xf32>, vector<2x2xf32>, vector<160x2xf32> -> vector<160x2xf32>
    %123 = arith.addf %117, %122 : vector<160x2xf32>
    %c1_45 = arith.constant 1 : index
    %c0_46 = arith.constant 0 : index
    %c0_47 = arith.constant 0 : index
    %124 = vector.load %arg15[%c1_45, %c0_46, %c0_47] : memref<12x18x2xf32, #tpu.memory_space<vmem>>, vector<10x16x2xf32>
    %125 = vector.shape_cast %124 : vector<10x16x2xf32> to vector<160x2xf32>
    %c1_48 = arith.constant 1 : index
    %c0_49 = arith.constant 0 : index
    %c0_50 = arith.constant 0 : index
    %c0_51 = arith.constant 0 : index
    %126 = vector.load %arg6[%c1_48, %c0_49, %c0_50, %c0_51] : memref<3x3x2x2xf32, #tpu.memory_space<vmem>>, vector<1x1x2x2xf32>
    %127 = vector.shape_cast %126 : vector<1x1x2x2xf32> to vector<2x2xf32>
    %cst_52 = arith.constant dense<0.000000e+00> : vector<160x2xf32>
    %128 = tpu.matmul %125, %127, %cst_52 {dimension_numbers = #tpu.dot_dimension_numbers<[1], [0], [0], [1], [0, 0, 1, 1], [], []>} : vector<160x2xf32>, vector<2x2xf32>, vector<160x2xf32> -> vector<160x2xf32>
    %129 = arith.addf %123, %128 : vector<160x2xf32>
    %c1_53 = arith.constant 1 : index
    %c1_54 = arith.constant 1 : index
    %c0_55 = arith.constant 0 : index
    %130 = vector.load %arg15[%c1_53, %c1_54, %c0_55] : memref<12x18x2xf32, #tpu.memory_space<vmem>>, vector<10x16x2xf32>
    %131 = vector.shape_cast %130 : vector<10x16x2xf32> to vector<160x2xf32>
    %c1_56 = arith.constant 1 : index
    %c1_57 = arith.constant 1 : index
    %c0_58 = arith.constant 0 : index
    %c0_59 = arith.constant 0 : index
    %132 = vector.load %arg6[%c1_56, %c1_57, %c0_58, %c0_59] : memref<3x3x2x2xf32, #tpu.memory_space<vmem>>, vector<1x1x2x2xf32>
    %133 = vector.shape_cast %132 : vector<1x1x2x2xf32> to vector<2x2xf32>
    %cst_60 = arith.constant dense<0.000000e+00> : vector<160x2xf32>
    %134 = tpu.matmul %131, %133, %cst_60 {dimension_numbers = #tpu.dot_dimension_numbers<[1], [0], [0], [1], [0, 0, 1, 1], [], []>} : vector<160x2xf32>, vector<2x2xf32>, vector<160x2xf32> -> vector<160x2xf32>
    %135 = arith.addf %129, %134 : vector<160x2xf32>
    %c1_61 = arith.constant 1 : index
    %c2_62 = arith.constant 2 : index
    %c0_63 = arith.constant 0 : index
    %136 = vector.load %arg15[%c1_61, %c2_62, %c0_63] : memref<12x18x2xf32, #tpu.memory_space<vmem>>, vector<10x16x2xf32>
    %137 = vector.shape_cast %136 : vector<10x16x2xf32> to vector<160x2xf32>
    %c1_64 = arith.constant 1 : index
    %c2_65 = arith.constant 2 : index
    %c0_66 = arith.constant 0 : index
    %c0_67 = arith.constant 0 : index
    %138 = vector.load %arg6[%c1_64, %c2_65, %c0_66, %c0_67] : memref<3x3x2x2xf32, #tpu.memory_space<vmem>>, vector<1x1x2x2xf32>
    %139 = vector.shape_cast %138 : vector<1x1x2x2xf32> to vector<2x2xf32>
    %cst_68 = arith.constant dense<0.000000e+00> : vector<160x2xf32>
    %140 = tpu.matmul %137, %139, %cst_68 {dimension_numbers = #tpu.dot_dimension_numbers<[1], [0], [0], [1], [0, 0, 1, 1], [], []>} : vector<160x2xf32>, vector<2x2xf32>, vector<160x2xf32> -> vector<160x2xf32>
    %141 = arith.addf %135, %140 : vector<160x2xf32>
    %c2_69 = arith.constant 2 : index
    %c0_70 = arith.constant 0 : index
    %c0_71 = arith.constant 0 : index
    %142 = vector.load %arg15[%c2_69, %c0_70, %c0_71] : memref<12x18x2xf32, #tpu.memory_space<vmem>>, vector<10x16x2xf32>
    %143 = vector.shape_cast %142 : vector<10x16x2xf32> to vector<160x2xf32>
    %c2_72 = arith.constant 2 : index
    %c0_73 = arith.constant 0 : index
    %c0_74 = arith.constant 0 : index
    %c0_75 = arith.constant 0 : index
    %144 = vector.load %arg6[%c2_72, %c0_73, %c0_74, %c0_75] : memref<3x3x2x2xf32, #tpu.memory_space<vmem>>, vector<1x1x2x2xf32>
    %145 = vector.shape_cast %144 : vector<1x1x2x2xf32> to vector<2x2xf32>
    %cst_76 = arith.constant dense<0.000000e+00> : vector<160x2xf32>
    %146 = tpu.matmul %143, %145, %cst_76 {dimension_numbers = #tpu.dot_dimension_numbers<[1], [0], [0], [1], [0, 0, 1, 1], [], []>} : vector<160x2xf32>, vector<2x2xf32>, vector<160x2xf32> -> vector<160x2xf32>
    %147 = arith.addf %141, %146 : vector<160x2xf32>
    %c2_77 = arith.constant 2 : index
    %c1_78 = arith.constant 1 : index
    %c0_79 = arith.constant 0 : index
    %148 = vector.load %arg15[%c2_77, %c1_78, %c0_79] : memref<12x18x2xf32, #tpu.memory_space<vmem>>, vector<10x16x2xf32>
    %149 = vector.shape_cast %148 : vector<10x16x2xf32> to vector<160x2xf32>
    %c2_80 = arith.constant 2 : index
    %c1_81 = arith.constant 1 : index
    %c0_82 = arith.constant 0 : index
    %c0_83 = arith.constant 0 : index
    %150 = vector.load %arg6[%c2_80, %c1_81, %c0_82, %c0_83] : memref<3x3x2x2xf32, #tpu.memory_space<vmem>>, vector<1x1x2x2xf32>
    %151 = vector.shape_cast %150 : vector<1x1x2x2xf32> to vector<2x2xf32>
    %cst_84 = arith.constant dense<0.000000e+00> : vector<160x2xf32>
    %152 = tpu.matmul %149, %151, %cst_84 {dimension_numbers = #tpu.dot_dimension_numbers<[1], [0], [0], [1], [0, 0, 1, 1], [], []>} : vector<160x2xf32>, vector<2x2xf32>, vector<160x2xf32> -> vector<160x2xf32>
    %153 = arith.addf %147, %152 : vector<160x2xf32>
    %c2_85 = arith.constant 2 : index
    %c2_86 = arith.constant 2 : index
    %c0_87 = arith.constant 0 : index
    %154 = vector.load %arg15[%c2_85, %c2_86, %c0_87] : memref<12x18x2xf32, #tpu.memory_space<vmem>>, vector<10x16x2xf32>
    %155 = vector.shape_cast %154 : vector<10x16x2xf32> to vector<160x2xf32>
    %c2_88 = arith.constant 2 : index
    %c2_89 = arith.constant 2 : index
    %c0_90 = arith.constant 0 : index
    %c0_91 = arith.constant 0 : index
    %156 = vector.load %arg6[%c2_88, %c2_89, %c0_90, %c0_91] : memref<3x3x2x2xf32, #tpu.memory_space<vmem>>, vector<1x1x2x2xf32>
    %157 = vector.shape_cast %156 : vector<1x1x2x2xf32> to vector<2x2xf32>
    %cst_92 = arith.constant dense<0.000000e+00> : vector<160x2xf32>
    %158 = tpu.matmul %155, %157, %cst_92 {dimension_numbers = #tpu.dot_dimension_numbers<[1], [0], [0], [1], [0, 0, 1, 1], [], []>} : vector<160x2xf32>, vector<2x2xf32>, vector<160x2xf32> -> vector<160x2xf32>
    %159 = arith.addf %153, %158 : vector<160x2xf32>
    %c0_93 = arith.constant 0 : index
    %c0_94 = arith.constant 0 : index
    %160 = vector.load %arg7[%c0_93, %c0_94] : memref<1x2xf32, #tpu.memory_space<vmem>>, vector<1x2xf32>
    %161 = vector.broadcast %160 : vector<1x2xf32> to vector<160x2xf32>
    %162 = arith.mulf %159, %161 : vector<160x2xf32>
    %c0_95 = arith.constant 0 : index
    %c0_96 = arith.constant 0 : index
    %163 = vector.load %arg8[%c0_95, %c0_96] : memref<1x2xf32, #tpu.memory_space<vmem>>, vector<1x2xf32>
    %164 = vector.broadcast %163 : vector<1x2xf32> to vector<160x2xf32>
    %165 = arith.addf %162, %164 : vector<160x2xf32>
    %cst_97 = arith.constant 0.000000e+00 : f32
    %166 = vector.broadcast %cst_97 : f32 to vector<160x2xf32>
    %167 = arith.maximumf %165, %166 : vector<160x2xf32>
    %168 = vector.shape_cast %167 : vector<160x2xf32> to vector<10x16x2xf32>
    %c0_98 = arith.constant 0 : index
    %c0_99 = arith.constant 0 : index
    %c0_100 = arith.constant 0 : index
    %169 = vector.load %arg16[%c0_98, %c0_99, %c0_100] : memref<10x16x2xf32, #tpu.memory_space<vmem>>, vector<10x16x2xf32>
    tpu.vector_store %arg16[%c0_98, %c0_99, %c0_100], %168 {strides = array<i32>} : memref<10x16x2xf32, #tpu.memory_space<vmem>>, vector<10x16x2xf32>,
    %c0_101 = arith.constant 0 : index
    %c0_102 = arith.constant 0 : index
    %c0_103 = arith.constant 0 : index
    %170 = tpu.strided_load %arg16[%c0_101, %c0_102, %c0_103] {strides = array<i32: 1, 2, 1>} : memref<10x16x2xf32, #tpu.memory_space<vmem>>, vector<10x8x2xf32>
    %c0_104 = arith.constant 0 : index
    %c1_105 = arith.constant 1 : index
    %c0_106 = arith.constant 0 : index
    %171 = tpu.strided_load %arg16[%c0_104, %c1_105, %c0_106] {strides = array<i32: 1, 2, 1>} : memref<10x16x2xf32, #tpu.memory_space<vmem>>, vector<10x8x2xf32>
    %172 = arith.maximumf %170, %171 : vector<10x8x2xf32>
    %c1_i32 = arith.constant 1 : i32
    %173 = arith.subi %0, %c1_i32 : i32
    %174 = tpu.iota {dimensions = array<i32: 0>} : vector<10x1x1xi32>
    %175 = vector.broadcast %173 : i32 to vector<10x1x1xi32>
    %176 = arith.addi %175, %174 : vector<10x1x1xi32>
    %c0_i32_107 = arith.constant 0 : i32
    %177 = vector.broadcast %c0_i32_107 : i32 to vector<10x1x1xi32>
    %178 = arith.cmpi sge, %176, %177 : vector<10x1x1xi32>
    %c8_i32_108 = arith.constant 8 : i32
    %179 = vector.broadcast %c8_i32_108 : i32 to vector<10x1x1xi32>
    %180 = arith.cmpi slt, %176, %179 : vector<10x1x1xi32>
    %181 = arith.andi %178, %180 : vector<10x1x1xi1>
    %cst_109 = arith.constant 0.000000e+00 : f32
    %182 = vector.shape_cast %181 : vector<10x1x1xi1> to vector<10x1x1xi1>
    %183 = vector.broadcast %182 : vector<10x1x1xi1> to vector<10x8x2xi1>
    %184 = vector.broadcast %cst_109 : f32 to vector<10x8x2xf32>
    %185 = arith.select %183, %172, %184 : vector<10x8x2xi1>, vector<10x8x2xf32>
    %cst_110 = arith.constant 0.000000e+00 : f32
    %186 = vector.broadcast %cst_110 : f32 to vector<10x1x2xf32>
    %c0_111 = arith.constant 0 : index
    %c0_112 = arith.constant 0 : index
    %c0_113 = arith.constant 0 : index
    %187 = vector.load %arg17[%c0_111, %c0_112, %c0_113] : memref<10x10x2xf32, #tpu.memory_space<vmem>>, vector<10x1x2xf32>
    tpu.vector_store %arg17[%c0_111, %c0_112, %c0_113], %186 {strides = array<i32>} : memref<10x10x2xf32, #tpu.memory_space<vmem>>, vector<10x1x2xf32>,
    %c0_114 = arith.constant 0 : index
    %c9 = arith.constant 9 : index
    %c0_115 = arith.constant 0 : index
    %188 = vector.load %arg17[%c0_114, %c9, %c0_115] : memref<10x10x2xf32, #tpu.memory_space<vmem>>, vector<10x1x2xf32>
    tpu.vector_store %arg17[%c0_114, %c9, %c0_115], %186 {strides = array<i32>} : memref<10x10x2xf32, #tpu.memory_space<vmem>>, vector<10x1x2xf32>,
    %c0_116 = arith.constant 0 : index
    %c1_117 = arith.constant 1 : index
    %c0_118 = arith.constant 0 : index
    %189 = vector.load %arg17[%c0_116, %c1_117, %c0_118] : memref<10x10x2xf32, #tpu.memory_space<vmem>>, vector<10x8x2xf32>
    tpu.vector_store %arg17[%c0_116, %c1_117, %c0_118], %185 {strides = array<i32>} : memref<10x10x2xf32, #tpu.memory_space<vmem>>, vector<10x8x2xf32>,
    %cst_119 = arith.constant 0.000000e+00 : f32
    %190 = vector.broadcast %cst_119 : f32 to vector<64x4xf32>
    %c0_120 = arith.constant 0 : index
    %c0_121 = arith.constant 0 : index
    %c0_122 = arith.constant 0 : index
    %191 = vector.load %arg17[%c0_120, %c0_121, %c0_122] : memref<10x10x2xf32, #tpu.memory_space<vmem>>, vector<8x8x2xf32>
    %192 = vector.shape_cast %191 : vector<8x8x2xf32> to vector<64x2xf32>
    %c0_123 = arith.constant 0 : index
    %c0_124 = arith.constant 0 : index
    %c0_125 = arith.constant 0 : index
    %c0_126 = arith.constant 0 : index
    %193 = vector.load %arg9[%c0_123, %c0_124, %c0_125, %c0_126] : memref<3x3x2x4xf32, #tpu.memory_space<vmem>>, vector<1x1x2x4xf32>
    %194 = vector.shape_cast %193 : vector<1x1x2x4xf32> to vector<2x4xf32>
    %cst_127 = arith.constant dense<0.000000e+00> : vector<64x4xf32>
    %195 = tpu.matmul %192, %194, %cst_127 {dimension_numbers = #tpu.dot_dimension_numbers<[1], [0], [0], [1], [0, 0, 1, 1], [], []>} : vector<64x2xf32>, vector<2x4xf32>, vector<64x4xf32> -> vector<64x4xf32>
    %196 = arith.addf %190, %195 : vector<64x4xf32>
    %c0_128 = arith.constant 0 : index
    %c1_129 = arith.constant 1 : index
    %c0_130 = arith.constant 0 : index
    %197 = vector.load %arg17[%c0_128, %c1_129, %c0_130] : memref<10x10x2xf32, #tpu.memory_space<vmem>>, vector<8x8x2xf32>
    %198 = vector.shape_cast %197 : vector<8x8x2xf32> to vector<64x2xf32>
    %c0_131 = arith.constant 0 : index
    %c1_132 = arith.constant 1 : index
    %c0_133 = arith.constant 0 : index
    %c0_134 = arith.constant 0 : index
    %199 = vector.load %arg9[%c0_131, %c1_132, %c0_133, %c0_134] : memref<3x3x2x4xf32, #tpu.memory_space<vmem>>, vector<1x1x2x4xf32>
    %200 = vector.shape_cast %199 : vector<1x1x2x4xf32> to vector<2x4xf32>
    %cst_135 = arith.constant dense<0.000000e+00> : vector<64x4xf32>
    %201 = tpu.matmul %198, %200, %cst_135 {dimension_numbers = #tpu.dot_dimension_numbers<[1], [0], [0], [1], [0, 0, 1, 1], [], []>} : vector<64x2xf32>, vector<2x4xf32>, vector<64x4xf32> -> vector<64x4xf32>
    %202 = arith.addf %196, %201 : vector<64x4xf32>
    %c0_136 = arith.constant 0 : index
    %c2_137 = arith.constant 2 : index
    %c0_138 = arith.constant 0 : index
    %203 = vector.load %arg17[%c0_136, %c2_137, %c0_138] : memref<10x10x2xf32, #tpu.memory_space<vmem>>, vector<8x8x2xf32>
    %204 = vector.shape_cast %203 : vector<8x8x2xf32> to vector<64x2xf32>
    %c0_139 = arith.constant 0 : index
    %c2_140 = arith.constant 2 : index
    %c0_141 = arith.constant 0 : index
    %c0_142 = arith.constant 0 : index
    %205 = vector.load %arg9[%c0_139, %c2_140, %c0_141, %c0_142] : memref<3x3x2x4xf32, #tpu.memory_space<vmem>>, vector<1x1x2x4xf32>
    %206 = vector.shape_cast %205 : vector<1x1x2x4xf32> to vector<2x4xf32>
    %cst_143 = arith.constant dense<0.000000e+00> : vector<64x4xf32>
    %207 = tpu.matmul %204, %206, %cst_143 {dimension_numbers = #tpu.dot_dimension_numbers<[1], [0], [0], [1], [0, 0, 1, 1], [], []>} : vector<64x2xf32>, vector<2x4xf32>, vector<64x4xf32> -> vector<64x4xf32>
    %208 = arith.addf %202, %207 : vector<64x4xf32>
    %c1_144 = arith.constant 1 : index
    %c0_145 = arith.constant 0 : index
    %c0_146 = arith.constant 0 : index
    %209 = vector.load %arg17[%c1_144, %c0_145, %c0_146] : memref<10x10x2xf32, #tpu.memory_space<vmem>>, vector<8x8x2xf32>
    %210 = vector.shape_cast %209 : vector<8x8x2xf32> to vector<64x2xf32>
    %c1_147 = arith.constant 1 : index
    %c0_148 = arith.constant 0 : index
    %c0_149 = arith.constant 0 : index
    %c0_150 = arith.constant 0 : index
    %211 = vector.load %arg9[%c1_147, %c0_148, %c0_149, %c0_150] : memref<3x3x2x4xf32, #tpu.memory_space<vmem>>, vector<1x1x2x4xf32>
    %212 = vector.shape_cast %211 : vector<1x1x2x4xf32> to vector<2x4xf32>
    %cst_151 = arith.constant dense<0.000000e+00> : vector<64x4xf32>
    %213 = tpu.matmul %210, %212, %cst_151 {dimension_numbers = #tpu.dot_dimension_numbers<[1], [0], [0], [1], [0, 0, 1, 1], [], []>} : vector<64x2xf32>, vector<2x4xf32>, vector<64x4xf32> -> vector<64x4xf32>
    %214 = arith.addf %208, %213 : vector<64x4xf32>
    %c1_152 = arith.constant 1 : index
    %c1_153 = arith.constant 1 : index
    %c0_154 = arith.constant 0 : index
    %215 = vector.load %arg17[%c1_152, %c1_153, %c0_154] : memref<10x10x2xf32, #tpu.memory_space<vmem>>, vector<8x8x2xf32>
    %216 = vector.shape_cast %215 : vector<8x8x2xf32> to vector<64x2xf32>
    %c1_155 = arith.constant 1 : index
    %c1_156 = arith.constant 1 : index
    %c0_157 = arith.constant 0 : index
    %c0_158 = arith.constant 0 : index
    %217 = vector.load %arg9[%c1_155, %c1_156, %c0_157, %c0_158] : memref<3x3x2x4xf32, #tpu.memory_space<vmem>>, vector<1x1x2x4xf32>
    %218 = vector.shape_cast %217 : vector<1x1x2x4xf32> to vector<2x4xf32>
    %cst_159 = arith.constant dense<0.000000e+00> : vector<64x4xf32>
    %219 = tpu.matmul %216, %218, %cst_159 {dimension_numbers = #tpu.dot_dimension_numbers<[1], [0], [0], [1], [0, 0, 1, 1], [], []>} : vector<64x2xf32>, vector<2x4xf32>, vector<64x4xf32> -> vector<64x4xf32>
    %220 = arith.addf %214, %219 : vector<64x4xf32>
    %c1_160 = arith.constant 1 : index
    %c2_161 = arith.constant 2 : index
    %c0_162 = arith.constant 0 : index
    %221 = vector.load %arg17[%c1_160, %c2_161, %c0_162] : memref<10x10x2xf32, #tpu.memory_space<vmem>>, vector<8x8x2xf32>
    %222 = vector.shape_cast %221 : vector<8x8x2xf32> to vector<64x2xf32>
    %c1_163 = arith.constant 1 : index
    %c2_164 = arith.constant 2 : index
    %c0_165 = arith.constant 0 : index
    %c0_166 = arith.constant 0 : index
    %223 = vector.load %arg9[%c1_163, %c2_164, %c0_165, %c0_166] : memref<3x3x2x4xf32, #tpu.memory_space<vmem>>, vector<1x1x2x4xf32>
    %224 = vector.shape_cast %223 : vector<1x1x2x4xf32> to vector<2x4xf32>
    %cst_167 = arith.constant dense<0.000000e+00> : vector<64x4xf32>
    %225 = tpu.matmul %222, %224, %cst_167 {dimension_numbers = #tpu.dot_dimension_numbers<[1], [0], [0], [1], [0, 0, 1, 1], [], []>} : vector<64x2xf32>, vector<2x4xf32>, vector<64x4xf32> -> vector<64x4xf32>
    %226 = arith.addf %220, %225 : vector<64x4xf32>
    %c2_168 = arith.constant 2 : index
    %c0_169 = arith.constant 0 : index
    %c0_170 = arith.constant 0 : index
    %227 = vector.load %arg17[%c2_168, %c0_169, %c0_170] : memref<10x10x2xf32, #tpu.memory_space<vmem>>, vector<8x8x2xf32>
    %228 = vector.shape_cast %227 : vector<8x8x2xf32> to vector<64x2xf32>
    %c2_171 = arith.constant 2 : index
    %c0_172 = arith.constant 0 : index
    %c0_173 = arith.constant 0 : index
    %c0_174 = arith.constant 0 : index
    %229 = vector.load %arg9[%c2_171, %c0_172, %c0_173, %c0_174] : memref<3x3x2x4xf32, #tpu.memory_space<vmem>>, vector<1x1x2x4xf32>
    %230 = vector.shape_cast %229 : vector<1x1x2x4xf32> to vector<2x4xf32>
    %cst_175 = arith.constant dense<0.000000e+00> : vector<64x4xf32>
    %231 = tpu.matmul %228, %230, %cst_175 {dimension_numbers = #tpu.dot_dimension_numbers<[1], [0], [0], [1], [0, 0, 1, 1], [], []>} : vector<64x2xf32>, vector<2x4xf32>, vector<64x4xf32> -> vector<64x4xf32>
    %232 = arith.addf %226, %231 : vector<64x4xf32>
    %c2_176 = arith.constant 2 : index
    %c1_177 = arith.constant 1 : index
    %c0_178 = arith.constant 0 : index
    %233 = vector.load %arg17[%c2_176, %c1_177, %c0_178] : memref<10x10x2xf32, #tpu.memory_space<vmem>>, vector<8x8x2xf32>
    %234 = vector.shape_cast %233 : vector<8x8x2xf32> to vector<64x2xf32>
    %c2_179 = arith.constant 2 : index
    %c1_180 = arith.constant 1 : index
    %c0_181 = arith.constant 0 : index
    %c0_182 = arith.constant 0 : index
    %235 = vector.load %arg9[%c2_179, %c1_180, %c0_181, %c0_182] : memref<3x3x2x4xf32, #tpu.memory_space<vmem>>, vector<1x1x2x4xf32>
    %236 = vector.shape_cast %235 : vector<1x1x2x4xf32> to vector<2x4xf32>
    %cst_183 = arith.constant dense<0.000000e+00> : vector<64x4xf32>
    %237 = tpu.matmul %234, %236, %cst_183 {dimension_numbers = #tpu.dot_dimension_numbers<[1], [0], [0], [1], [0, 0, 1, 1], [], []>} : vector<64x2xf32>, vector<2x4xf32>, vector<64x4xf32> -> vector<64x4xf32>
    %238 = arith.addf %232, %237 : vector<64x4xf32>
    %c2_184 = arith.constant 2 : index
    %c2_185 = arith.constant 2 : index
    %c0_186 = arith.constant 0 : index
    %239 = vector.load %arg17[%c2_184, %c2_185, %c0_186] : memref<10x10x2xf32, #tpu.memory_space<vmem>>, vector<8x8x2xf32>
    %240 = vector.shape_cast %239 : vector<8x8x2xf32> to vector<64x2xf32>
    %c2_187 = arith.constant 2 : index
    %c2_188 = arith.constant 2 : index
    %c0_189 = arith.constant 0 : index
    %c0_190 = arith.constant 0 : index
    %241 = vector.load %arg9[%c2_187, %c2_188, %c0_189, %c0_190] : memref<3x3x2x4xf32, #tpu.memory_space<vmem>>, vector<1x1x2x4xf32>
    %242 = vector.shape_cast %241 : vector<1x1x2x4xf32> to vector<2x4xf32>
    %cst_191 = arith.constant dense<0.000000e+00> : vector<64x4xf32>
    %243 = tpu.matmul %240, %242, %cst_191 {dimension_numbers = #tpu.dot_dimension_numbers<[1], [0], [0], [1], [0, 0, 1, 1], [], []>} : vector<64x2xf32>, vector<2x4xf32>, vector<64x4xf32> -> vector<64x4xf32>
    %244 = arith.addf %238, %243 : vector<64x4xf32>
    %c0_192 = arith.constant 0 : index
    %c0_193 = arith.constant 0 : index
    %245 = vector.load %arg10[%c0_192, %c0_193] : memref<1x4xf32, #tpu.memory_space<vmem>>, vector<1x4xf32>
    %246 = vector.broadcast %245 : vector<1x4xf32> to vector<64x4xf32>
    %247 = arith.mulf %244, %246 : vector<64x4xf32>
    %c0_194 = arith.constant 0 : index
    %c0_195 = arith.constant 0 : index
    %248 = vector.load %arg11[%c0_194, %c0_195] : memref<1x4xf32, #tpu.memory_space<vmem>>, vector<1x4xf32>
    %249 = vector.broadcast %248 : vector<1x4xf32> to vector<64x4xf32>
    %250 = arith.addf %247, %249 : vector<64x4xf32>
    %cst_196 = arith.constant 0.000000e+00 : f32
    %251 = vector.broadcast %cst_196 : f32 to vector<64x4xf32>
    %252 = arith.maximumf %250, %251 : vector<64x4xf32>
    %253 = vector.shape_cast %252 : vector<64x4xf32> to vector<8x8x4xf32>
    %c0_197 = arith.constant 0 : index
    %c0_198 = arith.constant 0 : index
    %c0_199 = arith.constant 0 : index
    %254 = vector.load %arg18[%c0_197, %c0_198, %c0_199] : memref<8x8x4xf32, #tpu.memory_space<vmem>>, vector<8x8x4xf32>
    tpu.vector_store %arg18[%c0_197, %c0_198, %c0_199], %253 {strides = array<i32>} : memref<8x8x4xf32, #tpu.memory_space<vmem>>, vector<8x8x4xf32>,
    %cst_200 = arith.constant 0.000000e+00 : f32
    %255 = vector.broadcast %cst_200 : f32 to vector<8x32xf32>
    %c0_201 = arith.constant 0 : index
    %c0_202 = arith.constant 0 : index
    %c0_203 = arith.constant 0 : index
    %256 = vector.load %arg18[%c0_201, %c0_202, %c0_203] : memref<8x8x4xf32, #tpu.memory_space<vmem>>, vector<8x1x4xf32>
    %257 = vector.shape_cast %256 : vector<8x1x4xf32> to vector<8x4xf32>
    %c0_204 = arith.constant 0 : index
    %c1_205 = arith.constant 1 : index
    %c0_206 = arith.constant 0 : index
    %258 = vector.load %arg18[%c0_204, %c1_205, %c0_206] : memref<8x8x4xf32, #tpu.memory_space<vmem>>, vector<8x1x4xf32>
    %259 = vector.shape_cast %258 : vector<8x1x4xf32> to vector<8x4xf32>
    %260 = arith.maximumf %257, %259 : vector<8x4xf32>
    %c0_207 = arith.constant 0 : index
    %c0_208 = arith.constant 0 : index
    %c0_209 = arith.constant 0 : index
    %261 = vector.load %arg12[%c0_207, %c0_208, %c0_209] : memref<4x4x32xf32, #tpu.memory_space<vmem>>, vector<1x4x32xf32>
    %262 = vector.shape_cast %261 : vector<1x4x32xf32> to vector<4x32xf32>
    %cst_210 = arith.constant dense<0.000000e+00> : vector<8x32xf32>
    %263 = tpu.matmul %260, %262, %cst_210 {dimension_numbers = #tpu.dot_dimension_numbers<[1], [0], [0], [1], [0, 0, 1, 1], [], []>} : vector<8x4xf32>, vector<4x32xf32>, vector<8x32xf32> -> vector<8x32xf32>
    %264 = arith.addf %255, %263 : vector<8x32xf32>
    %c0_211 = arith.constant 0 : index
    %c2_212 = arith.constant 2 : index
    %c0_213 = arith.constant 0 : index
    %265 = vector.load %arg18[%c0_211, %c2_212, %c0_213] : memref<8x8x4xf32, #tpu.memory_space<vmem>>, vector<8x1x4xf32>
    %266 = vector.shape_cast %265 : vector<8x1x4xf32> to vector<8x4xf32>
    %c0_214 = arith.constant 0 : index
    %c3 = arith.constant 3 : index
    %c0_215 = arith.constant 0 : index
    %267 = vector.load %arg18[%c0_214, %c3, %c0_215] : memref<8x8x4xf32, #tpu.memory_space<vmem>>, vector<8x1x4xf32>
    %268 = vector.shape_cast %267 : vector<8x1x4xf32> to vector<8x4xf32>
    %269 = arith.maximumf %266, %268 : vector<8x4xf32>
    %c1_216 = arith.constant 1 : index
    %c0_217 = arith.constant 0 : index
    %c0_218 = arith.constant 0 : index
    %270 = vector.load %arg12[%c1_216, %c0_217, %c0_218] : memref<4x4x32xf32, #tpu.memory_space<vmem>>, vector<1x4x32xf32>
    %271 = vector.shape_cast %270 : vector<1x4x32xf32> to vector<4x32xf32>
    %cst_219 = arith.constant dense<0.000000e+00> : vector<8x32xf32>
    %272 = tpu.matmul %269, %271, %cst_219 {dimension_numbers = #tpu.dot_dimension_numbers<[1], [0], [0], [1], [0, 0, 1, 1], [], []>} : vector<8x4xf32>, vector<4x32xf32>, vector<8x32xf32> -> vector<8x32xf32>
    %273 = arith.addf %264, %272 : vector<8x32xf32>
    %c0_220 = arith.constant 0 : index
    %c4 = arith.constant 4 : index
    %c0_221 = arith.constant 0 : index
    %274 = vector.load %arg18[%c0_220, %c4, %c0_221] : memref<8x8x4xf32, #tpu.memory_space<vmem>>, vector<8x1x4xf32>
    %275 = vector.shape_cast %274 : vector<8x1x4xf32> to vector<8x4xf32>
    %c0_222 = arith.constant 0 : index
    %c5 = arith.constant 5 : index
    %c0_223 = arith.constant 0 : index
    %276 = vector.load %arg18[%c0_222, %c5, %c0_223] : memref<8x8x4xf32, #tpu.memory_space<vmem>>, vector<8x1x4xf32>
    %277 = vector.shape_cast %276 : vector<8x1x4xf32> to vector<8x4xf32>
    %278 = arith.maximumf %275, %277 : vector<8x4xf32>
    %c2_224 = arith.constant 2 : index
    %c0_225 = arith.constant 0 : index
    %c0_226 = arith.constant 0 : index
    %279 = vector.load %arg12[%c2_224, %c0_225, %c0_226] : memref<4x4x32xf32, #tpu.memory_space<vmem>>, vector<1x4x32xf32>
    %280 = vector.shape_cast %279 : vector<1x4x32xf32> to vector<4x32xf32>
    %cst_227 = arith.constant dense<0.000000e+00> : vector<8x32xf32>
    %281 = tpu.matmul %278, %280, %cst_227 {dimension_numbers = #tpu.dot_dimension_numbers<[1], [0], [0], [1], [0, 0, 1, 1], [], []>} : vector<8x4xf32>, vector<4x32xf32>, vector<8x32xf32> -> vector<8x32xf32>
    %282 = arith.addf %273, %281 : vector<8x32xf32>
    %c0_228 = arith.constant 0 : index
    %c6 = arith.constant 6 : index
    %c0_229 = arith.constant 0 : index
    %283 = vector.load %arg18[%c0_228, %c6, %c0_229] : memref<8x8x4xf32, #tpu.memory_space<vmem>>, vector<8x1x4xf32>
    %284 = vector.shape_cast %283 : vector<8x1x4xf32> to vector<8x4xf32>
    %c0_230 = arith.constant 0 : index
    %c7 = arith.constant 7 : index
    %c0_231 = arith.constant 0 : index
    %285 = vector.load %arg18[%c0_230, %c7, %c0_231] : memref<8x8x4xf32, #tpu.memory_space<vmem>>, vector<8x1x4xf32>
    %286 = vector.shape_cast %285 : vector<8x1x4xf32> to vector<8x4xf32>
    %287 = arith.maximumf %284, %286 : vector<8x4xf32>
    %c3_232 = arith.constant 3 : index
    %c0_233 = arith.constant 0 : index
    %c0_234 = arith.constant 0 : index
    %288 = vector.load %arg12[%c3_232, %c0_233, %c0_234] : memref<4x4x32xf32, #tpu.memory_space<vmem>>, vector<1x4x32xf32>
    %289 = vector.shape_cast %288 : vector<1x4x32xf32> to vector<4x32xf32>
    %cst_235 = arith.constant dense<0.000000e+00> : vector<8x32xf32>
    %290 = tpu.matmul %287, %289, %cst_235 {dimension_numbers = #tpu.dot_dimension_numbers<[1], [0], [0], [1], [0, 0, 1, 1], [], []>} : vector<8x4xf32>, vector<4x32xf32>, vector<8x32xf32> -> vector<8x32xf32>
    %291 = arith.addf %282, %290 : vector<8x32xf32>
    %c0_236 = arith.constant 0 : index
    %c0_237 = arith.constant 0 : index
    %292 = vector.load %arg13[%c0_236, %c0_237] : memref<1x32xf32, #tpu.memory_space<vmem>>, vector<1x32xf32>
    %293 = vector.broadcast %292 : vector<1x32xf32> to vector<8x32xf32>
    %294 = arith.addf %291, %293 : vector<8x32xf32>
    %c0_238 = arith.constant 0 : index
    %c0_239 = arith.constant 0 : index
    %c0_240 = arith.constant 0 : index
    %295 = vector.load %arg14[%c0_238, %c0_239, %c0_240] : memref<1x8x32xf32, #tpu.memory_space<vmem>>, vector<1x8x32xf32>
    %296 = vector.shape_cast %295 : vector<1x8x32xf32> to vector<8x32xf32>
    %297 = vector.shape_cast %294 : vector<8x32xf32> to vector<1x8x32xf32>
    tpu.vector_store %arg14[%c0_238, %c0_239, %c0_240], %297 {strides = array<i32>} : memref<1x8x32xf32, #tpu.memory_space<vmem>>, vector<1x8x32xf32>,
    return
  }
  func.func @transform_0(%arg0: i32, %arg1: i32) -> (i32, i32, i32, i32) {
    %c0_i32 = arith.constant 0 : i32
    %c0_i32_0 = arith.constant 0 : i32
    %c0_i32_1 = arith.constant 0 : i32
    return %arg0, %arg1, %c0_i32, %c0_i32_0 : i32, i32, i32, i32
  }
  func.func @transform_1(%arg0: i32, %arg1: i32) -> (i32, i32, i32) {
    %c0_i32 = arith.constant 0 : i32
    %c0_i32_0 = arith.constant 0 : i32
    %c0_i32_1 = arith.constant 0 : i32
    %c0_i32_2 = arith.constant 0 : i32
    return %c0_i32, %c0_i32_0, %c0_i32_1 : i32, i32, i32
  }
  func.func @transform_2(%arg0: i32, %arg1: i32) -> (i32, i32) {
    %c0_i32 = arith.constant 0 : i32
    %c0_i32_0 = arith.constant 0 : i32
    %c0_i32_1 = arith.constant 0 : i32
    return %c0_i32, %c0_i32_0 : i32, i32
  }
  func.func @transform_3(%arg0: i32, %arg1: i32) -> (i32, i32) {
    %c0_i32 = arith.constant 0 : i32
    %c0_i32_0 = arith.constant 0 : i32
    %c0_i32_1 = arith.constant 0 : i32
    return %c0_i32, %c0_i32_0 : i32, i32
  }
  func.func @transform_4(%arg0: i32, %arg1: i32) -> (i32, i32, i32, i32) {
    %c0_i32 = arith.constant 0 : i32
    %c0_i32_0 = arith.constant 0 : i32
    %c0_i32_1 = arith.constant 0 : i32
    %c0_i32_2 = arith.constant 0 : i32
    %c0_i32_3 = arith.constant 0 : i32
    return %c0_i32, %c0_i32_0, %c0_i32_1, %c0_i32_2 : i32, i32, i32, i32
  }
  func.func @transform_5(%arg0: i32, %arg1: i32) -> (i32, i32) {
    %c0_i32 = arith.constant 0 : i32
    %c0_i32_0 = arith.constant 0 : i32
    %c0_i32_1 = arith.constant 0 : i32
    return %c0_i32, %c0_i32_0 : i32, i32
  }
  func.func @transform_6(%arg0: i32, %arg1: i32) -> (i32, i32) {
    %c0_i32 = arith.constant 0 : i32
    %c0_i32_0 = arith.constant 0 : i32
    %c0_i32_1 = arith.constant 0 : i32
    return %c0_i32, %c0_i32_0 : i32, i32
  }
  func.func @transform_7(%arg0: i32, %arg1: i32) -> (i32, i32, i32, i32) {
    %c0_i32 = arith.constant 0 : i32
    %c0_i32_0 = arith.constant 0 : i32
    %c0_i32_1 = arith.constant 0 : i32
    %c0_i32_2 = arith.constant 0 : i32
    %c0_i32_3 = arith.constant 0 : i32
    return %c0_i32, %c0_i32_0, %c0_i32_1, %c0_i32_2 : i32, i32, i32, i32
  }
  func.func @transform_8(%arg0: i32, %arg1: i32) -> (i32, i32) {
    %c0_i32 = arith.constant 0 : i32
    %c0_i32_0 = arith.constant 0 : i32
    %c0_i32_1 = arith.constant 0 : i32
    return %c0_i32, %c0_i32_0 : i32, i32
  }
  func.func @transform_9(%arg0: i32, %arg1: i32) -> (i32, i32) {
    %c0_i32 = arith.constant 0 : i32
    %c0_i32_0 = arith.constant 0 : i32
    %c0_i32_1 = arith.constant 0 : i32
    return %c0_i32, %c0_i32_0 : i32, i32
  }
  func.func @transform_10(%arg0: i32, %arg1: i32) -> (i32, i32, i32) {
    %c0_i32 = arith.constant 0 : i32
    %c0_i32_0 = arith.constant 0 : i32
    %c0_i32_1 = arith.constant 0 : i32
    %c0_i32_2 = arith.constant 0 : i32
    return %c0_i32, %c0_i32_0, %c0_i32_1 : i32, i32, i32
  }
  func.func @transform_11(%arg0: i32, %arg1: i32) -> (i32, i32) {
    %c0_i32 = arith.constant 0 : i32
    %c0_i32_0 = arith.constant 0 : i32
    %c0_i32_1 = arith.constant 0 : i32
    return %c0_i32, %c0_i32_0 : i32, i32
  }
  func.func @transform_12(%arg0: i32, %arg1: i32) -> (i32, i32, i32) {
    %c0_i32 = arith.constant 0 : i32
    %c0_i32_0 = arith.constant 0 : i32
    return %arg0, %arg1, %c0_i32 : i32, i32, i32
  }
}

</mosaic_0001>

<bundles_post_ra>
// kernel: tpu_custom_call.1
= control target key start
LH: loop header
LB: loop body
LE: loop exit
PB: predicated region body
PF: predicated region fallthrough
CT: control target
= control target key end

     0   :  { %s10114_s0 = inlined_call_operand.vmem [shape: f32[2,1,14,18], index: 0, kind: input, shape index: {}]   ;;  %s10115_s1 = inlined_call_operand.vmem [shape: f32[3,3,2], index: 1, kind: input, shape index: {}]   ;;  %s10116_s2 = inlined_call_operand.vmem [shape: f32[1,2], index: 2, kind: input, shape index: {}]   ;;  %s10117_s3 = inlined_call_operand.vmem [shape: f32[1,2], index: 3, kind: input, shape index: {}]   ;;  %s10118_s4 = inlined_call_operand.vmem [shape: f32[3,3,2,2], index: 4, kind: input, shape index: {}]   ;;  %s10119_s5 = inlined_call_operand.vmem [shape: f32[1,2], index: 5, kind: input, shape index: {}]   ;;  %s10120_s6 = inlined_call_operand.vmem [shape: f32[1,2], index: 6, kind: input, shape index: {}]   ;;  %s10121_s7 = inlined_call_operand.vmem [shape: f32[3,3,2,4], index: 7, kind: input, shape index: {}]   ;;  %s10122_s8 = inlined_call_operand.vmem [shape: f32[1,4], index: 8, kind: input, shape index: {}]   ;;  %s10123_s9 = inlined_call_operand.vmem [shape: f32[1,4], index: 9, kind: input, shape index: {}]   ;;  %s10124_s10 = inlined_call_operand.vmem [shape: f32[4,4,32], index: 10, kind: input, shape index: {}]   ;;  %s10125_s11 = inlined_call_operand.vmem [shape: f32[1,32], index: 11, kind: input, shape index: {}]   ;;  %s10126_s12 = inlined_call_operand.hbm [shape: f32[2,8,32], index: 12, kind: output, shape index: {}]  }
   0x1   :  { %10132 = sst [smem:[#allocation13_spill]] %s10114_s0 }
   0x2   :  { %10133 = sst [smem:[#allocation14_spill]] %s10115_s1 }
   0x3   :  { %10134 = sst [smem:[#allocation15_spill]] %s10116_s2 }
   0x4   :  { %10135 = sst [smem:[#allocation16_spill]] %s10117_s3 }
   0x5   :  { %17 = vsyncpa [#allocation7], 0 }
   0x6   :  { %19 = vsyncpa [#allocation7 + $0x1], 0  ;;  %s8019_s21 = smov 0   ;;  %s8021_s22 = smov 0  }
   0x7   :  { %s8023_s23 = smov 0   ;;  %s8025_s24 = smov 0  }
   0x8   :  { %s8027_s25 = smov 0   ;;  %s8029_s26 = smov 0  }
   0x9 LB: > { %s6772_s27 = sadd.s32 4294967295, %s7949_s26   ;;  %s6773_s28 = sadd.s32 4294967294, %s7949_s26   ;;  %s7949_s26 = sphi %s8029_s26, %s25_s26   ;;  %s7945_s25 = sphi %s8027_s25, %s10167_s25   ;;  %s7941_s24 = sphi %s8025_s24, %s10166_s24   ;;  %s7937_s23 = sphi %s8023_s23, %s10165_s23   ;;  %s7933_s22 = sphi %s8021_s22, %s10164_s22   ;;  %s7929_s21 = sphi %s8019_s21, %s10163_s21  }
   0xa   : > { %s37_s29 = sadd.s32 1, %s7945_s25  ;;  %s305_s30 = sadd.s32 1, %s7937_s23 }
   0xb   : > { %p39_p0 = scmp.ge.s32.totalorder %s37_s29, 2  ;;  %p315_p1 = scmp.ne.s32.totalorder %s7937_s23, %s7933_s22 }
   0xc   : > { %p316_p2 = scmp.eq.s32.totalorder %s6772_s27, 1  ;;  %p321_p3 = scmp.ne.s32.totalorder %s7933_s22, %s7929_s21 }
   0xd   : > { %s10169_s29 = smov (%p39_p0, %s37_s29), 0  ;;  %p322_p5 = scmp.eq.s32.totalorder %s6773_s28, 1 }
   0xe   : > { %p8059_p4 = por %p316_p2, %p315_p1  ;;  %s300_s14 = ssub.s32 %s7945_s25, %s10169_s29 }
   0xf   : > { %p6776_p6 = scmp.ge.s32.totalorder %s7949_s26, 1  ;;  %p303_p7 = scmp.eq.s32.totalorder %s300_s14, 0 }
  0x10   : > { %p8066_p8 = por %p322_p5, %p321_p3  ;;  %p385_p9 = scmp.lt.s32.totalorder %s7949_s26, 3 }
  0x11   : > { %s8072_s16 = scalar_select %p303_p7, %s7937_s23, %s305_s30  }
  0x12   : > { %p386_p10 = pnand %p6776_p6, %p385_p9 }
  0x14   : > { %389 = sbr.rel (%p386_p10) target bundleno = 1222 (0x4c6), region = 68 }
  0x19   : > { %p431_p11 = scmp.lt.s32.totalorder %s7941_s24, 1  ;;  %v443_v0 = vlaneseq  ;;  %s10138_s0 = sld [smem:[#allocation13_spill]]  ;;  %vm2126_vm0 = vcmask 15360   ;;  %vm2101_vm1 = vcmask 8192   ;;  %v10127_v22 = vmov 0.0  }
  0x1a   : > { %2127 = vst.msk [vmem:[#allocation2 + $0x1] sm:$0xff] %vm2126_vm0, %v10127_v22  ;;  %2128 = vst.msk [vmem:[#allocation2 + $0x9] sm:$0xff] %vm2126_vm0, %v10127_v22  ;;  %v6782_v23 = vld [vmem:[%s10118_s4 + $0x2] sm:$0x3]  ;;  %vm2254_vm2 = vcmask 1041408   ;;  %s10139_s1 = sld [smem:[#allocation14_spill]] }
  0x1b   : > { %s432_s17 = scalar_select %p431_p11, %s7941_s24, 1  ;;  %v444_v1 = vshrl.u32 %v443_v0, 7  ;;  %2129 = vst.msk [vmem:[#allocation2 + $0x19] sm:$0xff] %vm2126_vm0, %v10127_v22  ;;  %2130 = vst.msk [vmem:[#allocation2 + $0x21] sm:$0xff] %vm2126_vm0, %v10127_v22  ;;  %v2171_v24 = vld [vmem:[%s10118_s4] sm:$0x3]  ;;  %7367 = vmatprep.subr.msk.mxu0 %vm2254_vm2, %v6782_v23 }
  0x1c   : > { %2147 = vst.msk [vmem:[#allocation2 + $0xf1] sm:$0xff] %vm2126_vm0, %v10127_v22  ;;  %2148 = vst.msk [vmem:[#allocation2 + $0xf9] sm:$0xff] %vm2126_vm0, %v10127_v22  ;;  %7399 = vmatprep.subr.msk.mxu1 %vm2254_vm2, %v2171_v24  ;;  %7368 = vmatpush3.msk.msra.mxu0 %vm2254_vm2, %v6782_v23  ;;  %vm784_vm3 = vcmask 1046528   ;;  %vm969_vm4 = vcmask 1045504   ;;  %v6825_v48 = vld [vmem:[%s10118_s4 + $0x4] sm:$0x3] }
  0x1d   : > { %s7088_s18 = sshll.u32 %s432_s17, 4  ;;  %v8076_v2 = vsub.s32 2, %v444_v1  ;;  %v490_v3 = vsub.s32 3, %v444_v1  ;;  %v505_v7 = vsub.s32 4, %v444_v1  ;;  %v520_v9 = vsub.s32 5, %v444_v1  ;;  %2149 = vst.msk [vmem:[#allocation2 + $0x109] sm:$0xff] %vm2126_vm0, %v10127_v22  ;;  %7400 = vmatpush3.msk.msra.mxu1 %vm2254_vm2, %v2171_v24  ;;  %7431 = vmatprep.subr.msk.mxu0 %vm2254_vm2, %v6825_v48 }
  0x1e   : > { %v535_v11 = vsub.s32 6, %v444_v1  ;;  %v550_v13 = vsub.s32 7, %v444_v1  ;;  %v8082_v15 = vsub.s32 0, %v444_v1  ;;  %v8085_v18 = vsub.s32 1, %v444_v1  ;;  %2150 = vst.msk [vmem:[#allocation2 + $0x111] sm:$0xff] %vm2126_vm0, %v10127_v22  ;;  %4777 = vst.msk [vmem:[#allocation4 + $0x1] sm:$0xff] %vm2126_vm0, %v10127_v22 }
  0x1f   : > { %s439_s27 = scalar_lea.vmem %s10138_s0, %s7088_s18  ;;  %4786 = vst.msk [vmem:[#allocation4 + $0x91] sm:$0xff] %vm2126_vm0, %v10127_v22  ;;  %s10140_s2 = sld [smem:[#allocation15_spill]]  ;;  %vm6251_vm5 = vcmask 1043456   ;;  %vm7952_vm6 = vmmov 0   ;;  %vm6160_vm7 = vcmask 31744   ;;  %vm6229_vm8 = vcmask 1041409  }
  0x20   : > { %v441_v4 = vld [vmem:[%s439_s27] sm:$0xff]  ;;  %v442_v16 = vld [vmem:[%s439_s27 + $0x8] sm:$0x3f]  ;;  %2102 = vst.msk [vmem:[#allocation2] sm:$0x1] %vm2101_vm1, %v10127_v22  ;;  %s10141_s3 = sld [smem:[#allocation16_spill]] }
  0x21   : > { %v476_v5 = vrot.slane %v441_v4, %v8076_v2  ;;  %v491_v6 = vrot.slane %v441_v4, %v490_v3  ;;  %v506_v8 = vrot.slane %v441_v4, %v505_v7  ;;  %v521_v10 = vrot.slane %v441_v4, %v520_v9  ;;  %2103 = vst.msk [vmem:[#allocation2 + $0x18] sm:$0x1] %vm2101_vm1, %v10127_v22  ;;  %v2172_v25 = vld [vmem:[#allocation2 + $0x1] sm:$0xff]  ;;  %v2173_v27 = vld [vmem:[#allocation2 + $0x9] sm:$0xff]  ;;  %s428_s18 = sand.u32 1, %s7933_s22   ;;  %s7085_s28 = sshll.u32 %s7941_s24, 7 }
  0x22   : > { %v536_v12 = vrot.slane %v441_v4, %v535_v11  ;;  %v551_v14 = vrot.slane %v441_v4, %v550_v13  ;;  %v566_v17 = vrot.slane %v442_v16, %v8082_v15  ;;  %v581_v19 = vrot.slane %v442_v16, %v8085_v18  ;;  %2104 = vst.msk [vmem:[#allocation2 + $0x30] sm:$0x1] %vm2101_vm1, %v10127_v22  ;;  %v2152_v28 = vld [vmem:[#allocation2 + $0x8] sm:$0xff]  ;;  %v2174_v29 = vld [vmem:[#allocation2 + $0x19] sm:$0xff]  ;;  %v654_v38 = vld [vmem:[%s10139_s1 + $0x4] sm:$0x7] }
  0x23   : > { %486 = vbcast.lane.b32.xlu1 %v476_v5, 272  ;;  %478 = vbcast.lane.b32.xlu0 %v476_v5, 256  ;;  %v596_v20 = vrot.slane %v442_v16, %v8076_v2  ;;  %v611_v21 = vrot.slane %v442_v16, %v490_v3  ;;  %2105 = vst.msk [vmem:[#allocation2 + $0x48] sm:$0x1] %vm2101_vm1, %v10127_v22  ;;  %2106 = vst.msk [vmem:[#allocation2 + $0x60] sm:$0x1] %vm2101_vm1, %v10127_v22 }
  0x24   : > { %2107 = vst.msk [vmem:[#allocation2 + $0x78] sm:$0x1] %vm2101_vm1, %v10127_v22  ;;  %2108 = vst.msk [vmem:[#allocation2 + $0x90] sm:$0x1] %vm2101_vm1, %v10127_v22  ;;  %7369 = vmatprep.mubr.msk.f32.mxu0 %vm2126_vm0, %v2172_v25  ;;  %v2175_v31 = vld [vmem:[#allocation2 + $0x21] sm:$0xff]  ;;  %v8236_v43 = vrot.slane %v654_v38, %v8076_v2  ;;  %v8244_v49 = vrot.slane %v654_v38, %v8082_v15  ;;  %v8253_v52 = vrot.slane %v654_v38, %v8085_v18  ;;  %vm6232_vm9 = vcmask 1042434  }
  0x25   : > { %2109 = vst.msk [vmem:[#allocation2 + $0xa8] sm:$0x1] %vm2101_vm1, %v10127_v22  ;;  %2110 = vst.msk [vmem:[#allocation2 + $0xc0] sm:$0x1] %vm2101_vm1, %v10127_v22  ;;  %7370 = vmatmul.mubr.msk.f32.vlgmr.msra.gmra.mxu0 %vm2126_vm0, %v2173_v27  ;;  %v2154_v32 = vld [vmem:[#allocation2 + $0x20] sm:$0xff]  ;;  %vm6235_vm10 = vcmask 1043459  }
  0x26   : > { %2111 = vst.msk [vmem:[#allocation2 + $0xd8] sm:$0x1] %vm2101_vm1, %v10127_v22  ;;  %2112 = vst.msk [vmem:[#allocation2 + $0xf0] sm:$0x1] %vm2101_vm1, %v10127_v22  ;;  %7372 = vmatprep.mubr.msk.f32.mxu0 %vm2126_vm0, %v2174_v29  ;;  %v653_v33 = vld [vmem:[%s10139_s1] sm:$0x7]  ;;  %7432 = vmatpush3.msk.msra.mxu0 %vm2254_vm2, %v6825_v48 }
  0x27   : > { %493 = vbcast.lane.b32.xlu1 %v491_v6, 256  ;;  %482 = vbcast.lane.b32.xlu0 %v476_v5, 264  ;;  %2113 = vst.msk [vmem:[#allocation2 + $0x108] sm:$0x1] %vm2101_vm1, %v10127_v22  ;;  %2114 = vst.msk [vmem:[#allocation2 + $0x11] sm:$0x1] %vm2101_vm1, %v10127_v22  ;;  %v8219_v34 = vrot.slane %v653_v33, %v8076_v2  ;;  %v8222_v35 = vrot.slane %v653_v33, %v8085_v18 }
  0x28   : > { %2115 = vst.msk [vmem:[#allocation2 + $0x29] sm:$0x1] %vm2101_vm1, %v10127_v22  ;;  %2116 = vst.msk [vmem:[#allocation2 + $0x41] sm:$0x1] %vm2101_vm1, %v10127_v22  ;;  %v2151_v26 = vld [vmem:[#allocation2] sm:$0xff]  ;;  %v2153_v30 = vld [vmem:[#allocation2 + $0x18] sm:$0xff]  ;;  %v8231_v40 = vrot.slane %v653_v33, %v8082_v15 }
  0x29   : > { %2117 = vst.msk [vmem:[#allocation2 + $0x59] sm:$0x1] %vm2101_vm1, %v10127_v22  ;;  %2118 = vst.msk [vmem:[#allocation2 + $0x71] sm:$0x1] %vm2101_vm1, %v10127_v22  ;;  %7401 = vmatprep.mubr.msk.f32.mxu1 %vm2126_vm0, %v2151_v26  ;;  %7373 = vmatmul.mubr.msk.f32.gmra.mxu0 %vm2126_vm0, %v2175_v31  ;;  %v655_v39 = vld [vmem:[%s10139_s1 + $0x8] sm:$0x7]  ;;  %s6693_s1 = scalar_lea.hbm %s10126_s12, %s7085_s28 }
  0x2a   : > { %2119 = vst.msk [vmem:[#allocation2 + $0x89] sm:$0x1] %vm2101_vm1, %v10127_v22  ;;  %2120 = vst.msk [vmem:[#allocation2 + $0xa1] sm:$0x1] %vm2101_vm1, %v10127_v22  ;;  %7402 = vmatmul.mubr.msk.f32.vlgmr.msra.gmra.mxu1 %vm2126_vm0, %v2152_v28  ;;  %v8247_v50 = vrot.slane %v655_v39, %v8082_v15  ;;  %v8250_v51 = vrot.slane %v655_v39, %v8076_v2  ;;  %v8257_v53 = vrot.slane %v655_v39, %v8085_v18  ;;  %vm6238_vm11 = vcmask 1044484   ;;  %s6777_s19 = sshll.u32 %s428_s18, 3 }
  0x2b   : > { %501 = vbcast.lane.b32.xlu1 %v491_v6, 272  ;;  %497 = vbcast.lane.b32.xlu0 %v491_v6, 264  ;;  %2121 = vst.msk [vmem:[#allocation2 + $0xb9] sm:$0x1] %vm2101_vm1, %v10127_v22  ;;  %2122 = vst.msk [vmem:[#allocation2 + $0xd1] sm:$0x1] %vm2101_vm1, %v10127_v22 }
  0x2c   : > { %2123 = vst.msk [vmem:[#allocation2 + $0xe9] sm:$0x1] %vm2101_vm1, %v10127_v22  ;;  %2124 = vst.msk [vmem:[#allocation2 + $0x101] sm:$0x1] %vm2101_vm1, %v10127_v22  ;;  %7404 = vmatprep.mubr.msk.f32.mxu1 %vm2126_vm0, %v2153_v30  ;;  %vm6241_vm12 = vcmask 1045509   ;;  %vm6244_vm13 = vcmask 1046534  }
  0x2d   : > { %2125 = vst.msk [vmem:[#allocation2 + $0x119] sm:$0x1] %vm2101_vm1, %v10127_v22  ;;  %4757 = vst.msk [vmem:[#allocation4] sm:$0x1] %vm2101_vm1, %v10127_v22  ;;  %vm6247_vm14 = vcmask 1047559   ;;  %s430_s30 = scalar_lea.vmem [#allocation6], %s6777_s19 }
  0x2e   : > { %4758 = vst.msk [vmem:[#allocation4 + $0x10] sm:$0x1] %vm2101_vm1, %v10127_v22  ;;  %4759 = vst.msk [vmem:[#allocation4 + $0x20] sm:$0x1] %vm2101_vm1, %v10127_v22  ;;  %7405 = vmatmul.mubr.msk.f32.gmra.mxu1 %vm2126_vm0, %v2154_v32  ;;  %s6695_s14 = sshll.u32 %s430_s30, 4  ;;  %vm6678_vm15 = vcmask 261120   ;;  %s6696_s14 = int_to_ptr.vmem [resolvable:$true] %s6695_s14 }
  0x2f   : > { %512 = vbcast.lane.b32.xlu1 %v506_v8, 264  ;;  %508 = vbcast.lane.b32.xlu0 %v506_v8, 256  ;;  %4760 = vst.msk [vmem:[#allocation4 + $0x30] sm:$0x1] %vm2101_vm1, %v10127_v22  ;;  %4761 = vst.msk [vmem:[#allocation4 + $0x40] sm:$0x1] %vm2101_vm1, %v10127_v22 }
  0x30   : > { %4762 = vst.msk [vmem:[#allocation4 + $0x50] sm:$0x1] %vm2101_vm1, %v10127_v22  ;;  %4763 = vst.msk [vmem:[#allocation4 + $0x60] sm:$0x1] %vm2101_vm1, %v10127_v22  ;;  %s7953_s20 = smov [#allocation6]  }
  0x31   : > { %4764 = vst.msk [vmem:[#allocation4 + $0x70] sm:$0x1] %vm2101_vm1, %v10127_v22  ;;  %4765 = vst.msk [vmem:[#allocation4 + $0x80] sm:$0x1] %vm2101_vm1, %v10127_v22  ;;  %s7877_s27 = sshll.u32 %s7953_s20, 4  ;;  %s7878_s27 = int_to_ptr.vmem [resolvable:$false] %s7877_s27 }
  0x32   : > { %4766 = vst.msk [vmem:[#allocation4 + $0x90] sm:$0x1] %vm2101_vm1, %v10127_v22  ;;  %4767 = vst.msk [vmem:[#allocation4 + $0x9] sm:$0x1] %vm2101_vm1, %v10127_v22  ;;  %s7879_s24 = scalar_lea.vmem %s7878_s27, 256  ;;  %p7880_p1 = scmp.lt.s32.totalorder %s6696_s14, %s7878_s27 }
  0x33   : > { %523 = vbcast.lane.b32.xlu1 %v521_v10, 256  ;;  %516 = vbcast.lane.b32.xlu0 %v506_v8, 272  ;;  %4768 = vst.msk [vmem:[#allocation4 + $0x19] sm:$0x1] %vm2101_vm1, %v10127_v22  ;;  %4769 = vst.msk [vmem:[#allocation4 + $0x29] sm:$0x1] %vm2101_vm1, %v10127_v22 }
  0x34   : > { %4770 = vst.msk [vmem:[#allocation4 + $0x39] sm:$0x1] %vm2101_vm1, %v10127_v22  ;;  %4771 = vst.msk [vmem:[#allocation4 + $0x49] sm:$0x1] %vm2101_vm1, %v10127_v22 }
  0x35   : > { %4772 = vst.msk [vmem:[#allocation4 + $0x59] sm:$0x1] %vm2101_vm1, %v10127_v22  ;;  %4773 = vst.msk [vmem:[#allocation4 + $0x69] sm:$0x1] %vm2101_vm1, %v10127_v22 }
  0x36   : > { %4774 = vst.msk [vmem:[#allocation4 + $0x79] sm:$0x1] %vm2101_vm1, %v10127_v22  ;;  %4775 = vst.msk [vmem:[#allocation4 + $0x89] sm:$0x1] %vm2101_vm1, %v10127_v22 }
  0x37   : > { %531 = vbcast.lane.b32.xlu1 %v521_v10, 272  ;;  %527 = vbcast.lane.b32.xlu0 %v521_v10, 264  ;;  %4776 = vst.msk [vmem:[#allocation4 + $0x99] sm:$0x1] %vm2101_vm1, %v10127_v22 }
  0x3b   : > { %542 = vbcast.lane.b32.xlu1 %v536_v12, 264  ;;  %538 = vbcast.lane.b32.xlu0 %v536_v12, 256 }
  0x3f   : > { %553 = vbcast.lane.b32.xlu1 %v551_v14, 256  ;;  %546 = vbcast.lane.b32.xlu0 %v536_v12, 272 }
  0x43   : > { %561 = vbcast.lane.b32.xlu1 %v551_v14, 272  ;;  %557 = vbcast.lane.b32.xlu0 %v551_v14, 264 }
  0x47   : > { %572 = vbcast.lane.b32.xlu1 %v566_v17, 264  ;;  %568 = vbcast.lane.b32.xlu0 %v566_v17, 256 }
  0x4b   : > { %583 = vbcast.lane.b32.xlu1 %v581_v19, 256  ;;  %576 = vbcast.lane.b32.xlu0 %v566_v17, 272 }
  0x4f   : > { %591 = vbcast.lane.b32.xlu1 %v581_v19, 272  ;;  %587 = vbcast.lane.b32.xlu0 %v581_v19, 264 }
  0x53   : > { %602 = vbcast.lane.b32.xlu1 %v596_v20, 264  ;;  %598 = vbcast.lane.b32.xlu0 %v596_v20, 256 }
  0x57   : > { %606 = vbcast.lane.b32.xlu0 %v596_v20, 272  ;;  %613 = vbcast.lane.b32.xlu1 %v611_v21, 256 }
  0x5b   : > { %617 = vbcast.lane.b32.xlu0 %v611_v21, 264  ;;  %621 = vbcast.lane.b32.xlu1 %v611_v21, 272 }
  0x95   : > { %v487_v36 = vpop.permute.xlu1 %486  ;;  %v479_v37 = vpop.permute.xlu0 %478 }
  0x96   : > { %v720_v41 = vmul.f32 %v8222_v35, %v487_v36  ;;  %v905_v42 = vmul.f32 %v8219_v34, %v487_v36  ;;  %v718_v44 = vmul.f32 %v8222_v35, %v479_v37  ;;  %v903_v45 = vmul.f32 %v8219_v34, %v479_v37 }
  0x97   : > { %v664_v55 = vmul.f32 %v8231_v40, %v479_v37 }
  0x98   : > { %v798_v54 = vrot.slane %v720_v41, 1  ;;  %v983_v57 = vrot.slane %v905_v42, 2  ;;  %v795_v61 = vrot.slane %v718_v44, 1  ;;  %v980_v62 = vrot.slane %v903_v45, 2 }
  0x99   : > { %v494_v46 = vpop.permute.xlu1 %493  ;;  %v483_v47 = vpop.permute.xlu0 %482 }
  0x9a   : > { %v719_v56 = vmul.f32 %v8222_v35, %v483_v47  ;;  %v721_v58 = vmul.f32 %v8222_v35, %v494_v46  ;;  %v906_v59 = vmul.f32 %v8219_v34, %v494_v46  ;;  %v904_v60 = vmul.f32 %v8219_v34, %v483_v47 }
  0x9b   : > { %v666_v63 = vmul.f32 %v8231_v40, %v494_v46  ;;  %v1086_v2 = vmul.f32 %v8244_v49, %v494_v46  ;;  %v665_v3 = vmul.f32 %v8231_v40, %v483_v47  ;;  %v1140_v6 = vmul.f32 %v8253_v52, %v494_v46 }
  0x9c   : > { %v796_v0 = vrot.slane %v719_v56, 1  ;;  %v981_v4 = vrot.slane %v904_v60, 2  ;;  %v1324_v7 = vmul.f32 %v8236_v43, %v494_v46  ;;  %v800_v11 = vrot.slane %v721_v58, 1 }
  0x9d   : > { %v502_v1 = vpop.permute.xlu1 %501  ;;  %v498_v10 = vpop.permute.xlu0 %497  ;;  %v985_v12 = vrot.slane %v906_v59, 2  ;;  %v1216_v24 = vrot.slane %v1140_v6, 1 }
  0x9e   : > { %v723_v5 = vmul.f32 %v8222_v35, %v502_v1  ;;  %v797_v8 = vsel %vm784_vm3, %v795_v61, %v796_v0  ;;  %v799_v9 = vsel %vm784_vm3, %v796_v0, %v798_v54  ;;  %v982_v15 = vsel %vm969_vm4, %v980_v62, %v981_v4 }
  0x9f   : > { %v873_v13 = vadd.f32 %v797_v8, %v664_v55  ;;  %v874_v14 = vadd.f32 %v799_v9, %v665_v3  ;;  %v984_v16 = vsel %vm969_vm4, %v981_v4, %v983_v57  ;;  %v1142_v18 = vmul.f32 %v8253_v52, %v502_v1 }
  0xa0   : > { %v803_v17 = vrot.slane %v723_v5, 1  ;;  %v722_v21 = vmul.f32 %v8222_v35, %v498_v10  ;;  %v907_v23 = vmul.f32 %v8219_v34, %v498_v10  ;;  %v908_v25 = vmul.f32 %v8219_v34, %v502_v1 }
  0xa1   : > { %v1058_v19 = vadd.f32 %v982_v15, %v873_v13  ;;  %v1059_v20 = vadd.f32 %v984_v16, %v874_v14  ;;  %v1141_v26 = vmul.f32 %v8253_v52, %v498_v10  ;;  %v1325_v27 = vmul.f32 %v8236_v43, %v498_v10  ;;  %v8283_v38 = vpop.permute.xlu1 %512  ;;  %v509_v39 = vpop.permute.xlu0 %508 }
  0xa2   : > { %v1326_v29 = vmul.f32 %v8236_v43, %v502_v1  ;;  %v801_v30 = vrot.slane %v722_v21, 1  ;;  %v1087_v31 = vmul.f32 %v8244_v49, %v498_v10  ;;  %v1400_v32 = vrot.slane %v1324_v7, 2 }
  0xa3   : > { %v1110_v28 = vadd.f32 %v1086_v2, %v1058_v19  ;;  %v1219_v33 = vrot.slane %v1142_v18, 1  ;;  %v986_v36 = vrot.slane %v907_v23, 2  ;;  %v1217_v37 = vrot.slane %v1141_v26, 1 }
  0xa4   : > { %v802_v41 = vsel %vm784_vm3, %v800_v11, %v801_v30  ;;  %v804_v42 = vsel %vm784_vm3, %v801_v30, %v803_v17  ;;  %v1111_v44 = vadd.f32 %v1087_v31, %v1059_v20  ;;  %v1401_v45 = vrot.slane %v1325_v27, 2 }
  0xa5   : > { %v988_v46 = vrot.slane %v908_v25, 2  ;;  %v667_v47 = vmul.f32 %v8231_v40, %v498_v10  ;;  %v875_v48 = vadd.f32 %v802_v41, %v666_v63  ;;  %v1218_v54 = vsel %vm784_vm3, %v1216_v24, %v1217_v37  ;;  %v524_v7 = vpop.permute.xlu1 %523 }
  0xa6   : > { %v1403_v55 = vrot.slane %v1326_v29, 2  ;;  %v1294_v56 = vadd.f32 %v1218_v54, %v1110_v28  ;;  %v668_v57 = vmul.f32 %v8231_v40, %v509_v39  ;;  %v724_v58 = vmul.f32 %v8222_v35, %v509_v39 }
  0xa7   : > { %v876_v59 = vadd.f32 %v804_v42, %v667_v47  ;;  %v987_v60 = vsel %vm969_vm4, %v985_v12, %v986_v36  ;;  %v1220_v61 = vsel %vm784_vm3, %v1217_v37, %v1219_v33  ;;  %v8294_v62 = vmul.f32 %v8219_v34, %v509_v39 }
  0xa8   : > { %v1060_v0 = vadd.f32 %v987_v60, %v875_v48  ;;  %v1295_v1 = vadd.f32 %v1220_v61, %v1111_v44  ;;  %v1402_v63 = vsel %vm969_vm4, %v1400_v32, %v1401_v45  ;;  %v1143_v2 = vmul.f32 %v8253_v52, %v509_v39 }
  0xa9   : > { %v989_v3 = vsel %vm969_vm4, %v986_v36, %v988_v46  ;;  %v1478_v4 = vadd.f32 %v1402_v63, %v1294_v56  ;;  %v1327_v5 = vmul.f32 %v8236_v43, %v509_v39  ;;  %v1560_v6 = vmul.f32 %v8257_v53, %v509_v39  ;;  %v517_v46 = vpop.permute.xlu0 %516 }
  0xaa   : > { %v1404_v8 = vsel %vm969_vm4, %v1401_v45, %v1403_v55  ;;  %v1088_v9 = vmul.f32 %v8244_v49, %v509_v39  ;;  %v1744_v10 = vmul.f32 %v8250_v51, %v509_v39  ;;  %v8305_v11 = vmul.f32 %v8222_v35, %v524_v7 }
  0xab   : > { %v1061_v12 = vadd.f32 %v989_v3, %v876_v59  ;;  %v805_v13 = vrot.slane %v724_v58, 1  ;;  %v990_v14 = vrot.slane %v8294_v62, 2  ;;  %v1506_v15 = vmul.f32 %v8247_v50, %v509_v39 }
  0xac   : > { %v1479_v16 = vadd.f32 %v1404_v8, %v1295_v1  ;;  %v1112_v17 = vadd.f32 %v1088_v9, %v1060_v0  ;;  %v1221_v18 = vrot.slane %v1143_v2, 1  ;;  %v8310_v19 = vmul.f32 %v8231_v40, %v524_v7 }
  0xad   : > { %v1405_v20 = vrot.slane %v1327_v5, 2  ;;  %v1530_v21 = vadd.f32 %v1506_v15, %v1478_v4  ;;  %v1636_v23 = vrot.slane %v1560_v6, 1  ;;  %v8313_v24 = vmul.f32 %v8219_v34, %v524_v7 }
  0xae   : > { %v1820_v25 = vrot.slane %v1744_v10, 2  ;;  %v810_v26 = vrot.slane %v8305_v11, 1  ;;  %v8317_v27 = vmul.f32 %v8253_v52, %v524_v7  ;;  %v725_v28 = vmul.f32 %v8222_v35, %v8283_v38 }
  0xaf   : > { %v1090_v29 = vmul.f32 %v8244_v49, %v524_v7  ;;  %v8323_v30 = vmul.f32 %v8236_v43, %v524_v7  ;;  %v8326_v31 = vmul.f32 %v8247_v50, %v524_v7  ;;  %v8330_v32 = vmul.f32 %v8219_v34, %v8283_v38 }
  0xb0   : > { %v8333_v33 = vmul.f32 %v8257_v53, %v524_v7  ;;  %v806_v36 = vrot.slane %v725_v28, 1  ;;  %v1144_v37 = vmul.f32 %v8253_v52, %v8283_v38  ;;  %v8339_v39 = vmul.f32 %v8236_v43, %v8283_v38 }
  0xb1   : > { %v995_v41 = vrot.slane %v8313_v24, 2  ;;  %v8343_v42 = vmul.f32 %v8250_v51, %v524_v7  ;;  %v1561_v44 = vmul.f32 %v8257_v53, %v8283_v38  ;;  %v1745_v45 = vmul.f32 %v8250_v51, %v8283_v38 }
  0xb2   : > { %v1226_v47 = vrot.slane %v8317_v27, 1  ;;  %v807_v48 = vsel %vm784_vm3, %v805_v13, %v806_v36  ;;  %v1089_v54 = vmul.f32 %v8244_v49, %v8283_v38  ;;  %v1222_v55 = vrot.slane %v1144_v37, 1 }
  0xb3   : > { %v669_v56 = vmul.f32 %v8231_v40, %v8283_v38  ;;  %v991_v58 = vrot.slane %v8330_v32, 2  ;;  %v1406_v59 = vrot.slane %v8339_v39, 2  ;;  %v1637_v60 = vrot.slane %v1561_v44, 1 }
  0xb4   : > { %v1223_v61 = vsel %vm784_vm3, %v1221_v18, %v1222_v55  ;;  %v1507_v62 = vmul.f32 %v8247_v50, %v8283_v38  ;;  %v1821_v0 = vrot.slane %v1745_v45, 2  ;;  %v726_v1 = vmul.f32 %v8222_v35, %v517_v46 }
  0xb5   : > { %v877_v63 = vadd.f32 %v807_v48, %v668_v57  ;;  %v1296_v2 = vadd.f32 %v1223_v61, %v1112_v17  ;;  %v1638_v3 = vsel %vm784_vm3, %v1636_v23, %v1637_v60  ;;  %v911_v4 = vmul.f32 %v8219_v34, %v517_v46  ;;  %v8370_v57 = vld [vmem:[%s10140_s2] ss:$0 sm:$0xff] }
  0xb6   : > { %v1113_v5 = vadd.f32 %v1089_v54, %v1061_v12  ;;  %v1714_v6 = vadd.f32 %v1638_v3, %v1530_v21  ;;  %v808_v7 = vrot.slane %v726_v1, 1  ;;  %v1145_v8 = vmul.f32 %v8253_v52, %v517_v46  ;;  %v528_v3 = vpop.permute.xlu0 %527 }
  0xb7   : > { %v992_v9 = vsel %vm969_vm4, %v990_v14, %v991_v58  ;;  %v1407_v10 = vsel %vm969_vm4, %v1405_v20, %v1406_v59  ;;  %v1822_v38 = vsel %vm969_vm4, %v1820_v25, %v1821_v0  ;;  %v1329_v13 = vmul.f32 %v8236_v43, %v517_v46  ;;  %v8378_v20 = vld [vmem:[%s10141_s3] ss:$0 sm:$0xff] }
  0xb8   : > { %v1898_v15 = vadd.f32 %v1822_v38, %v1714_v6  ;;  %v809_v12 = vsel %vm784_vm3, %v806_v36, %v808_v7  ;;  %v1224_v17 = vrot.slane %v1145_v8, 1  ;;  %v1562_v18 = vmul.f32 %v8257_v53, %v517_v46  ;;  %v532_v36 = vpop.permute.xlu1 %531 }
  0xb9   : > { %v1062_v21 = vadd.f32 %v992_v9, %v877_v63  ;;  %v1480_v23 = vadd.f32 %v1407_v10, %v1296_v2  ;;  %v1531_v14 = vadd.f32 %v1507_v62, %v1479_v16  ;;  %v993_v25 = vrot.slane %v911_v4, 2 }
  0xba   : > { %v1929_v28 = vmul.f32 %v8370_v57, %v1898_v15  ;;  %v1225_v32 = vsel %vm784_vm3, %v1222_v55, %v1224_v17  ;;  %v1639_v37 = vrot.slane %v1562_v18, 1  ;;  %v1746_v39 = vmul.f32 %v8250_v51, %v517_v46  ;;  %v6847_v18 = vld [vmem:[%s10118_s4 + $0x6] sm:$0x3] }
  0xbb   : > { %v1410_v44 = vrot.slane %v8323_v30, 2  ;;  %v1641_v45 = vrot.slane %v8333_v33, 1  ;;  %v878_v48 = vadd.f32 %v809_v12, %v669_v56  ;;  %v1408_v16 = vrot.slane %v1329_v13, 2  ;;  %7463 = vmatprep.subr.msk.mxu1 %vm2254_vm2, %v6847_v18 }
  0xbc   : > { %v1960_v54 = vadd.f32 %v8378_v20, %v1929_v28  ;;  %v1297_v61 = vadd.f32 %v1225_v32, %v1113_v5  ;;  %v1640_v62 = vsel %vm784_vm3, %v1637_v60, %v1639_v37  ;;  %v1823_v1 = vrot.slane %v1746_v39, 2  ;;  %v6869_v28 = vld [vmem:[%s10118_s4 + $0x8] sm:$0x3]  ;;  %7464 = vmatpush3.msk.msra.mxu1 %vm2254_vm2, %v6847_v18 }
  0xbd   : > { %v1825_v63 = vrot.slane %v8343_v42, 2  ;;  %v8388_v2 = vadd.f32 %v1090_v29, %v1062_v21  ;;  %v1715_v55 = vadd.f32 %v1640_v62, %v1531_v14  ;;  %v8391_v46 = vmul.f32 %v8222_v35, %v532_v36  ;;  %7495 = vmatprep.subr.msk.mxu0 %vm2254_vm2, %v6869_v28 }
  0xbe   : > { %v1532_v4 = vadd.f32 %v8326_v31, %v1480_v23  ;;  %v1984_v33 = vmax.f32 %v1960_v54, 0.0  ;;  %v994_v56 = vsel %vm969_vm4, %v991_v58, %v993_v25  ;;  %v1824_v6 = vsel %vm969_vm4, %v1821_v0, %v1823_v1 }
  0xbf   : > { %v8396_v5 = vadd.f32 %v994_v56, %v878_v48  ;;  %v1409_v60 = vsel %vm969_vm4, %v1406_v59, %v1408_v16  ;;  %v1899_v7 = vadd.f32 %v1824_v6, %v1715_v55  ;;  %v1565_v29 = vmul.f32 %v8257_v53, %v532_v36  ;;  %v8457_v6 = vpop.permute.xlu1 %542 }
  0xc0   : > { %2131 = vst.msk [vmem:[#allocation2 + $0x31] sm:$0xff] %vm2126_vm0, %v1984_v33  ;;  %v1481_v8 = vadd.f32 %v1409_v60, %v1297_v61  ;;  %v8402_v9 = vmul.f32 %v8219_v34, %v532_v36  ;;  %v1749_v31 = vmul.f32 %v8250_v51, %v532_v36  ;;  %v8406_v10 = vmul.f32 %v8222_v35, %v528_v3 }
  0xc1   : > { %v1930_v58 = vmul.f32 %v8370_v57, %v1899_v7  ;;  %v813_v0 = vrot.slane %v8391_v46, 1  ;;  %v8411_v59 = vmul.f32 %v8253_v52, %v532_v36  ;;  %v8414_v38 = vmul.f32 %v8219_v34, %v528_v3  ;;  %v539_v7 = vpop.permute.xlu0 %538 }
  0xc2   : > { %v1644_v13 = vrot.slane %v1565_v29, 1  ;;  %v811_v15 = vrot.slane %v8406_v10, 1  ;;  %v8418_v12 = vmul.f32 %v8253_v52, %v528_v3  ;;  %v8421_v17 = vmul.f32 %v8236_v43, %v528_v3 }
  0xc3   : > { %v1961_v21 = vadd.f32 %v8378_v20, %v1930_v58  ;;  %v1509_v23 = vmul.f32 %v8247_v50, %v528_v3  ;;  %v1564_v14 = vmul.f32 %v8257_v53, %v528_v3  ;;  %v1748_v25 = vmul.f32 %v8250_v51, %v528_v3 }
  0xc4   : > { %v8435_v32 = vmul.f32 %v8236_v43, %v532_v36  ;;  %v1828_v37 = vrot.slane %v1749_v31, 2  ;;  %v812_v39 = vsel %vm784_vm3, %v810_v26, %v811_v15  ;;  %v1227_v48 = vrot.slane %v8418_v12, 1 }
  0xc5   : > { %v1985_v16 = vmax.f32 %v1961_v21, 0.0  ;;  %v1533_v54 = vadd.f32 %v1509_v23, %v1481_v8  ;;  %v1642_v61 = vrot.slane %v1564_v14, 1  ;;  %v1826_v62 = vrot.slane %v1748_v25, 2 }
  0xc6   : > { %v998_v36 = vrot.slane %v8402_v9, 2  ;;  %v1229_v1 = vrot.slane %v8411_v59, 1  ;;  %v996_v55 = vrot.slane %v8414_v38, 2  ;;  %v1228_v11 = vsel %vm784_vm3, %v1226_v47, %v1227_v48 }
  0xc7   : > { %2132 = vst.msk [vmem:[#allocation2 + $0x39] sm:$0xff] %vm2126_vm0, %v1985_v16  ;;  %v1411_v26 = vrot.slane %v8421_v17, 2  ;;  %v1643_v33 = vsel %vm784_vm3, %v1641_v45, %v1642_v61  ;;  %v1645_v56 = vsel %vm784_vm3, %v1642_v61, %v1644_v13  ;;  %v879_v60 = vadd.f32 %v812_v39, %v8310_v19  ;;  %v2176_v29 = vld [vmem:[#allocation2 + $0x31] sm:$0xff]  ;;  %v554_v16 = vpop.permute.xlu1 %553 }
  0xc8   : > { %v2155_v8 = vld [vmem:[#allocation2 + $0x30] sm:$0xff]  ;;  %v1413_v31 = vrot.slane %v8435_v32, 2  ;;  %v671_v27 = vmul.f32 %v8231_v40, %v528_v3  ;;  %v1716_v47 = vadd.f32 %v1643_v33, %v1532_v4  ;;  %v1717_v58 = vadd.f32 %v1645_v56, %v1533_v54  ;;  %7375 = vmatprep.mubr.msk.f32.mxu0 %vm2126_vm0, %v2176_v29 }
  0xc9   : > { %v1091_v18 = vmul.f32 %v8244_v49, %v528_v3  ;;  %v1827_v45 = vsel %vm969_vm4, %v1825_v63, %v1826_v62  ;;  %v1829_v13 = vsel %vm969_vm4, %v1826_v62, %v1828_v37  ;;  %v1298_v19 = vadd.f32 %v1228_v11, %v8388_v2  ;;  %7407 = vmatprep.mubr.msk.f32.mxu1 %vm2126_vm0, %v2155_v8 }
  0xca   : > { %v1900_v21 = vadd.f32 %v1827_v45, %v1716_v47  ;;  %v1901_v23 = vadd.f32 %v1829_v13, %v1717_v58  ;;  %v997_v4 = vsel %vm969_vm4, %v995_v41, %v996_v55  ;;  %v730_v3 = vmul.f32 %v8222_v35, %v539_v7 }
  0xcb   : > { %v1064_v14 = vadd.f32 %v997_v4, %v879_v60  ;;  %v1412_v42 = vsel %vm969_vm4, %v1410_v44, %v1411_v26  ;;  %v672_v63 = vmul.f32 %v8231_v40, %v539_v7  ;;  %v8483_v2 = vmul.f32 %v8219_v34, %v539_v7 }
  0xcc   : > { %v1931_v25 = vmul.f32 %v8370_v57, %v1900_v21  ;;  %v1932_v24 = vmul.f32 %v8370_v57, %v1901_v23  ;;  %v8488_v41 = vmul.f32 %v8253_v52, %v539_v7  ;;  %v8491_v28 = vmul.f32 %v8236_v43, %v539_v7 }
  0xcd   : > { %v1482_v37 = vadd.f32 %v1412_v42, %v1298_v19  ;;  %v1092_v30 = vmul.f32 %v8244_v49, %v539_v7  ;;  %v8495_v44 = vmul.f32 %v8257_v53, %v539_v7  ;;  %v8498_v39 = vmul.f32 %v8250_v51, %v539_v7 }
  0xce   : > { %v1962_v54 = vadd.f32 %v8378_v20, %v1931_v25  ;;  %v1963_v61 = vadd.f32 %v8378_v20, %v1932_v24  ;;  %v815_v62 = vrot.slane %v730_v3, 1  ;;  %v8503_v11 = vmul.f32 %v8222_v35, %v554_v16  ;;  %v2177_v33 = vld [vmem:[#allocation2 + $0x39] sm:$0xff] }
  0xcf   : > { %v8505_v56 = vld [vmem:[#allocation2 + $0x38] sm:$0xff]  ;;  %v1000_v60 = vrot.slane %v8483_v2, 2  ;;  %v1116_v29 = vadd.f32 %v1092_v30, %v1064_v14  ;;  %v1510_v8 = vmul.f32 %v8247_v50, %v539_v7  ;;  %v8510_v47 = vmul.f32 %v8219_v34, %v554_v16  ;;  %7376 = vmatmul.mubr.msk.f32.gmra.mxu0 %vm2126_vm0, %v2177_v33 }
  0xd0   : > { %7408 = vmatmul.mubr.msk.f32.gmra.mxu1 %vm2126_vm0, %v8505_v56  ;;  %v1986_v58 = vmax.f32 %v1962_v54, 0.0  ;;  %v1987_v45 = vmax.f32 %v1963_v61, 0.0  ;;  %v1231_v13 = vrot.slane %v8488_v41, 1  ;;  %v1415_v19 = vrot.slane %v8491_v28, 2  ;;  %v547_v61 = vpop.permute.xlu0 %546 }
  0xd1   : > { %v1534_v21 = vadd.f32 %v1510_v8, %v1482_v37  ;;  %v1646_v23 = vrot.slane %v8495_v44, 1  ;;  %v1830_v4 = vrot.slane %v8498_v39, 2  ;;  %v8520_v7 = vmul.f32 %v8231_v40, %v554_v16 }
  0xd2   : > { %2133 = vst.msk [vmem:[#allocation2 + $0x49] sm:$0xff] %vm2126_vm0, %v1986_v58  ;;  %2134 = vst.msk [vmem:[#allocation2 + $0x51] sm:$0xff] %vm2126_vm0, %v1987_v45  ;;  %v820_v3 = vrot.slane %v8503_v11, 1  ;;  %v8526_v14 = vmul.f32 %v8244_v49, %v554_v16  ;;  %v731_v42 = vmul.f32 %v8222_v35, %v8457_v6  ;;  %v814_v2 = vsel %vm784_vm3, %v811_v15, %v813_v0 }
  0xd3   : > { %v1005_v25 = vrot.slane %v8510_v47, 2  ;;  %v8537_v24 = vmul.f32 %v8253_v52, %v554_v16  ;;  %v8540_v41 = vmul.f32 %v8236_v43, %v554_v16  ;;  %v880_v28 = vadd.f32 %v814_v2, %v671_v27 }
  0xd4   : > { %v8543_v37 = vmul.f32 %v8247_v50, %v554_v16  ;;  %v8546_v30 = vmul.f32 %v8257_v53, %v554_v16  ;;  %v816_v46 = vrot.slane %v731_v42, 1  ;;  %v8550_v10 = vmul.f32 %v8219_v34, %v8457_v6 }
  0xd5   : > { %v999_v0 = vsel %vm969_vm4, %v996_v55, %v998_v36  ;;  %v1093_v15 = vmul.f32 %v8244_v49, %v8457_v6  ;;  %v1115_v27 = vadd.f32 %v1091_v18, %v8396_v5  ;;  %v1150_v44 = vmul.f32 %v8253_v52, %v8457_v6 }
  0xd6   : > { %v817_v39 = vsel %vm784_vm3, %v815_v62, %v816_v46  ;;  %v1065_v54 = vadd.f32 %v999_v0, %v880_v28  ;;  %v1230_v9 = vsel %vm784_vm3, %v1227_v48, %v1229_v1  ;;  %v8570_v38 = vmul.f32 %v8236_v43, %v8457_v6 }
  0xd7   : > { %v8573_v36 = vmul.f32 %v8250_v51, %v554_v16  ;;  %v1001_v5 = vrot.slane %v8550_v10, 2  ;;  %v1232_v55 = vrot.slane %v1150_v44, 1  ;;  %v1299_v18 = vadd.f32 %v1230_v9, %v1115_v27 }
  0xd8   : > { %v1236_v62 = vrot.slane %v8537_v24, 1  ;;  %v1420_v59 = vrot.slane %v8540_v41, 2  ;;  %v673_v12 = vmul.f32 %v8231_v40, %v8457_v6  ;;  %v1567_v48 = vmul.f32 %v8257_v53, %v8457_v6 }
  0xd9   : > { %v881_v1 = vadd.f32 %v817_v39, %v672_v63  ;;  %v1414_v16 = vsel %vm969_vm4, %v1411_v26, %v1413_v31  ;;  %v1416_v33 = vrot.slane %v8570_v38, 2  ;;  %v1751_v8 = vmul.f32 %v8250_v51, %v8457_v6  ;;  %v2178_v58 = vld [vmem:[#allocation2 + $0x49] sm:$0xff]  ;;  %v2179_v42 = vld [vmem:[#allocation2 + $0x51] sm:$0xff] }
  0xda   : > { %v8590_v45 = vld [vmem:[#allocation2 + $0x48] sm:$0xff]  ;;  %v1117_v2 = vadd.f32 %v1093_v15, %v1065_v54  ;;  %v1233_v28 = vsel %vm784_vm3, %v1231_v13, %v1232_v55  ;;  %v1647_v0 = vrot.slane %v1567_v48, 1  ;;  %v732_v63 = vmul.f32 %v8222_v35, %v547_v61  ;;  %7378 = vmatprep.mubr.msk.f32.mxu0 %vm2126_vm0, %v2178_v58  ;;  %v8597_v17 = vld [vmem:[#allocation2 + $0x50] sm:$0xff] }
  0xdb   : > { %7410 = vmatprep.mubr.msk.f32.mxu1 %vm2126_vm0, %v8590_v45  ;;  %v1002_v32 = vsel %vm969_vm4, %v1000_v60, %v1001_v5  ;;  %v1300_v26 = vadd.f32 %v1233_v28, %v1116_v29  ;;  %v1483_v31 = vadd.f32 %v1414_v16, %v1299_v18  ;;  %v1831_v27 = vrot.slane %v1751_v8, 2  ;;  %7379 = vmatmul.mubr.msk.f32.gmra.mxu0 %vm2126_vm0, %v2179_v42 }
  0xdc   : > { %7411 = vmatmul.mubr.msk.f32.gmra.mxu1 %vm2126_vm0, %v8597_v17  ;;  %v1648_v13 = vsel %vm784_vm3, %v1646_v23, %v1647_v0  ;;  %v818_v15 = vrot.slane %v732_v63, 1  ;;  %v917_v44 = vmul.f32 %v8219_v34, %v547_v61  ;;  %v1151_v39 = vmul.f32 %v8253_v52, %v547_v61 }
  0xdd   : > { %v1417_v54 = vsel %vm969_vm4, %v1415_v19, %v1416_v33  ;;  %v1511_v60 = vmul.f32 %v8247_v50, %v8457_v6  ;;  %v1718_v29 = vadd.f32 %v1648_v13, %v1534_v21  ;;  %v1335_v9 = vmul.f32 %v8236_v43, %v547_v61 }
  0xde   : > { %v1832_v38 = vsel %vm969_vm4, %v1830_v4, %v1831_v27  ;;  %v819_v18 = vsel %vm784_vm3, %v816_v46, %v818_v15  ;;  %v1234_v48 = vrot.slane %v1151_v39, 1  ;;  %v1568_v23 = vmul.f32 %v8257_v53, %v547_v61  ;;  %v562_v46 = vpop.permute.xlu1 %561 }
  0xdf   : > { %v1066_v16 = vadd.f32 %v1002_v32, %v881_v1  ;;  %v1484_v8 = vadd.f32 %v1417_v54, %v1300_v26  ;;  %v1535_v58 = vadd.f32 %v1511_v60, %v1483_v31  ;;  %v1902_v42 = vadd.f32 %v1832_v38, %v1718_v29 }
  0xe0   : > { %v1003_v28 = vrot.slane %v917_v44, 2  ;;  %v1235_v19 = vsel %vm784_vm3, %v1232_v55, %v1234_v48  ;;  %v1649_v63 = vrot.slane %v1568_v23, 1  ;;  %v1752_v6 = vmul.f32 %v8250_v51, %v547_v61  ;;  %v8624_v44 = vpop.permute.xlu0 %557 }
  0xe1   : > { %v1651_v21 = vrot.slane %v8546_v30, 1  ;;  %v1933_v13 = vmul.f32 %v8370_v57, %v1902_v42  ;;  %v882_v4 = vadd.f32 %v819_v18, %v673_v12  ;;  %v1418_v22 = vrot.slane %v1335_v9, 2 }
  0xe2   : > { %v1835_v15 = vrot.slane %v8573_v36, 2  ;;  %v1301_v39 = vadd.f32 %v1235_v19, %v1117_v2  ;;  %v1650_v1 = vsel %vm784_vm3, %v1647_v0, %v1649_v63  ;;  %v1833_v32 = vrot.slane %v1752_v6, 2 }
  0xe3   : > { %v1118_v26 = vadd.f32 %v8526_v14, %v1066_v16  ;;  %v1536_v55 = vadd.f32 %v8543_v37, %v1484_v8  ;;  %v1964_v31 = vadd.f32 %v8378_v20, %v1933_v13  ;;  %v1719_v61 = vadd.f32 %v1650_v1, %v1535_v58  ;;  %v8683_v13 = vld [vmem:[%s10118_s4 + $0xa] sm:$0x3] }
  0xe4   : > { %v1004_v30 = vsel %vm969_vm4, %v1001_v5, %v1003_v28  ;;  %v1834_v12 = vsel %vm969_vm4, %v1831_v27, %v1833_v32  ;;  %v8631_v36 = vmul.f32 %v8222_v35, %v562_v46  ;;  %v1571_v2 = vmul.f32 %v8257_v53, %v562_v46  ;;  %7527 = vmatprep.subr.msk.mxu1 %vm2254_vm2, %v8683_v13 }
  0xe5   : > { %v1988_v0 = vmax.f32 %v1964_v31, 0.0  ;;  %v8634_v14 = vadd.f32 %v1004_v30, %v882_v4  ;;  %v1419_v37 = vsel %vm969_vm4, %v1416_v33, %v1418_v22  ;;  %v1903_v54 = vadd.f32 %v1834_v12, %v1719_v61  ;;  %v569_v61 = vpop.permute.xlu0 %568 }
  0xe6   : > { %v1485_v60 = vadd.f32 %v1419_v37, %v1301_v39  ;;  %v8638_v29 = vmul.f32 %v8219_v34, %v562_v46  ;;  %v8641_v10 = vmul.f32 %v8253_v52, %v562_v46  ;;  %v8645_v5 = vmul.f32 %v8222_v35, %v8624_v44 }
  0xe7   : > { %2135 = vst.msk [vmem:[#allocation2 + $0x61] sm:$0xff] %vm2126_vm0, %v1988_v0  ;;  %v1934_v27 = vmul.f32 %v8370_v57, %v1903_v54  ;;  %v8650_v9 = vmul.f32 %v8236_v43, %v562_v46  ;;  %v1755_v22 = vmul.f32 %v8250_v51, %v562_v46  ;;  %v8655_v33 = vmul.f32 %v8219_v34, %v8624_v44 }
  0xe8   : > { %v1654_v38 = vrot.slane %v1571_v2, 1  ;;  %v821_v18 = vrot.slane %v8645_v5, 1  ;;  %v8660_v48 = vmul.f32 %v8253_v52, %v8624_v44  ;;  %v1513_v23 = vmul.f32 %v8247_v50, %v8624_v44 }
  0xe9   : > { %v1965_v16 = vadd.f32 %v8378_v20, %v1934_v27  ;;  %v8667_v8 = vmul.f32 %v8236_v43, %v8624_v44  ;;  %v1570_v58 = vmul.f32 %v8257_v53, %v8624_v44  ;;  %v1754_v42 = vmul.f32 %v8250_v51, %v8624_v44  ;;  %v8712_v27 = vpop.permute.xlu1 %572 }
  0xea   : > { %v822_v28 = vsel %vm784_vm3, %v820_v3, %v821_v18  ;;  %v1006_v19 = vrot.slane %v8655_v33, 2  ;;  %v1237_v63 = vrot.slane %v8660_v48, 1  ;;  %v1537_v6 = vadd.f32 %v1513_v23, %v1485_v60 }
  0xeb   : > { %v1989_v4 = vmax.f32 %v1965_v16, 0.0  ;;  %v1838_v46 = vrot.slane %v1755_v22, 2  ;;  %v1652_v39 = vrot.slane %v1570_v58, 1  ;;  %v1836_v1 = vrot.slane %v1754_v42, 2 }
  0xec   : > { %v823_v11 = vrot.slane %v8631_v36, 1  ;;  %v1008_v3 = vrot.slane %v8638_v29, 2  ;;  %v1238_v32 = vsel %vm784_vm3, %v1236_v62, %v1237_v63  ;;  %v883_v31 = vadd.f32 %v822_v28, %v8520_v7 }
  0xed   : > { %2136 = vst.msk [vmem:[#allocation2 + $0x69] sm:$0xff] %vm2126_vm0, %v1989_v4  ;;  %v1239_v30 = vrot.slane %v8641_v10, 1  ;;  %v1423_v12 = vrot.slane %v8650_v9, 2  ;;  %v1653_v2 = vsel %vm784_vm3, %v1651_v21, %v1652_v39  ;;  %v1655_v36 = vsel %vm784_vm3, %v1652_v39, %v1654_v38 }
  0xee   : > { %v1421_v0 = vrot.slane %v8667_v8, 2  ;;  %v1720_v37 = vadd.f32 %v1653_v2, %v1536_v55  ;;  %v1721_v54 = vadd.f32 %v1655_v36, %v1537_v6  ;;  %v1007_v7 = vsel %vm969_vm4, %v1005_v25, %v1006_v19  ;;  %v8706_v24 = vld [vmem:[#allocation2 + $0x61] sm:$0xff] }
  0xef   : > { %v8708_v62 = vld [vmem:[#allocation2 + $0x60] sm:$0xff]  ;;  %v1837_v60 = vsel %vm969_vm4, %v1835_v15, %v1836_v1  ;;  %v1839_v21 = vsel %vm969_vm4, %v1836_v1, %v1838_v46  ;;  %v1302_v22 = vadd.f32 %v1238_v32, %v1118_v26  ;;  %v8715_v55 = vmul.f32 %v8222_v35, %v569_v61  ;;  %7381 = vmatprep.mubr.msk.f32.mxu0 %vm2126_vm0, %v8706_v24 }
  0xf0   : > { %v1904_v47 = vadd.f32 %v1837_v60, %v1720_v37  ;;  %v1905_v38 = vadd.f32 %v1839_v21, %v1721_v54  ;;  %v1068_v25 = vadd.f32 %v1007_v7, %v883_v31  ;;  %v8720_v23 = vmul.f32 %v8219_v34, %v569_v61  ;;  %7413 = vmatprep.mubr.msk.f32.mxu1 %vm2126_vm0, %v8708_v62  ;;  %v8755_v21 = vpop.permute.xlu1 %583 }
  0xf1   : > { %v675_v15 = vmul.f32 %v8231_v40, %v8624_v44  ;;  %v1095_v26 = vmul.f32 %v8244_v49, %v8624_v44  ;;  %v1155_v16 = vmul.f32 %v8253_v52, %v569_v61  ;;  %v8730_v58 = vmul.f32 %v8236_v43, %v569_v61 }
  0xf2   : > { %v1935_v42 = vmul.f32 %v8370_v57, %v1904_v47  ;;  %v1936_v28 = vmul.f32 %v8370_v57, %v1905_v38  ;;  %v1422_v6 = vsel %vm969_vm4, %v1420_v59, %v1421_v0  ;;  %v1096_v4 = vmul.f32 %v8244_v49, %v569_v61 }
  0xf3   : > { %v1486_v46 = vadd.f32 %v1422_v6, %v1302_v22  ;;  %v8741_v44 = vmul.f32 %v8231_v40, %v569_v61  ;;  %v825_v39 = vrot.slane %v8715_v55, 1  ;;  %v1572_v1 = vmul.f32 %v8257_v53, %v569_v61 }
  0xf4   : > { %v1966_v32 = vadd.f32 %v8378_v20, %v1935_v42  ;;  %v1967_v31 = vadd.f32 %v8378_v20, %v1936_v28  ;;  %v1010_v2 = vrot.slane %v8720_v23, 2  ;;  %v1120_v36 = vadd.f32 %v1096_v4, %v1068_v25  ;;  %v8748_v41 = vld [vmem:[#allocation2 + $0x69] sm:$0xff] }
  0xf5   : > { %v8750_v59 = vld [vmem:[#allocation2 + $0x68] sm:$0xff]  ;;  %v1241_v37 = vrot.slane %v1155_v16, 1  ;;  %v1425_v54 = vrot.slane %v8730_v58, 2  ;;  %v1514_v7 = vmul.f32 %v8247_v50, %v569_v61  ;;  %v1756_v60 = vmul.f32 %v8250_v51, %v569_v61  ;;  %7382 = vmatmul.mubr.msk.f32.gmra.mxu0 %vm2126_vm0, %v8748_v41 }
  0xf6   : > { %7414 = vmatmul.mubr.msk.f32.gmra.mxu1 %vm2126_vm0, %v8750_v59  ;;  %v1990_v22 = vmax.f32 %v1966_v32, 0.0  ;;  %v1991_v47 = vmax.f32 %v1967_v31, 0.0  ;;  %v8763_v38 = vmul.f32 %v8247_v50, %v8755_v21  ;;  %v8767_v25 = vmul.f32 %v8257_v53, %v8755_v21 }
  0xf7   : > { %v1538_v16 = vadd.f32 %v1514_v7, %v1486_v46  ;;  %v1656_v61 = vrot.slane %v1572_v1, 1  ;;  %v8771_v58 = vmul.f32 %v8222_v35, %v8712_v27  ;;  %v824_v42 = vsel %vm784_vm3, %v821_v18, %v823_v11  ;;  %v577_v1 = vpop.permute.xlu0 %576 }
  0xf8   : > { %2137 = vst.msk [vmem:[#allocation2 + $0x79] sm:$0xff] %vm2126_vm0, %v1990_v22  ;;  %2138 = vst.msk [vmem:[#allocation2 + $0x81] sm:$0xff] %vm2126_vm0, %v1991_v47  ;;  %v884_v28 = vadd.f32 %v824_v42, %v675_v15  ;;  %v8780_v6 = vmul.f32 %v8219_v34, %v8712_v27  ;;  %v1119_v4 = vadd.f32 %v1095_v26, %v8634_v14 }
  0xf9   : > { %v1156_v46 = vmul.f32 %v8253_v52, %v8712_v27  ;;  %v1009_v5 = vsel %vm969_vm4, %v1006_v19, %v1008_v3  ;;  %v1097_v18 = vmul.f32 %v8244_v49, %v8712_v27  ;;  %v1240_v11 = vsel %vm784_vm3, %v1237_v63, %v1239_v30 }
  0xfa   : > { %v1340_v14 = vmul.f32 %v8236_v43, %v8712_v27  ;;  %v1069_v15 = vadd.f32 %v1009_v5, %v884_v28  ;;  %v1303_v32 = vadd.f32 %v1240_v11, %v1119_v4  ;;  %v1424_v29 = vsel %vm969_vm4, %v1421_v0, %v1423_v12 }
  0xfb   : > { %v1242_v26 = vrot.slane %v1156_v46, 1  ;;  %v1573_v10 = vmul.f32 %v8257_v53, %v8712_v27  ;;  %v1757_v48 = vmul.f32 %v8250_v51, %v8712_v27  ;;  %v738_v19 = vmul.f32 %v8222_v35, %v577_v1 }
  0xfc   : > { %v1426_v33 = vrot.slane %v1340_v14, 2  ;;  %v1840_v63 = vrot.slane %v1756_v60, 2  ;;  %v1487_v30 = vadd.f32 %v1424_v29, %v1303_v32  ;;  %v923_v31 = vmul.f32 %v8219_v34, %v577_v1 }
  0xfd   : > { %v1243_v3 = vsel %vm784_vm3, %v1241_v37, %v1242_v26  ;;  %v826_v9 = vrot.slane %v8771_v58, 1  ;;  %v1657_v7 = vrot.slane %v1573_v10, 1  ;;  %v1841_v12 = vrot.slane %v1757_v48, 2 }
  0xfe   : > { %v1304_v8 = vadd.f32 %v1243_v3, %v1120_v36  ;;  %v1011_v0 = vrot.slane %v8780_v6, 2  ;;  %v1515_v22 = vmul.f32 %v8247_v50, %v8712_v27  ;;  %v828_v47 = vrot.slane %v738_v19, 1 }
  0xff   : > { %v1157_v42 = vmul.f32 %v8253_v52, %v577_v1  ;;  %v1121_v28 = vadd.f32 %v1097_v18, %v1069_v15  ;;  %v1427_v60 = vsel %vm969_vm4, %v1425_v54, %v1426_v33  ;;  %v1658_v37 = vsel %vm784_vm3, %v1656_v61, %v1657_v7  ;;  %v8819_v46 = vld [vmem:[#allocation2 + $0x79] sm:$0xff]  ;;  %v8823_v5 = vld [vmem:[#allocation2 + $0x81] sm:$0xff] }
 0x100   : > { %v1341_v4 = vmul.f32 %v8236_v43, %v577_v1  ;;  %v8821_v36 = vld [vmem:[#allocation2 + $0x78] sm:$0xff]  ;;  %v1539_v11 = vadd.f32 %v1515_v22, %v1487_v30  ;;  %v1722_v14 = vadd.f32 %v1658_v37, %v1538_v16  ;;  %v1013_v32 = vrot.slane %v923_v31, 2  ;;  %7384 = vmatprep.mubr.msk.f32.mxu0 %vm2126_vm0, %v8819_v46  ;;  %v8829_v54 = vld [vmem:[#allocation2 + $0x80] sm:$0xff]  ;;  %v592_v22 = vpop.permute.xlu1 %591 }
 0x101   : > { %v1244_v29 = vrot.slane %v1157_v42, 1  ;;  %7416 = vmatprep.mubr.msk.f32.mxu1 %vm2126_vm0, %v8821_v36  ;;  %v1488_v61 = vadd.f32 %v1427_v60, %v1304_v8  ;;  %v1842_v18 = vsel %vm969_vm4, %v1840_v63, %v1841_v12  ;;  %v1574_v10 = vmul.f32 %v8257_v53, %v577_v1  ;;  %7385 = vmatmul.mubr.msk.f32.gmra.mxu0 %vm2126_vm0, %v8823_v5 }
 0x102   : > { %v1428_v15 = vrot.slane %v1341_v4, 2  ;;  %7417 = vmatmul.mubr.msk.f32.gmra.mxu1 %vm2126_vm0, %v8829_v54  ;;  %v1906_v16 = vadd.f32 %v1842_v18, %v1722_v14  ;;  %v829_v48 = vsel %vm784_vm3, %v826_v9, %v828_v47  ;;  %v1758_v3 = vmul.f32 %v8250_v51, %v577_v1 }
 0x103   : > { %v1245_v19 = vsel %vm784_vm3, %v1242_v26, %v1244_v29  ;;  %v1759_v63 = vmul.f32 %v8250_v51, %v8755_v21  ;;  %v677_v30 = vmul.f32 %v8231_v40, %v8712_v27  ;;  %v1659_v8 = vrot.slane %v1574_v10, 1  ;;  %v8854_v27 = vpop.permute.xlu0 %587 }
 0x104   : > { %v1305_v31 = vadd.f32 %v1245_v19, %v1121_v28  ;;  %v1661_v42 = vrot.slane %v8767_v25, 1  ;;  %v1937_v60 = vmul.f32 %v8370_v57, %v1906_v16  ;;  %v1014_v47 = vsel %vm969_vm4, %v1011_v0, %v1013_v32 }
 0x105   : > { %v1843_v26 = vrot.slane %v1758_v3, 2  ;;  %v1540_v1 = vadd.f32 %v8763_v38, %v1488_v61  ;;  %v886_v37 = vadd.f32 %v829_v48, %v677_v30  ;;  %v1429_v4 = vsel %vm969_vm4, %v1426_v33, %v1428_v15 }
 0x106   : > { %v1660_v14 = vsel %vm784_vm3, %v1657_v7, %v1659_v8  ;;  %v1968_v28 = vadd.f32 %v8378_v20, %v1937_v60  ;;  %v1489_v29 = vadd.f32 %v1429_v4, %v1305_v31  ;;  %v8858_v18 = vmul.f32 %v8222_v35, %v592_v22 }
 0x107   : > { %v1723_v25 = vadd.f32 %v1660_v14, %v1539_v11  ;;  %v1844_v10 = vsel %vm969_vm4, %v1841_v12, %v1843_v26  ;;  %v8862_v32 = vmul.f32 %v8219_v34, %v592_v22  ;;  %v1577_v38 = vmul.f32 %v8257_v53, %v592_v22 }
 0x108   : > { %v1761_v33 = vmul.f32 %v8250_v51, %v592_v22  ;;  %v1992_v61 = vmax.f32 %v1968_v28, 0.0  ;;  %v1517_v15 = vmul.f32 %v8247_v50, %v8854_v27  ;;  %v1576_v11 = vmul.f32 %v8257_v53, %v8854_v27 }
 0x109   : > { %v1907_v7 = vadd.f32 %v1844_v10, %v1723_v25  ;;  %v8871_v16 = vmul.f32 %v8253_v52, %v592_v22  ;;  %v8874_v12 = vmul.f32 %v8236_v43, %v592_v22  ;;  %v1664_v48 = vrot.slane %v1577_v38, 1  ;;  %v8887_v38 = vpop.permute.xlu1 %602 }
 0x10a   : > { %v1760_v19 = vmul.f32 %v8250_v51, %v8854_v27  ;;  %2139 = vst.msk [vmem:[#allocation2 + $0x91] sm:$0xff] %vm2126_vm0, %v1992_v61  ;;  %v1848_v30 = vrot.slane %v1761_v33, 2  ;;  %v1541_v31 = vadd.f32 %v1517_v15, %v1489_v29  ;;  %v1662_v8 = vrot.slane %v1576_v11, 1 }
 0x10b   : > { %v1938_v3 = vmul.f32 %v8370_v57, %v1907_v7  ;;  %v1845_v60 = vrot.slane %v1759_v63, 2  ;;  %v8880_v26 = vadd.f32 %v1014_v47, %v886_v37  ;;  %v833_v4 = vrot.slane %v8858_v18, 1 }
 0x10c   : > { %v1846_v14 = vrot.slane %v1760_v19, 2  ;;  %v1663_v25 = vsel %vm784_vm3, %v1661_v42, %v1662_v8  ;;  %v1665_v10 = vsel %vm784_vm3, %v1662_v8, %v1664_v48  ;;  %v1249_v33 = vrot.slane %v8871_v16, 1  ;;  %v599_v19 = vpop.permute.xlu0 %598 }
 0x10d   : > { %v1969_v22 = vadd.f32 %v8378_v20, %v1938_v3  ;;  %v1433_v29 = vrot.slane %v8874_v12, 2  ;;  %v1724_v63 = vadd.f32 %v1663_v25, %v1540_v1  ;;  %v1725_v47 = vadd.f32 %v1665_v10, %v1541_v31 }
 0x10e   : > { %v1847_v61 = vsel %vm969_vm4, %v1845_v60, %v1846_v14  ;;  %v1849_v7 = vsel %vm969_vm4, %v1846_v14, %v1848_v30  ;;  %v827_v42 = vsel %vm784_vm3, %v825_v39, %v826_v9  ;;  %v8900_v48 = vmul.f32 %v8253_v52, %v8887_v38 }
 0x10f   : > { %v1993_v37 = vmax.f32 %v1969_v22, 0.0  ;;  %v1908_v15 = vadd.f32 %v1847_v61, %v1724_v63  ;;  %v1909_v11 = vadd.f32 %v1849_v7, %v1725_v47  ;;  %v885_v1 = vadd.f32 %v827_v42, %v8741_v44 }
 0x110   : > { %v1012_v58 = vsel %vm969_vm4, %v1010_v2, %v1011_v0  ;;  %v1098_v55 = vmul.f32 %v8244_v49, %v8755_v21  ;;  %v1158_v39 = vmul.f32 %v8253_v52, %v8755_v21  ;;  %v1159_v9 = vmul.f32 %v8253_v52, %v8854_v27 }
 0x111   : > { %2140 = vst.msk [vmem:[#allocation2 + $0x99] sm:$0xff] %vm2126_vm0, %v1993_v37  ;;  %v1939_v44 = vmul.f32 %v8370_v57, %v1908_v15  ;;  %v1940_v3 = vmul.f32 %v8370_v57, %v1909_v11  ;;  %v1070_v30 = vadd.f32 %v1012_v58, %v885_v1  ;;  %v1342_v23 = vmul.f32 %v8236_v43, %v8755_v21  ;;  %v8919_v6 = vld [vmem:[#allocation2 + $0x91] sm:$0xff] }
 0x112   : > { %v8921_v2 = vld [vmem:[#allocation2 + $0x90] sm:$0xff]  ;;  %v1579_v0 = vmul.f32 %v8257_v53, %v8887_v38  ;;  %v1246_v31 = vrot.slane %v1158_v39, 1  ;;  %v1247_v8 = vrot.slane %v1159_v9, 1  ;;  %v1343_v60 = vmul.f32 %v8236_v43, %v8854_v27  ;;  %7387 = vmatprep.mubr.msk.f32.mxu0 %vm2126_vm0, %v8919_v6  ;;  %v607_v9 = vpop.permute.xlu0 %606 }
 0x113   : > { %7419 = vmatprep.mubr.msk.f32.mxu1 %vm2126_vm0, %v8921_v2  ;;  %v1970_v14 = vadd.f32 %v8378_v20, %v1939_v44  ;;  %v1971_v22 = vadd.f32 %v8378_v20, %v1940_v3  ;;  %v8935_v25 = vmul.f32 %v8236_v43, %v8887_v38  ;;  %v1122_v10 = vadd.f32 %v1098_v55, %v1070_v30 }
 0x114   : > { %v8939_v63 = vmul.f32 %v8250_v51, %v8887_v38  ;;  %v1248_v47 = vsel %vm784_vm3, %v1246_v31, %v1247_v8  ;;  %v1430_v37 = vrot.slane %v1342_v23, 2  ;;  %v1431_v61 = vrot.slane %v1343_v60, 2 }
 0x115   : > { %v1994_v7 = vmax.f32 %v1970_v14, 0.0  ;;  %v1995_v42 = vmax.f32 %v1971_v22, 0.0  ;;  %v1306_v11 = vadd.f32 %v1248_v47, %v1122_v10  ;;  %v1519_v1 = vmul.f32 %v8247_v50, %v8887_v38 }
 0x116   : > { %v1667_v58 = vrot.slane %v1579_v0, 1  ;;  %v1432_v39 = vsel %vm969_vm4, %v1430_v37, %v1431_v61  ;;  %v1578_v55 = vmul.f32 %v8257_v53, %v599_v19  ;;  %v1518_v3 = vmul.f32 %v8247_v50, %v599_v19 }
 0x117   : > { %2141 = vst.msk [vmem:[#allocation2 + $0xa9] sm:$0xff] %vm2126_vm0, %v1994_v7  ;;  %2142 = vst.msk [vmem:[#allocation2 + $0xb1] sm:$0xff] %vm2126_vm0, %v1995_v42  ;;  %v1490_v44 = vadd.f32 %v1432_v39, %v1306_v11  ;;  %v1762_v30 = vmul.f32 %v8250_v51, %v599_v19  ;;  %v1099_v23 = vmul.f32 %v8244_v49, %v8854_v27  ;;  %v1851_v14 = vrot.slane %v8939_v63, 2 }
 0x118   : > { %v8953_v31 = vld [vmem:[#allocation2 + $0x99] sm:$0xff]  ;;  %v8960_v22 = vmul.f32 %v8253_v52, %v599_v19  ;;  %v1666_v10 = vrot.slane %v1578_v55, 1  ;;  %v1580_v42 = vmul.f32 %v8257_v53, %v607_v9  ;;  %v1100_v11 = vmul.f32 %v8244_v49, %v599_v19 }
 0x119   : > { %v8955_v0 = vld [vmem:[#allocation2 + $0x98] sm:$0xff]  ;;  %7388 = vmatmul.mubr.msk.f32.gmra.mxu0 %vm2126_vm0, %v8953_v31  ;;  %v1542_v47 = vadd.f32 %v1518_v3, %v1490_v44  ;;  %v1850_v37 = vrot.slane %v1762_v30, 2  ;;  %v1123_v7 = vadd.f32 %v1099_v23, %v8880_v26  ;;  %v1250_v39 = vsel %vm784_vm3, %v1247_v8, %v1249_v33 }
 0x11a   : > { %7420 = vmatmul.mubr.msk.f32.gmra.mxu1 %vm2126_vm0, %v8955_v0  ;;  %v1668_v63 = vsel %vm784_vm3, %v1666_v10, %v1667_v58  ;;  %v1764_v55 = vmul.f32 %v8250_v51, %v607_v9  ;;  %v1345_v60 = vmul.f32 %v8236_v43, %v599_v19  ;;  %v1669_v44 = vrot.slane %v1580_v42, 1 }
 0x11b   : > { %v1726_v28 = vadd.f32 %v1668_v63, %v1542_v47  ;;  %v1307_v15 = vadd.f32 %v1250_v39, %v1123_v7  ;;  %v1251_v3 = vrot.slane %v8960_v22, 1  ;;  %v1852_v26 = vsel %vm969_vm4, %v1850_v37, %v1851_v14  ;;  %v614_v37 = vpop.permute.xlu1 %613 }
 0x11c   : > { %v1434_v30 = vsel %vm969_vm4, %v1431_v61, %v1433_v29  ;;  %v739_v16 = vmul.f32 %v8222_v35, %v8755_v21  ;;  %v924_v8 = vmul.f32 %v8219_v34, %v8755_v21  ;;  %v740_v19 = vmul.f32 %v8222_v35, %v8854_v27 }
 0x11d   : > { %v1910_v23 = vadd.f32 %v1852_v26, %v1726_v28  ;;  %v1491_v33 = vadd.f32 %v1434_v30, %v1307_v15  ;;  %v1163_v10 = vmul.f32 %v8253_v52, %v607_v9  ;;  %v1670_v22 = vsel %vm784_vm3, %v1667_v58, %v1669_v44 }
 0x11e   : > { %v1853_v47 = vrot.slane %v1764_v55, 2  ;;  %v925_v12 = vmul.f32 %v8219_v34, %v8854_v27  ;;  %v8990_v29 = vld [vmem:[#allocation2 + $0xa9] sm:$0xff]  ;;  %v8994_v28 = vld [vmem:[#allocation2 + $0xb1] sm:$0xff]  ;;  %v830_v42 = vrot.slane %v739_v16, 1  ;;  %v831_v35 = vrot.slane %v740_v19, 1 }
 0x11f   : > { %v8992_v61 = vld [vmem:[#allocation2 + $0xa8] sm:$0xff]  ;;  %v1941_v15 = vmul.f32 %v8370_v57, %v1910_v23  ;;  %v1543_v7 = vadd.f32 %v1519_v1, %v1491_v33  ;;  %7390 = vmatprep.mubr.msk.f32.mxu0 %vm2126_vm0, %v8990_v29  ;;  %v9001_v52 = vld [vmem:[#allocation2 + $0xb0] sm:$0xff]  ;;  %v1435_v34 = vrot.slane %v1345_v60, 2  ;;  %v1347_v58 = vmul.f32 %v8236_v43, %v607_v9 }
 0x120   : > { %7422 = vmatprep.mubr.msk.f32.mxu1 %vm2126_vm0, %v8992_v61  ;;  %v678_v63 = vmul.f32 %v8231_v40, %v8755_v21  ;;  %v1016_v39 = vrot.slane %v925_v12, 2  ;;  %7391 = vmatmul.mubr.msk.f32.gmra.mxu0 %vm2126_vm0, %v8994_v28  ;;  %v1015_v55 = vrot.slane %v924_v8, 2  ;;  %v832_v44 = vsel %vm784_vm3, %v830_v42, %v831_v35 }
 0x121   : > { %7423 = vmatmul.mubr.msk.f32.gmra.mxu1 %vm2126_vm0, %v9001_v52  ;;  %v1972_v57 = vadd.f32 %v8378_v20, %v1941_v15  ;;  %v1727_v1 = vadd.f32 %v1670_v22, %v1543_v7  ;;  %v1254_v26 = vrot.slane %v1163_v10, 1  ;;  %v1854_v60 = vsel %vm969_vm4, %v1851_v14, %v1853_v47  ;;  %v618_v20 = vpop.permute.xlu0 %617  ;;  %v622_v14 = vpop.permute.xlu1 %621 }
 0x122   : > { %v887_v43 = vadd.f32 %v832_v44, %v678_v63  ;;  %v679_v21 = vmul.f32 %v8231_v40, %v8854_v27  ;;  %v1017_v16 = vsel %vm969_vm4, %v1015_v55, %v1016_v39  ;;  %v834_v23 = vsel %vm784_vm3, %v831_v35, %v833_v4  ;;  %v7858_v40 = vld [vmem:[%s10140_s2] ss:$0 sm:$0xff]  ;;  %s6681_s2 = scalar_lea.sflag [#allocation7], %s428_s18 }
 0x123   : > { %v1996_v9 = vmax.f32 %v1972_v57, 0.0  ;;  %v1911_v30 = vadd.f32 %v1854_v60, %v1727_v1  ;;  %v1438_v33 = vrot.slane %v1347_v58, 2  ;;  %v1101_v10 = vmul.f32 %v8244_v49, %v8887_v38  ;;  %v7859_v35 = vld [vmem:[%s10141_s3] ss:$0 sm:$0xff]  ;;  %s7873_s3 = scalar_lea.vmem %s6696_s14, 128 }
 0x124   : > { %v1072_v8 = vadd.f32 %v1017_v16, %v887_v43  ;;  %v888_v19 = vadd.f32 %v834_v23, %v679_v21  ;;  %v10142_v22 = vrot.slane %v8900_v48, 1  ;;  %v1581_v4 = vmul.f32 %v8257_v53, %v614_v37  ;;  %p7874_p12 = scmp.ne.s32.totalorder %s6696_s14, %s7873_s3  ;;  %p7881_p2 = scmp.lt.s32.totalorder %s7879_s24, %s7873_s3 }
 0x125   : > { %2143 = vst.msk [vmem:[#allocation2 + $0xc1] sm:$0xff] %vm2126_vm0, %v1996_v9  ;;  %v1942_v27 = vmul.f32 %v7858_v40, %v1911_v30  ;;  %v10143_v47 = vrot.slane %v8862_v32, 2  ;;  %v10144_v49 = vrot.slane %v8935_v25, 2  ;;  %v1582_v42 = vmul.f32 %v8257_v53, %v618_v20 }
 0x126   : > { %v1253_v18 = vsel %vm784_vm3, %v1251_v3, %v10142_v22  ;;  %v1124_v15 = vadd.f32 %v1100_v11, %v1072_v8  ;;  %v10145_v3 = vmov %v10142_v22  ;;  %v1766_v32 = vmul.f32 %v8250_v51, %v618_v20  ;;  %p7875_p13 = pnand %p7874_p12, %p8059_p4  ;;  %p7882_p3 = por %p7881_p2, %p7880_p1 }
 0x127   : > { %v1019_v12 = vsel %vm969_vm4, %v1016_v39, %v10143_v47  ;;  %v1437_v38 = vsel %vm969_vm4, %v1435_v34, %v10144_v49  ;;  %v1973_v58 = vadd.f32 %v7859_v35, %v1942_v27  ;;  %v1255_v63 = vsel %vm784_vm3, %v10145_v3, %v1254_v26 }
 0x128   : > { %v1073_v7 = vadd.f32 %v1019_v12, %v888_v19  ;;  %v1583_v11 = vmul.f32 %v8257_v53, %v622_v14  ;;  %v1308_v39 = vadd.f32 %v1253_v18, %v1124_v15  ;;  %v1765_v57 = vmul.f32 %v8250_v51, %v614_v37  ;;  %p7876_p0 = pneg %p7875_p13 }
 0x129   : > { %v1672_v1 = vrot.slane %v1582_v42, 1  ;;  %v1997_v55 = vmax.f32 %v1973_v58, 0.0  ;;  %v1671_v44 = vrot.slane %v1581_v4, 1  ;;  %v1767_v43 = vmul.f32 %v8250_v51, %v622_v14 }
 0x12a   : > { %v1125_v34 = vadd.f32 %v1101_v10, %v1073_v7  ;;  %v1674_v60 = vrot.slane %v1583_v11, 1  ;;  %v1492_v21 = vadd.f32 %v1437_v38, %v1308_v39  ;;  %v1520_v9 = vmul.f32 %v8247_v50, %v614_v37  ;;  %v2652_v39 = vld [vmem:[#allocation2 + $0xa] sm:$0xff]  ;;  %p7883_p5 = pnand %p7882_p3, %p7876_p0 }
 0x12b   : > { %2144 = vst.msk [vmem:[#allocation2 + $0xc9] sm:$0xff] %vm2126_vm0, %v1997_v55  ;;  %v10146_v26 = vmov %v10144_v49  ;;  %v1673_v30 = vsel %vm784_vm3, %v1671_v44, %v1672_v1  ;;  %v1856_v16 = vrot.slane %v1766_v32, 2  ;;  %v1521_v19 = vmul.f32 %v8247_v50, %v618_v20  ;;  %v2651_v32 = vld [vmem:[#allocation2 + $0x2] sm:$0xff]  ;;  %v9104_v55 = vld [vmem:[%s10118_s4 + $0xe] sm:$0x3] }
 0x12c   : > { %v1309_v48 = vadd.f32 %v1255_v63, %v1125_v34  ;;  %v1439_v53 = vsel %vm969_vm4, %v10146_v26, %v1438_v33  ;;  %v1544_v23 = vadd.f32 %v1520_v9, %v1492_v21  ;;  %v9053_v10 = vld [vmem:[#allocation2 + $0xc1] sm:$0xff]  ;;  %v1855_v14 = vrot.slane %v1765_v57, 2  ;;  %v9128_v21 = vld [vmem:[#allocation2 + $0x32] sm:$0xff]  ;;  %v9140_v9 = vld [vmem:[#allocation2 + $0x4a] sm:$0xff] }
 0x12d   : > { %v9055_v51 = vld [vmem:[#allocation2 + $0xc0] sm:$0xff]  ;;  %v1675_v37 = vsel %vm784_vm3, %v1672_v1, %v1674_v60  ;;  %v1858_v27 = vrot.slane %v1767_v43, 2  ;;  %7393 = vmatprep.mubr.msk.f32.mxu0 %vm2126_vm0, %v9053_v10  ;;  %v9099_v1 = vld [vmem:[%s10118_s4 + $0xc] sm:$0x3]  ;;  %v7862_v44 = vld [vmem:[%s10118_s4 + $0x8] sm:$0x3] }
 0x12e   : > { %v1493_v8 = vadd.f32 %v1439_v53, %v1309_v48  ;;  %7425 = vmatprep.mubr.msk.f32.mxu1 %vm2126_vm0, %v9055_v51  ;;  %v1728_v33 = vadd.f32 %v1673_v30, %v1544_v23  ;;  %v1857_v22 = vsel %vm969_vm4, %v1855_v14, %v1856_v16  ;;  %v9092_v57 = vld [vmem:[#allocation2 + $0x1a] sm:$0xff]  ;;  %v9110_v60 = vld [vmem:[#allocation2 + $0x30] sm:$0xff]  ;;  %v9114_v43 = vld [vmem:[#allocation2 + $0x22] sm:$0xff]  ;;  %v7403_v48 = vpop.f32.mrf.mxu1 }
 0x12f   : > { %v1859_v20 = vsel %vm969_vm4, %v1856_v16, %v1858_v27  ;;  %v7861_v34 = vld [vmem:[#allocation2 + $0x20] sm:$0xff]  ;;  %v9146_v26 = vld [vmem:[#allocation2 + $0x52] sm:$0xff]  ;;  %v9158_v23 = vld [vmem:[#allocation2 + $0x6a] sm:$0xff] }
 0x130   : > { %v1545_v25 = vadd.f32 %v1521_v19, %v1493_v8  ;;  %v1912_v18 = vadd.f32 %v1857_v22, %v1728_v33  ;;  %v2552_v53 = vpop.f32.mrf.mxu1  ;;  %v9166_v19 = vld [vmem:[#allocation2 + $0x7a] sm:$0xff]  ;;  %v9172_v14 = vld [vmem:[#allocation2 + $0x82] sm:$0xff]  ;;  %v9196_v33 = vld [vmem:[#allocation2 + $0xb2] sm:$0xff] }
 0x131   : > { %v9184_v27 = vld [vmem:[#allocation2 + $0x9a] sm:$0xff]  ;;  %v7871_v53 = vld [vmem:[#allocation2 + $0x48] sm:$0xff] }
 0x132   : > { %v1729_v50 = vadd.f32 %v1675_v37, %v1545_v25  ;;  %v1943_v4 = vmul.f32 %v7858_v40, %v1912_v18  ;;  %v9064_v12 = vld [vmem:[#allocation2 + $0xc9] sm:$0xff]  ;;  %v7406_v16 = vpop.f32.mrf.mxu1  ;;  %v9178_v37 = vld [vmem:[#allocation2 + $0x92] sm:$0xff] }
 0x133   : > { %v9066_v15 = vld [vmem:[#allocation2 + $0xc8] sm:$0xff]  ;;  %7394 = vmatmul.mubr.msk.f32.gmra.mxu0 %vm2126_vm0, %v9064_v12  ;;  %v9208_v18 = vld [vmem:[#allocation2 + $0xf0] sm:$0xff] }
 0x134   : > { %v1913_v47 = vadd.f32 %v1859_v20, %v1729_v50  ;;  %7426 = vmatmul.mubr.msk.f32.gmra.mxu1 %vm2126_vm0, %v9066_v15  ;;  %v1974_v49 = vadd.f32 %v7859_v35, %v1943_v4  ;;  %v9190_v25 = vld [vmem:[#allocation2 + $0xaa] sm:$0xff]  ;;  %v9202_v22 = vld [vmem:[#allocation2 + $0xc2] sm:$0xff]  ;;  %v9222_v4 = vld [vmem:[#allocation2 + $0xf8] sm:$0xff] }
 0x135   : > { %v9210_v50 = vld [vmem:[#allocation2 + $0xca] sm:$0xff] }
 0x136   : > { %v1944_v38 = vmul.f32 %v7858_v40, %v1913_v47  ;;  %v1998_v7 = vmax.f32 %v1974_v49, 0.0  ;;  %v7864_v49 = vld [vmem:[#allocation2 + $0x19] sm:$0xff] }
 0x138   : > { %v1975_v42 = vadd.f32 %v7859_v35, %v1944_v38  ;;  %2145 = vst.msk [vmem:[#allocation2 + $0xd9] sm:$0xff] %vm2126_vm0, %v1998_v7  ;;  %v7860_v35 = vld [vmem:[#allocation2 + $0x18] sm:$0xff]  ;;  %v7865_v38 = vld [vmem:[#allocation2 + $0x21] sm:$0xff]  ;;  %v6957_v7 = vld [vmem:[%s10118_s4 + $0x10] sm:$0x3] }
 0x13a   : > { %v1999_v58 = vmax.f32 %v1975_v42, 0.0  ;;  %v7866_v42 = vld [vmem:[#allocation2 + $0x31] sm:$0xff] }
 0x13c   : > { %2146 = vst.msk [vmem:[#allocation2 + $0xe1] sm:$0xff] %vm2126_vm0, %v1999_v58  ;;  %v7867_v58 = vld [vmem:[#allocation2 + $0x39] sm:$0xff] }
 0x13f   : > { %v9074_v3 = vld [vmem:[#allocation2 + $0xd9] sm:$0xff] }
 0x140   : > { %v9076_v63 = vld [vmem:[#allocation2 + $0xd8] sm:$0xff]  ;;  %7396 = vmatprep.mubr.msk.f32.mxu0 %vm2126_vm0, %v9074_v3 }
 0x141   : > { %7428 = vmatprep.mubr.msk.f32.mxu1 %vm2126_vm0, %v9076_v63 }
 0x143   : > { %v9082_v11 = vld [vmem:[#allocation2 + $0xe1] sm:$0xff] }
 0x144   : > { %v9084_v40 = vld [vmem:[#allocation2 + $0xe0] sm:$0xff]  ;;  %7397 = vmatmul.mubr.msk.f32.gmra.mxu0 %vm2126_vm0, %v9082_v11 }
 0x145   : > { %7429 = vmatmul.mubr.msk.f32.gmra.mxu1 %vm2126_vm0, %v9084_v40  ;;  %7433 = vmatprep.mubr.msk.f32.mxu0 %vm2126_vm0, %v2651_v32  ;;  %v9216_v20 = vld [vmem:[#allocation2 + $0xda] sm:$0xff]  ;;  %v9224_v47 = vld [vmem:[#allocation2 + $0xe2] sm:$0xff] }
 0x146   : > { %7465 = vmatprep.mubr.msk.f32.mxu1 %vm2126_vm0, %v7860_v35  ;;  %v7868_v32 = vld [vmem:[#allocation2 + $0x49] sm:$0xff]  ;;  %v7869_v35 = vld [vmem:[#allocation2 + $0x51] sm:$0xff] }
 0x148   : > { %7434 = vmatmul.mubr.msk.f32.vlgmr.msra.gmra.mxu0 %vm2126_vm0, %v2652_v39 }
 0x149   : > { %7466 = vmatmul.mubr.msk.f32.vlgmr.msra.gmra.mxu1 %vm2126_vm0, %v7861_v34  ;;  %7496 = vmatpush3.msk.msra.mxu0 %vm2254_vm2, %v7862_v44  ;;  %v3210_v34 = vld [vmem:[#allocation2 + $0xf1] sm:$0xff]  ;;  %v9313_v44 = vld [vmem:[#allocation2 + $0xfa] sm:$0xff] }
 0x14a   : > { %7468 = vmatprep.mubr.msk.f32.mxu1 %vm2126_vm0, %v9110_v60  ;;  %7436 = vmatprep.mubr.msk.f32.mxu0 %vm2126_vm0, %v9092_v57 }
 0x14b   : > { %7528 = vmatpush3.msk.msra.mxu1 %vm2254_vm2, %v8683_v13  ;;  %7559 = vmatprep.subr.msk.mxu0 %vm2254_vm2, %v9099_v1  ;;  %v9134_v13 = vld [vmem:[#allocation2 + $0x3a] sm:$0xff] }
 0x14c   : > { %7591 = vmatprep.subr.msk.mxu1 %vm2254_vm2, %v9104_v55  ;;  %7437 = vmatmul.mubr.msk.f32.gmra.mxu0 %vm2126_vm0, %v9114_v43 }
 0x14d   : > { %7469 = vmatmul.mubr.msk.f32.gmra.mxu1 %vm2126_vm0, %v8505_v56  ;;  %7439 = vmatprep.mubr.msk.f32.mxu0 %vm2126_vm0, %v9128_v21  ;;  %v7371_v56 = vpop.f32.mrf.mxu0 }
 0x14e   : > { %7471 = vmatprep.mubr.msk.f32.mxu1 %vm2126_vm0, %v8590_v45  ;;  %v9152_v45 = vld [vmem:[#allocation2 + $0x62] sm:$0xff] }
 0x150   : > { %7440 = vmatmul.mubr.msk.f32.gmra.mxu0 %vm2126_vm0, %v9134_v13 }
 0x151   : > { %7472 = vmatmul.mubr.msk.f32.gmra.mxu1 %vm2126_vm0, %v8597_v17  ;;  %7442 = vmatprep.mubr.msk.f32.mxu0 %vm2126_vm0, %v9140_v9  ;;  %v2324_v17 = vpop.f32.mrf.mxu0 }
 0x152   : > { %7474 = vmatprep.mubr.msk.f32.mxu1 %vm2126_vm0, %v8708_v62  ;;  %v7870_v17 = vld [vmem:[#allocation2 + $0x38] sm:$0xff] }
 0x153   : > { %v7374_v30 = vpop.f32.mrf.mxu0 }
 0x154   : > { %7443 = vmatmul.mubr.msk.f32.gmra.mxu0 %vm2126_vm0, %v9146_v26  ;;  %v9160_v8 = vadd.f32 %v7406_v16, %v7374_v30 }
 0x155   : > { %7475 = vmatmul.mubr.msk.f32.gmra.mxu1 %vm2126_vm0, %v8750_v59  ;;  %7445 = vmatprep.mubr.msk.f32.mxu0 %vm2126_vm0, %v9152_v45  ;;  %v9300_v39 = vpop.f32.mrf.mxu0 }
 0x156   : > { %7477 = vmatprep.mubr.msk.f32.mxu1 %vm2126_vm0, %v8821_v36 }
 0x158   : > { %7446 = vmatmul.mubr.msk.f32.gmra.mxu0 %vm2126_vm0, %v9158_v23 }
 0x159   : > { %7478 = vmatmul.mubr.msk.f32.gmra.mxu1 %vm2126_vm0, %v8829_v54  ;;  %7448 = vmatprep.mubr.msk.f32.mxu0 %vm2126_vm0, %v9166_v19 }
 0x15a   : > { %7480 = vmatprep.mubr.msk.f32.mxu1 %vm2126_vm0, %v8921_v2 }
 0x15c   : > { %7449 = vmatmul.mubr.msk.f32.gmra.mxu0 %vm2126_vm0, %v9172_v14 }
 0x15d   : > { %7481 = vmatmul.mubr.msk.f32.gmra.mxu1 %vm2126_vm0, %v8955_v0  ;;  %7451 = vmatprep.mubr.msk.f32.mxu0 %vm2126_vm0, %v9178_v37 }
 0x15e   : > { %7483 = vmatprep.mubr.msk.f32.mxu1 %vm2126_vm0, %v8992_v61 }
 0x160   : > { %7452 = vmatmul.mubr.msk.f32.gmra.mxu0 %vm2126_vm0, %v9184_v27 }
 0x161   : > { %7484 = vmatmul.mubr.msk.f32.gmra.mxu1 %vm2126_vm0, %v9001_v52  ;;  %7454 = vmatprep.mubr.msk.f32.mxu0 %vm2126_vm0, %v9190_v25 }
 0x162   : > { %7486 = vmatprep.mubr.msk.f32.mxu1 %vm2126_vm0, %v9055_v51 }
 0x164   : > { %7455 = vmatmul.mubr.msk.f32.gmra.mxu0 %vm2126_vm0, %v9196_v33 }
 0x165   : > { %7487 = vmatmul.mubr.msk.f32.gmra.mxu1 %vm2126_vm0, %v9066_v15  ;;  %7457 = vmatprep.mubr.msk.f32.mxu0 %vm2126_vm0, %v9202_v22 }
 0x166   : > { %7489 = vmatprep.mubr.msk.f32.mxu1 %vm2126_vm0, %v9076_v63 }
 0x168   : > { %7458 = vmatmul.mubr.msk.f32.gmra.mxu0 %vm2126_vm0, %v9210_v50 }
 0x169   : > { %7490 = vmatmul.mubr.msk.f32.gmra.mxu1 %vm2126_vm0, %v9084_v40  ;;  %7460 = vmatprep.mubr.msk.f32.mxu0 %vm2126_vm0, %v9216_v20 }
 0x16a   : > { %7492 = vmatprep.mubr.msk.f32.mxu1 %vm2126_vm0, %v9208_v18 }
 0x16c   : > { %7461 = vmatmul.mubr.msk.f32.gmra.mxu0 %vm2126_vm0, %v9224_v47 }
 0x16d   : > { %7493 = vmatmul.mubr.msk.f32.gmra.mxu1 %vm2126_vm0, %v9222_v4  ;;  %7497 = vmatprep.mubr.msk.f32.mxu0 %vm2126_vm0, %v7864_v49  ;;  %v7872_v49 = vld [vmem:[#allocation2 + $0x50] sm:$0xff] }
 0x16e   : > { %7529 = vmatprep.mubr.msk.f32.mxu1 %vm2126_vm0, %v9092_v57  ;;  %v9302_v57 = vpop.f32.mrf.mxu1 }
 0x170   : > { %7498 = vmatmul.mubr.msk.f32.vlgmr.msra.gmra.mxu0 %vm2126_vm0, %v7865_v38 }
 0x171   : > { %7530 = vmatmul.mubr.msk.f32.vlgmr.msra.gmra.mxu1 %vm2126_vm0, %v9114_v43  ;;  %7560 = vmatpush3.msk.msra.mxu0 %vm2254_vm2, %v9099_v1  ;;  %v9304_v1 = vld [vmem:[#allocation2 + $0xf2] sm:$0xff] }
 0x172   : > { %7500 = vmatprep.mubr.msk.f32.mxu0 %vm2126_vm0, %v7866_v42  ;;  %7532 = vmatprep.mubr.msk.f32.mxu1 %vm2126_vm0, %v9128_v21 }
 0x173   : > { %7592 = vmatpush3.msk.msra.mxu1 %vm2254_vm2, %v9104_v55  ;;  %7623 = vmatprep.subr.msk.mxu0 %vm2254_vm2, %v6957_v7  ;;  %v3211_v55 = vld [vmem:[#allocation2 + $0xf9] sm:$0xff] }
 0x174   : > { %7501 = vmatmul.mubr.msk.f32.gmra.mxu0 %vm2126_vm0, %v7867_v58 }
 0x175   : > { %7533 = vmatmul.mubr.msk.f32.gmra.mxu1 %vm2126_vm0, %v9134_v13  ;;  %7503 = vmatprep.mubr.msk.f32.mxu0 %vm2126_vm0, %v7868_v32 }
 0x176   : > { %7535 = vmatprep.mubr.msk.f32.mxu1 %vm2126_vm0, %v9140_v9 }
 0x178   : > { %7504 = vmatmul.mubr.msk.f32.gmra.mxu0 %vm2126_vm0, %v7869_v35 }
 0x179   : > { %7536 = vmatmul.mubr.msk.f32.gmra.mxu1 %vm2126_vm0, %v9146_v26  ;;  %7506 = vmatprep.mubr.msk.f32.mxu0 %vm2126_vm0, %v8706_v24 }
 0x17a   : > { %7538 = vmatprep.mubr.msk.f32.mxu1 %vm2126_vm0, %v9152_v45 }
 0x17c   : > { %7507 = vmatmul.mubr.msk.f32.gmra.mxu0 %vm2126_vm0, %v8748_v41 }
 0x17d   : > { %7539 = vmatmul.mubr.msk.f32.gmra.mxu1 %vm2126_vm0, %v9158_v23  ;;  %7509 = vmatprep.mubr.msk.f32.mxu0 %vm2126_vm0, %v8819_v46 }
 0x17e   : > { %7541 = vmatprep.mubr.msk.f32.mxu1 %vm2126_vm0, %v9166_v19 }
 0x180   : > { %7510 = vmatmul.mubr.msk.f32.gmra.mxu0 %vm2126_vm0, %v8823_v5 }
 0x181   : > { %7542 = vmatmul.mubr.msk.f32.gmra.mxu1 %vm2126_vm0, %v9172_v14  ;;  %7512 = vmatprep.mubr.msk.f32.mxu0 %vm2126_vm0, %v8919_v6 }
 0x182   : > { %7544 = vmatprep.mubr.msk.f32.mxu1 %vm2126_vm0, %v9178_v37 }
 0x184   : > { %7513 = vmatmul.mubr.msk.f32.gmra.mxu0 %vm2126_vm0, %v8953_v31 }
 0x185   : > { %7545 = vmatmul.mubr.msk.f32.gmra.mxu1 %vm2126_vm0, %v9184_v27  ;;  %7515 = vmatprep.mubr.msk.f32.mxu0 %vm2126_vm0, %v8990_v29 }
 0x186   : > { %7547 = vmatprep.mubr.msk.f32.mxu1 %vm2126_vm0, %v9190_v25 }
 0x188   : > { %7516 = vmatmul.mubr.msk.f32.gmra.mxu0 %vm2126_vm0, %v8994_v28 }
 0x189   : > { %7548 = vmatmul.mubr.msk.f32.gmra.mxu1 %vm2126_vm0, %v9196_v33  ;;  %7518 = vmatprep.mubr.msk.f32.mxu0 %vm2126_vm0, %v9053_v10 }
 0x18a   : > { %7550 = vmatprep.mubr.msk.f32.mxu1 %vm2126_vm0, %v9202_v22 }
 0x18c   : > { %7519 = vmatmul.mubr.msk.f32.gmra.mxu0 %vm2126_vm0, %v9064_v12 }
 0x18d   : > { %7551 = vmatmul.mubr.msk.f32.gmra.mxu1 %vm2126_vm0, %v9210_v50  ;;  %7521 = vmatprep.mubr.msk.f32.mxu0 %vm2126_vm0, %v9074_v3 }
 0x18e   : > { %7553 = vmatprep.mubr.msk.f32.mxu1 %vm2126_vm0, %v9216_v20 }
 0x18f   : > { %v7377_v43 = vpop.f32.mrf.mxu0 }
 0x190   : > { %7522 = vmatmul.mubr.msk.f32.gmra.mxu0 %vm2126_vm0, %v9082_v11  ;;  %v7409_v56 = vpop.f32.mrf.mxu1 }
 0x191   : > { %7554 = vmatmul.mubr.msk.f32.gmra.mxu1 %vm2126_vm0, %v9224_v47  ;;  %7524 = vmatprep.mubr.msk.f32.mxu0 %vm2126_vm0, %v3210_v34  ;;  %v9315_v48 = vadd.f32 %v7409_v56, %v7377_v43  ;;  %v9327_v30 = vpop.f32.mrf.mxu0 }
 0x192   : > { %7556 = vmatprep.mubr.msk.f32.mxu1 %vm2126_vm0, %v9304_v1  ;;  %v9329_v16 = vpop.f32.mrf.mxu1 }
 0x194   : > { %7525 = vmatmul.mubr.msk.f32.gmra.mxu0 %vm2126_vm0, %v3211_v55 }
 0x195   : > { %7557 = vmatmul.mubr.msk.f32.gmra.mxu1 %vm2126_vm0, %v9313_v44  ;;  %7561 = vmatprep.mubr.msk.f32.mxu0 %vm2126_vm0, %v9110_v60 }
 0x196   : > { %7593 = vmatprep.mubr.msk.f32.mxu1 %vm2126_vm0, %v7866_v42 }
 0x198   : > { %7562 = vmatmul.mubr.msk.f32.vlgmr.msra.gmra.mxu0 %vm2126_vm0, %v7870_v17 }
 0x199   : > { %7594 = vmatmul.mubr.msk.f32.vlgmr.msra.gmra.mxu1 %vm2126_vm0, %v7867_v58  ;;  %7624 = vmatpush3.msk.msra.mxu0 %vm2254_vm2, %v6957_v7  ;;  %v2563_v58 = vadd.f32 %v9302_v57, %v9300_v39  ;;  %v2573_v39 = vadd.f32 %v9329_v16, %v9327_v30 }
 0x19a   : > { %7564 = vmatprep.mubr.msk.f32.mxu0 %vm2126_vm0, %v7871_v53  ;;  %7596 = vmatprep.mubr.msk.f32.mxu1 %vm2126_vm0, %v7868_v32 }
 0x19b   : > { %v7380_v60 = vpop.f32.mrf.mxu0 }
 0x19c   : > { %7565 = vmatmul.mubr.msk.f32.gmra.mxu0 %vm2126_vm0, %v7872_v49  ;;  %v7412_v38 = vpop.f32.mrf.mxu1 }
 0x19d   : > { %7597 = vmatmul.mubr.msk.f32.gmra.mxu1 %vm2126_vm0, %v7869_v35  ;;  %7567 = vmatprep.mubr.msk.f32.mxu0 %vm2126_vm0, %v8708_v62  ;;  %v9338_v7 = vadd.f32 %v7412_v38, %v7380_v60  ;;  %v6981_v35 = vld [vmem:[%s10121_s7 + $0x2] sm:$0x3] }
 0x19e   : > { %7599 = vmatprep.mubr.msk.f32.mxu1 %vm2126_vm0, %v8706_v24  ;;  %v9387_v24 = vpop.f32.mrf.mxu0  ;;  %v9389_v62 = vpop.f32.mrf.mxu1  ;;  %7655 = vmatprep.subr.msk.mxu1 %vm2254_vm2, %v6981_v35 }
 0x19f   : > { %7656 = vmatpush3.msk.msra.mxu1 %vm2254_vm2, %v6981_v35 }
 0x1a0   : > { %7568 = vmatmul.mubr.msk.f32.gmra.mxu0 %vm2126_vm0, %v8750_v59  ;;  %v4021_v59 = vld [vmem:[#allocation2 + $0x109] sm:$0xff] }
 0x1a1   : > { %7600 = vmatmul.mubr.msk.f32.gmra.mxu1 %vm2126_vm0, %v8748_v41  ;;  %7570 = vmatprep.mubr.msk.f32.mxu0 %vm2126_vm0, %v8821_v36  ;;  %v3751_v41 = vld [vmem:[#allocation2 + $0x108] sm:$0xff] }
 0x1a2   : > { %7602 = vmatprep.mubr.msk.f32.mxu1 %vm2126_vm0, %v8819_v46 }
 0x1a4   : > { %7571 = vmatmul.mubr.msk.f32.gmra.mxu0 %vm2126_vm0, %v8829_v54  ;;  %v3752_v54 = vld [vmem:[#allocation2 + $0x110] sm:$0xff] }
 0x1a5   : > { %7603 = vmatmul.mubr.msk.f32.gmra.mxu1 %vm2126_vm0, %v8823_v5  ;;  %7573 = vmatprep.mubr.msk.f32.mxu0 %vm2126_vm0, %v8921_v2 }
 0x1a6   : > { %7605 = vmatprep.mubr.msk.f32.mxu1 %vm2126_vm0, %v8919_v6  ;;  %v4022_v6 = vld [vmem:[#allocation2 + $0x111] sm:$0xff] }
 0x1a8   : > { %7574 = vmatmul.mubr.msk.f32.gmra.mxu0 %vm2126_vm0, %v8955_v0 }
 0x1a9   : > { %7606 = vmatmul.mubr.msk.f32.gmra.mxu1 %vm2126_vm0, %v8953_v31  ;;  %7576 = vmatprep.mubr.msk.f32.mxu0 %vm2126_vm0, %v8992_v61 }
 0x1aa   : > { %7608 = vmatprep.mubr.msk.f32.mxu1 %vm2126_vm0, %v8990_v29 }
 0x1ac   : > { %7577 = vmatmul.mubr.msk.f32.gmra.mxu0 %vm2126_vm0, %v9001_v52 }
 0x1ad   : > { %7609 = vmatmul.mubr.msk.f32.gmra.mxu1 %vm2126_vm0, %v8994_v28  ;;  %7579 = vmatprep.mubr.msk.f32.mxu0 %vm2126_vm0, %v9055_v51 }
 0x1ae   : > { %7611 = vmatprep.mubr.msk.f32.mxu1 %vm2126_vm0, %v9053_v10 }
 0x1b0   : > { %7580 = vmatmul.mubr.msk.f32.gmra.mxu0 %vm2126_vm0, %v9066_v15  ;;  %v4291_v15 = vld [vmem:[#allocation2 + $0x10a] sm:$0xff] }
 0x1b1   : > { %7612 = vmatmul.mubr.msk.f32.gmra.mxu1 %vm2126_vm0, %v9064_v12  ;;  %7582 = vmatprep.mubr.msk.f32.mxu0 %vm2126_vm0, %v9076_v63 }
 0x1b2   : > { %7614 = vmatprep.mubr.msk.f32.mxu1 %vm2126_vm0, %v9074_v3 }
 0x1b4   : > { %7583 = vmatmul.mubr.msk.f32.gmra.mxu0 %vm2126_vm0, %v9084_v40 }
 0x1b5   : > { %7615 = vmatmul.mubr.msk.f32.gmra.mxu1 %vm2126_vm0, %v9082_v11  ;;  %7585 = vmatprep.mubr.msk.f32.mxu0 %vm2126_vm0, %v9208_v18  ;;  %v7383_v46 = vpop.f32.mrf.mxu0  ;;  %v4292_v11 = vld [vmem:[#allocation2 + $0x112] sm:$0xff] }
 0x1b6   : > { %7617 = vmatprep.mubr.msk.f32.mxu1 %vm2126_vm0, %v3210_v34  ;;  %v7415_v36 = vpop.f32.mrf.mxu1 }
 0x1b7   : > { %v9394_v5 = vadd.f32 %v7415_v36, %v7383_v46  ;;  %v9406_v2 = vpop.f32.mrf.mxu0 }
 0x1b8   : > { %7586 = vmatmul.mubr.msk.f32.gmra.mxu0 %vm2126_vm0, %v9222_v4  ;;  %v9408_v31 = vpop.f32.mrf.mxu1 }
 0x1b9   : > { %7618 = vmatmul.mubr.msk.f32.gmra.mxu1 %vm2126_vm0, %v3211_v55  ;;  %7588 = vmatprep.mubr.msk.f32.mxu0 %vm2126_vm0, %v3751_v41 }
 0x1ba   : > { %7620 = vmatprep.mubr.msk.f32.mxu1 %vm2126_vm0, %v4021_v59  ;;  %v2583_v59 = vadd.f32 %v9389_v62, %v9387_v24 }
 0x1bc   : > { %7589 = vmatmul.mubr.msk.f32.gmra.mxu0 %vm2126_vm0, %v3752_v54 }
 0x1bd   : > { %7621 = vmatmul.mubr.msk.f32.gmra.mxu1 %vm2126_vm0, %v4022_v6  ;;  %7625 = vmatprep.mubr.msk.f32.mxu0 %vm2126_vm0, %v9128_v21 }
 0x1c0   : > { %7626 = vmatmul.mubr.msk.f32.vlgmr.msra.gmra.mxu0 %vm2126_vm0, %v9134_v13 }
 0x1c1   : > { %7628 = vmatprep.mubr.msk.f32.mxu0 %vm2126_vm0, %v9140_v9  ;;  %v7386_v0 = vpop.f32.mrf.mxu0 }
 0x1c2   : > { %v7418_v29 = vpop.f32.mrf.mxu1 }
 0x1c3   : > { %v9412_v61 = vadd.f32 %v7418_v29, %v7386_v0  ;;  %v9434_v28 = vpop.f32.mrf.mxu0  ;;  %v2593_v29 = vadd.f32 %v9408_v31, %v9406_v2 }
 0x1c4   : > { %7629 = vmatmul.mubr.msk.f32.gmra.mxu0 %vm2126_vm0, %v9146_v26  ;;  %v9436_v52 = vpop.f32.mrf.mxu1 }
 0x1c5   : > { %7631 = vmatprep.mubr.msk.f32.mxu0 %vm2126_vm0, %v9152_v45 }
 0x1c8   : > { %7632 = vmatmul.mubr.msk.f32.gmra.mxu0 %vm2126_vm0, %v9158_v23 }
 0x1c9   : > { %7634 = vmatprep.mubr.msk.f32.mxu0 %vm2126_vm0, %v9166_v19 }
 0x1cc   : > { %7635 = vmatmul.mubr.msk.f32.gmra.mxu0 %vm2126_vm0, %v9172_v14 }
 0x1cd   : > { %7637 = vmatprep.mubr.msk.f32.mxu0 %vm2126_vm0, %v9178_v37 }
 0x1d0   : > { %7638 = vmatmul.mubr.msk.f32.gmra.mxu0 %vm2126_vm0, %v9184_v27 }
 0x1d1   : > { %7640 = vmatprep.mubr.msk.f32.mxu0 %vm2126_vm0, %v9190_v25 }
 0x1d4   : > { %7641 = vmatmul.mubr.msk.f32.gmra.mxu0 %vm2126_vm0, %v9196_v33 }
 0x1d5   : > { %7643 = vmatprep.mubr.msk.f32.mxu0 %vm2126_vm0, %v9202_v22 }
 0x1d8   : > { %7644 = vmatmul.mubr.msk.f32.gmra.mxu0 %vm2126_vm0, %v9210_v50 }
 0x1d9   : > { %7646 = vmatprep.mubr.msk.f32.mxu0 %vm2126_vm0, %v9216_v20  ;;  %v7389_v10 = vpop.f32.mrf.mxu0 }
 0x1da   : > { %v7421_v51 = vpop.f32.mrf.mxu1 }
 0x1db   : > { %v9440_v12 = vadd.f32 %v7421_v51, %v7389_v10  ;;  %v9448_v3 = vpop.f32.mrf.mxu0 }
 0x1dc   : > { %7647 = vmatmul.mubr.msk.f32.gmra.mxu0 %vm2126_vm0, %v9224_v47  ;;  %v9450_v63 = vpop.f32.mrf.mxu1 }
 0x1dd   : > { %7649 = vmatprep.mubr.msk.f32.mxu0 %vm2126_vm0, %v9304_v1 }
 0x1e0   : > { %7650 = vmatmul.mubr.msk.f32.gmra.mxu0 %vm2126_vm0, %v9313_v44  ;;  %v7392_v40 = vpop.f32.mrf.mxu0 }
 0x1e1   : > { %7652 = vmatprep.mubr.msk.f32.mxu0 %vm2126_vm0, %v4291_v15  ;;  %v7424_v21 = vpop.f32.mrf.mxu1 }
 0x1e2   : > { %v9453_v13 = vadd.f32 %v7424_v21, %v7392_v40  ;;  %v9456_v9 = vpop.f32.mrf.mxu0  ;;  %v2603_v21 = vadd.f32 %v9436_v52, %v9434_v28 }
 0x1e3   : > { %v9458_v26 = vpop.f32.mrf.mxu1 }
 0x1e4   : > { %7653 = vmatmul.mubr.msk.f32.gmra.mxu0 %vm2126_vm0, %v4292_v11 }
 0x1f3   : > { %v7395_v45 = vpop.f32.mrf.mxu0 }
 0x1f4   : > { %v7427_v23 = vpop.f32.mrf.mxu1 }
 0x1f5   : > { %v9460_v19 = vadd.f32 %v7427_v23, %v7395_v45  ;;  %v9462_v14 = vpop.f32.mrf.mxu0 }
 0x1f6   : > { %v9464_v37 = vpop.f32.mrf.mxu1 }
 0x204   : > { %v7398_v27 = vpop.f32.mrf.mxu0 }
 0x205   : > { %v7430_v25 = vpop.f32.mrf.mxu1 }
 0x206   : > { %v2414_v33 = vpop.f32.mrf.mxu0 }
 0x207   : > { %v2642_v22 = vpop.f32.mrf.mxu1 }
 0x208   : > { %v7435_v18 = vpop.f32.mrf.mxu0  ;;  %v2613_v22 = vadd.f32 %v9450_v63, %v9448_v3 }
 0x209   : > { %v7467_v50 = vpop.f32.mrf.mxu1 }
 0x20a   : > { %v2802_v20 = vpop.f32.mrf.mxu0 }
 0x20b   : > { %v3073_v4 = vpop.f32.mrf.mxu1 }
 0x20c   : > { %v7438_v47 = vpop.f32.mrf.mxu0 }
 0x20d   : > { %v7470_v42 = vpop.f32.mrf.mxu1  ;;  %v2904_v32 = vadd.f32 %v7438_v47, %v9160_v8 }
 0x20e   : > { %v2812_v34 = vpop.f32.mrf.mxu0 }
 0x20f   : > { %v3083_v1 = vpop.f32.mrf.mxu1  ;;  %v9473_v55 = vadd.f32 %v7470_v42, %v2904_v32  ;;  %v2903_v44 = vadd.f32 %v2812_v34, %v2563_v58  ;;  %v4796_v42 = vld [vmem:[#allocation4 + $0x1] sm:$0xff]  ;;  %v2623_v58 = vadd.f32 %v9458_v26, %v9456_v9  ;;  %v2633_v9 = vadd.f32 %v9464_v37, %v9462_v14 }
 0x210   : > { %v7441_v43 = vpop.f32.mrf.mxu0  ;;  %7657 = vmatprep.mubr.msk.f32.mxu1 %vm2126_vm0, %v4796_v42 }
 0x211   : > { %v7473_v56 = vpop.f32.mrf.mxu1  ;;  %v9478_v57 = vadd.f32 %v3083_v1, %v2903_v44  ;;  %v2906_v8 = vadd.f32 %v7441_v43, %v9315_v48  ;;  %v7010_v1 = vld [vmem:[%s10121_s7 + $0x6] sm:$0x3] }
 0x212   : > { %v2822_v17 = vpop.f32.mrf.mxu0  ;;  %7697 = vmatprep.subr.msk.mxu0 %vm2254_vm2, %v7010_v1 }
 0x213   : > { %v3093_v53 = vpop.f32.mrf.mxu1  ;;  %v9481_v49 = vadd.f32 %v7473_v56, %v2906_v8  ;;  %v2905_v60 = vadd.f32 %v2822_v17, %v2573_v39  ;;  %7698 = vmatpush3.msk.msra.mxu0 %vm2254_vm2, %v7010_v1 }
 0x214   : > { %v7444_v38 = vpop.f32.mrf.mxu0 }
 0x215   : > { %v7476_v41 = vpop.f32.mrf.mxu1  ;;  %v9485_v46 = vadd.f32 %v3093_v53, %v2905_v60  ;;  %v2908_v36 = vadd.f32 %v7444_v38, %v9338_v7 }
 0x216   : > { %v2832_v54 = vpop.f32.mrf.mxu0 }
 0x217   : > { %v3103_v30 = vpop.f32.mrf.mxu1  ;;  %v9488_v16 = vadd.f32 %v7476_v41, %v2908_v36  ;;  %v2907_v6 = vadd.f32 %v2832_v54, %v2583_v59  ;;  %v9530_v36 = vld [vmem:[%s10121_s7] sm:$0x3] }
 0x218   : > { %v7447_v48 = vpop.f32.mrf.mxu0  ;;  %10147 = vst [vmem:[#allocation9_spill] sm:$0xff] %v9530_v36  ;;  %7669 = vmatprep.subr.msk.mxu1 %vm2254_vm2, %v9530_v36 }
 0x219   : > { %v7479_v0 = vpop.f32.mrf.mxu1  ;;  %v9492_v10 = vadd.f32 %v3103_v30, %v2907_v6  ;;  %v2910_v51 = vadd.f32 %v7447_v48, %v9394_v5 }
 0x21a   : > { %v2842_v15 = vpop.f32.mrf.mxu0 }
 0x21b   : > { %v3113_v24 = vpop.f32.mrf.mxu1  ;;  %v9495_v62 = vadd.f32 %v7479_v0, %v2910_v51  ;;  %v2909_v11 = vadd.f32 %v2842_v15, %v2593_v29 }
 0x21c   : > { %v7450_v7 = vpop.f32.mrf.mxu0 }
 0x21d   : > { %v7482_v40 = vpop.f32.mrf.mxu1  ;;  %v9499_v45 = vadd.f32 %v3113_v24, %v2909_v11  ;;  %v2912_v23 = vadd.f32 %v7450_v7, %v9412_v61 }
 0x21e   : > { %v2852_v27 = vpop.f32.mrf.mxu0 }
 0x21f   : > { %v3123_v2 = vpop.f32.mrf.mxu1  ;;  %v9502_v31 = vadd.f32 %v7482_v40, %v2912_v23  ;;  %v2911_v25 = vadd.f32 %v2852_v27, %v2603_v21 }
 0x220   : > { %v7453_v5 = vpop.f32.mrf.mxu0 }
 0x221   : > { %v7485_v33 = vpop.f32.mrf.mxu1  ;;  %v9506_v18 = vadd.f32 %v3123_v2, %v2911_v25  ;;  %v2914_v50 = vadd.f32 %v7453_v5, %v9440_v12 }
 0x222   : > { %v2862_v20 = vpop.f32.mrf.mxu0 }
 0x223   : > { %v3133_v28 = vpop.f32.mrf.mxu1  ;;  %v9509_v52 = vadd.f32 %v7485_v33, %v2914_v50  ;;  %v2913_v4 = vadd.f32 %v2862_v20, %v2613_v22 }
 0x224   : > { %v7456_v61 = vpop.f32.mrf.mxu0 }
 0x225   : > { %v7488_v47 = vpop.f32.mrf.mxu1  ;;  %v9513_v32 = vadd.f32 %v3133_v28, %v2913_v4  ;;  %v2916_v35 = vadd.f32 %v7456_v61, %v9453_v13 }
 0x226   : > { %v2872_v3 = vpop.f32.mrf.mxu0 }
 0x227   : > { %v3143_v63 = vpop.f32.mrf.mxu1  ;;  %v9517_v12 = vadd.f32 %v7488_v47, %v2916_v35  ;;  %v2915_v34 = vadd.f32 %v2872_v3, %v2623_v58 }
 0x228   : > { %v7459_v44 = vpop.f32.mrf.mxu0 }
 0x229   : > { %v7491_v43 = vpop.f32.mrf.mxu1  ;;  %v3186_v26 = vadd.f32 %v3143_v63, %v2915_v34  ;;  %v2918_v13 = vadd.f32 %v7459_v44, %v9460_v19 }
 0x22a   : > { %v2882_v56 = vpop.f32.mrf.mxu0 }
 0x22b   : > { %v3153_v39 = vpop.f32.mrf.mxu1  ;;  %v3189_v8 = vadd.f32 %v7491_v43, %v2918_v13  ;;  %v2917_v17 = vadd.f32 %v2882_v56, %v2633_v9 }
 0x22c   : > { %v7462_v53 = vpop.f32.mrf.mxu0 }
 0x22d   : > { %v7494_v60 = vpop.f32.mrf.mxu1  ;;  %v3188_v38 = vadd.f32 %v3153_v39, %v2917_v17 }
 0x22e   : > { %v2892_v41 = vpop.f32.mrf.mxu0 }
 0x22f   : > { %v3163_v59 = vpop.f32.mrf.mxu1 }
 0x230   : > { %v7499_v14 = vpop.f32.mrf.mxu0 }
 0x231   : > { %v7531_v37 = vpop.f32.mrf.mxu1 }
 0x232   : > { %v3343_v19 = vpop.f32.mrf.mxu0 }
 0x233   : > { %v3613_v54 = vpop.f32.mrf.mxu1 }
 0x234   : > { %v7502_v30 = vpop.f32.mrf.mxu0 }
 0x235   : > { %v9534_v6 = vpop.f32.mrf.mxu1  ;;  %v9537_v48 = vadd.f32 %v7502_v30, %v9473_v55 }
 0x236   : > { %v3353_v0 = vpop.f32.mrf.mxu0 }
 0x237   : > { %v9539_v29 = vpop.f32.mrf.mxu1  ;;  %v9542_v51 = vadd.f32 %v3353_v0, %v9478_v57 }
 0x238   : > { %v7505_v15 = vpop.f32.mrf.mxu0 }
 0x239   : > { %v9544_v24 = vpop.f32.mrf.mxu1  ;;  %v9547_v11 = vadd.f32 %v7505_v15, %v9481_v49  ;;  %v9567_v49 = vld [vmem:[%s10121_s7 + $0xa] sm:$0x3] }
 0x23a   : > { %v3363_v7 = vpop.f32.mrf.mxu0  ;;  %10148 = vst [vmem:[#allocation10_spill] sm:$0xff] %v9567_v49  ;;  %7725 = vmatprep.subr.msk.mxu0 %vm2254_vm2, %v9567_v49 }
 0x23b   : > { %v9549_v40 = vpop.f32.mrf.mxu1  ;;  %v9552_v21 = vadd.f32 %v3363_v7, %v9485_v46  ;;  %v3717_v49 = vadd.f32 %v9544_v24, %v9547_v11 }
 0x23c   : > { %v7508_v55 = vpop.f32.mrf.mxu0 }
 0x23d   : > { %v9554_v23 = vpop.f32.mrf.mxu1  ;;  %v9557_v27 = vadd.f32 %v7508_v55, %v9488_v16 }
 0x23e   : > { %v3373_v57 = vpop.f32.mrf.mxu0 }
 0x23f   : > { %v9559_v2 = vpop.f32.mrf.mxu1  ;;  %v9562_v25 = vadd.f32 %v3373_v57, %v9492_v10 }
 0x240   : > { %v7511_v5 = vpop.f32.mrf.mxu0 }
 0x241   : > { %v9569_v46 = vpop.f32.mrf.mxu1  ;;  %v9574_v16 = vadd.f32 %v7511_v5, %v9495_v62 }
 0x242   : > { %v3383_v33 = vpop.f32.mrf.mxu0 }
 0x243   : > { %v9576_v22 = vpop.f32.mrf.mxu1  ;;  %v9579_v10 = vadd.f32 %v3383_v33, %v9499_v45 }
 0x244   : > { %v7514_v50 = vpop.f32.mrf.mxu0 }
 0x245   : > { %v9581_v20 = vpop.f32.mrf.mxu1  ;;  %v9584_v28 = vadd.f32 %v7514_v50, %v9502_v31 }
 0x246   : > { %v3393_v4 = vpop.f32.mrf.mxu0 }
 0x247   : > { %v9586_v61 = vpop.f32.mrf.mxu1  ;;  %v9589_v47 = vadd.f32 %v3393_v4, %v9506_v18 }
 0x248   : > { %v7517_v62 = vpop.f32.mrf.mxu0 }
 0x249   : > { %v9591_v42 = vpop.f32.mrf.mxu1  ;;  %v9594_v58 = vadd.f32 %v7517_v62, %v9509_v52 }
 0x24a   : > { %v3403_v45 = vpop.f32.mrf.mxu0 }
 0x24b   : > { %v9596_v35 = vpop.f32.mrf.mxu1  ;;  %v9599_v3 = vadd.f32 %v3403_v45, %v9513_v32 }
 0x24c   : > { %v7520_v31 = vpop.f32.mrf.mxu0 }
 0x24d   : > { %v9601_v63 = vpop.f32.mrf.mxu1  ;;  %v9604_v34 = vadd.f32 %v7520_v31, %v9517_v12 }
 0x24e   : > { %v3413_v18 = vpop.f32.mrf.mxu0 }
 0x24f   : > { %v9606_v1 = vpop.f32.mrf.mxu1  ;;  %v9608_v44 = vadd.f32 %v3413_v18, %v3186_v26 }
 0x250   : > { %v7523_v43 = vpop.f32.mrf.mxu0 }
 0x251   : > { %v9610_v52 = vpop.f32.mrf.mxu1  ;;  %v9612_v9 = vadd.f32 %v7523_v43, %v3189_v8 }
 0x252   : > { %v3423_v13 = vpop.f32.mrf.mxu0 }
 0x253   : > { %v9614_v56 = vpop.f32.mrf.mxu1  ;;  %v9616_v32 = vadd.f32 %v3423_v13, %v3188_v38 }
 0x254   : > { %v7526_v39 = vpop.f32.mrf.mxu0 }
 0x255   : > { %v7558_v17 = vpop.f32.mrf.mxu1 }
 0x256   : > { %v3433_v53 = vpop.f32.mrf.mxu0 }
 0x257   : > { %v3703_v12 = vpop.f32.mrf.mxu1 }
 0x258   : > { %v7563_v60 = vpop.f32.mrf.mxu0  ;;  %v3715_v12 = vadd.f32 %v9534_v6, %v9537_v48  ;;  %v3716_v6 = vadd.f32 %v9549_v40, %v9552_v21  ;;  %v3718_v40 = vadd.f32 %v9559_v2, %v9562_v25  ;;  %v3720_v2 = vadd.f32 %v9576_v22, %v9579_v10 }
 0x259   : > { %v7595_v41 = vpop.f32.mrf.mxu1 }
 0x25a   : > { %v3884_v59 = vpop.f32.mrf.mxu0  ;;  %v3714_v41 = vadd.f32 %v9539_v29, %v9542_v51  ;;  %v9654_v29 = vld [vmem:[%s10120_s6] ss:$0 sm:$0xff] }
 0x25b   : > { %v4154_v14 = vpop.f32.mrf.mxu1 }
 0x25c   : > { %v7566_v26 = vpop.f32.mrf.mxu0 }
 0x25d   : > { %v7598_v19 = vpop.f32.mrf.mxu1  ;;  %v3986_v59 = vadd.f32 %v7566_v26, %v3715_v12 }
 0x25e   : > { %v3894_v37 = vpop.f32.mrf.mxu0 }
 0x25f   : > { %v4164_v8 = vpop.f32.mrf.mxu1  ;;  %v4256_v26 = vadd.f32 %v7598_v19, %v3986_v59  ;;  %v3721_v59 = vadd.f32 %v9569_v46, %v9574_v16 }
 0x260   : > { %v7569_v54 = vpop.f32.mrf.mxu0 }
 0x261   : > { %v7601_v7 = vpop.f32.mrf.mxu1  ;;  %v3988_v48 = vadd.f32 %v7569_v54, %v3717_v49 }
 0x262   : > { %v3904_v30 = vpop.f32.mrf.mxu0 }
 0x263   : > { %v4174_v57 = vpop.f32.mrf.mxu1  ;;  %v3987_v24 = vadd.f32 %v3904_v30, %v3716_v6  ;;  %v4258_v21 = vadd.f32 %v7601_v7, %v3988_v48 }
 0x264   : > { %v7572_v0 = vpop.f32.mrf.mxu0 }
 0x265   : > { %v7604_v50 = vpop.f32.mrf.mxu1 }
 0x266   : > { %v3914_v15 = vpop.f32.mrf.mxu0 }
 0x267   : > { %v4184_v45 = vpop.f32.mrf.mxu1 }
 0x268   : > { %v7575_v55 = vpop.f32.mrf.mxu0 }
 0x269   : > { %v7607_v43 = vpop.f32.mrf.mxu1 }
 0x26a   : > { %v3924_v38 = vpop.f32.mrf.mxu0 }
 0x26b   : > { %v9634_v17 = vpop.f32.mrf.mxu1 }
 0x26c   : > { %v9618_v5 = vpop.f32.mrf.mxu0 }
 0x26d   : > { %v9640_v14 = vpop.f32.mrf.mxu1 }
 0x26e   : > { %v9620_v33 = vpop.f32.mrf.mxu0 }
 0x26f   : > { %v9656_v12 = vpop.f32.mrf.mxu1 }
 0x270   : > { %v9622_v4 = vpop.f32.mrf.mxu0 }
 0x272   : > { %v9624_v62 = vpop.f32.mrf.mxu0 }
 0x274   : > { %v9626_v31 = vpop.f32.mrf.mxu0 }
 0x276   : > { %v9628_v18 = vpop.f32.mrf.mxu0 }
 0x278   : > { %v9630_v13 = vpop.f32.mrf.mxu0 }
 0x279   : > { %10149 = vst [vmem:[#allocation11_spill] sm:$0xff] %v9630_v13  ;;  %v4257_v13 = vadd.f32 %v4174_v57, %v3987_v24 }
 0x27a   : > { %v9632_v39 = vpop.f32.mrf.mxu0 }
 0x27b   : > { %10150 = vst [vmem:[#allocation12_spill] sm:$0xff] %v9632_v39  ;;  %v9647_v39 = vld [vmem:[%s10119_s5] ss:$0 sm:$0xff] }
 0x27c   : > { %v7590_v53 = vpop.f32.mrf.mxu0 }
 0x27d   : > { %v3985_v53 = vadd.f32 %v3894_v37, %v3714_v41  ;;  %v9662_v41 = vpop.f32.mrf.mxu1 }
 0x27e   : > { %v3974_v60 = vpop.f32.mrf.mxu0 }
 0x27f   : > { %v4255_v60 = vadd.f32 %v4164_v8, %v3985_v53  ;;  %v9671_v6 = vpop.f32.mrf.mxu1 }
 0x280   : > { %v7627_v36 = vpop.f32.mrf.mxu0 }
 0x281   : > { %v3719_v36 = vadd.f32 %v9554_v23, %v9557_v27  ;;  %v3989_v23 = vadd.f32 %v3914_v15, %v3718_v40  ;;  %v3723_v15 = vadd.f32 %v9581_v20, %v9584_v28  ;;  %v7616_v40 = vpop.f32.mrf.mxu1 }
 0x282   : > { %v4424_v51 = vpop.f32.mrf.mxu0 }
 0x283   : > { %v3990_v49 = vadd.f32 %v7572_v0, %v3719_v36  ;;  %v3992_v0 = vadd.f32 %v7575_v55, %v3721_v59  ;;  %v4259_v57 = vadd.f32 %v4184_v45, %v3989_v23  ;;  %v3991_v36 = vadd.f32 %v3924_v38, %v3720_v2 }
 0x284   : > { %v7630_v11 = vpop.f32.mrf.mxu0  ;;  %v3722_v45 = vadd.f32 %v9586_v61, %v9589_v47  ;;  %v3724_v59 = vadd.f32 %v9596_v35, %v9599_v3 }
 0x285   : > { %v4526_v37 = vadd.f32 %v7630_v11, %v4256_v26  ;;  %v4260_v25 = vadd.f32 %v7604_v50, %v3990_v49  ;;  %v4262_v11 = vadd.f32 %v7607_v43, %v3992_v0  ;;  %v4261_v43 = vadd.f32 %v9634_v17, %v3991_v36 }
 0x286   : > { %v4434_v54 = vpop.f32.mrf.mxu0  ;;  %v3993_v61 = vadd.f32 %v9620_v33, %v3722_v45  ;;  %v3995_v35 = vadd.f32 %v9624_v62, %v3724_v59  ;;  %v3726_v0 = vadd.f32 %v9606_v1, %v9608_v44  ;;  %v3729_v1 = vadd.f32 %v9610_v52, %v9612_v9  ;;  %v10151_v52 = vld [vmem:[#allocation11_spill] sm:$0xff] }
 0x287   : > { %v4553_v51 = vmul.f32 %v9647_v39, %v4526_v37  ;;  %v4525_v19 = vadd.f32 %v4434_v54, %v4255_v60  ;;  %v3994_v60 = vadd.f32 %v9618_v5, %v3723_v15 }
 0x288   : > { %v7633_v27 = vpop.f32.mrf.mxu0  ;;  %v4265_v44 = vadd.f32 %v9671_v6, %v3995_v35  ;;  %v4000_v9 = vadd.f32 %v10151_v52, %v3729_v1  ;;  %v9743_v35 = vld [vmem:[%s10121_s7 + $0x4] sm:$0x3]  ;;  %v9767_v1 = vld [vmem:[%s10121_s7 + $0xe] sm:$0x3] }
 0x289   : > { %v4580_v30 = vadd.f32 %v9654_v29, %v4553_v51  ;;  %v4552_v8 = vmul.f32 %v9647_v39, %v4525_v19  ;;  %v4528_v53 = vadd.f32 %v7633_v27, %v4258_v21  ;;  %v3725_v21 = vadd.f32 %v9591_v42, %v9594_v58  ;;  %v4224_v58 = vpop.f32.mrf.mxu1 }
 0x28a   : > { %v4444_v7 = vpop.f32.mrf.mxu0  ;;  %v4264_v23 = vadd.f32 %v9640_v14, %v3994_v60 }
 0x28b   : > { %v4600_v48 = vmax.f32 %v4580_v30, 0.0  ;;  %v4579_v26 = vadd.f32 %v9654_v29, %v4552_v8  ;;  %v4555_v46 = vmul.f32 %v9647_v39, %v4528_v53  ;;  %v4527_v16 = vadd.f32 %v4444_v7, %v4257_v13  ;;  %v7619_v14 = vpop.f32.mrf.mxu1 }
 0x28c   : > { %v7636_v24 = vpop.f32.mrf.mxu0  ;;  %v3996_v47 = vadd.f32 %v9622_v4, %v3725_v21  ;;  %v3727_v53 = vadd.f32 %v9601_v63, %v9604_v34  ;;  %v4263_v7 = vadd.f32 %v9656_v12, %v3993_v61 }
 0x28d   : > { %4620 = vst.msk [vmem:[#allocation3 + $0x18] sm:$0xff] %vm2126_vm0, %v4600_v48  ;;  %v4599_v22 = vmax.f32 %v4579_v26, 0.0  ;;  %v4582_v10 = vadd.f32 %v9654_v29, %v4555_v46  ;;  %v4554_v55 = vmul.f32 %v9647_v39, %v4527_v16  ;;  %v4530_v50 = vadd.f32 %v7636_v24, %v4260_v25  ;;  %v4234_v36 = vpop.f32.mrf.mxu1 }
 0x28e   : > { %v4454_v37 = vpop.f32.mrf.mxu0  ;;  %v4266_v48 = vadd.f32 %v9662_v41, %v3996_v47  ;;  %v3998_v63 = vadd.f32 %v9626_v31, %v3727_v53  ;;  %v3997_v31 = vadd.f32 %v9628_v18, %v3726_v0 }
 0x28f   : > { %4619 = vst.msk [vmem:[#allocation3 + $0x10] sm:$0xff] %vm2126_vm0, %v4599_v22  ;;  %v4602_v13 = vmax.f32 %v4582_v10, 0.0  ;;  %v4581_v20 = vadd.f32 %v9654_v29, %v4554_v55  ;;  %v4557_v28 = vmul.f32 %v9647_v39, %v4530_v50  ;;  %v4529_v38 = vadd.f32 %v4454_v37, %v4259_v57 }
 0x290   : > { %v7639_v49 = vpop.f32.mrf.mxu0  ;;  %v3728_v55 = vadd.f32 %v9614_v56, %v9616_v32  ;;  %v4268_v50 = vadd.f32 %v7616_v40, %v3998_v63  ;;  %v4267_v32 = vadd.f32 %v4224_v58, %v3997_v31  ;;  %v7622_v40 = vpop.f32.mrf.mxu1 }
 0x291   : > { %4622 = vst.msk [vmem:[#allocation3 + $0x28] sm:$0xff] %vm2126_vm0, %v4602_v13  ;;  %v4601_v5 = vmax.f32 %v4581_v20, 0.0  ;;  %v4584_v54 = vadd.f32 %v9654_v29, %v4557_v28  ;;  %v4556_v51 = vmul.f32 %v9647_v39, %v4529_v38  ;;  %v4532_v19 = vadd.f32 %v7639_v49, %v4262_v11  ;;  %v10152_v38 = vld [vmem:[#allocation12_spill] sm:$0xff] }
 0x292   : > { %v4464_v42 = vpop.f32.mrf.mxu0  ;;  %v3999_v45 = vadd.f32 %v10152_v38, %v3728_v55 }
 0x293   : > { %4621 = vst.msk [vmem:[#allocation3 + $0x20] sm:$0xff] %vm2126_vm0, %v4601_v5  ;;  %v4604_v17 = vmax.f32 %v4584_v54, 0.0  ;;  %v4583_v27 = vadd.f32 %v9654_v29, %v4556_v51  ;;  %v4559_v30 = vmul.f32 %v9647_v39, %v4532_v19  ;;  %v4531_v8 = vadd.f32 %v4464_v42, %v4261_v43 }
 0x294   : > { %v7642_v3 = vpop.f32.mrf.mxu0  ;;  %v4270_v54 = vadd.f32 %v7619_v14, %v4000_v9 }
 0x295   : > { %4624 = vst.msk [vmem:[#allocation3 + $0x38] sm:$0xff] %vm2126_vm0, %v4604_v17  ;;  %v4603_v33 = vmax.f32 %v4583_v27, 0.0  ;;  %v4586_v4 = vadd.f32 %v9654_v29, %v4559_v30  ;;  %v4558_v2 = vmul.f32 %v9647_v39, %v4531_v8  ;;  %v4534_v25 = vadd.f32 %v7642_v3, %v4264_v23  ;;  %v4244_v3 = vpop.f32.mrf.mxu1 }
 0x296   : > { %v4639_v34 = vld [vmem:[#allocation3 + $0x10] ss:$2 sm:$0xff]  ;;  %v4659_v62 = vld [vmem:[#allocation3 + $0x11] ss:$2 sm:$0xff]  ;;  %v4474_v26 = vpop.f32.mrf.mxu0  ;;  %v4269_v17 = vadd.f32 %v4234_v36, %v3999_v45 }
 0x297   : > { %v4677_v46 = vmax.f32 %v4639_v34, %v4659_v62  ;;  %4623 = vst.msk [vmem:[#allocation3 + $0x30] sm:$0xff] %vm2126_vm0, %v4603_v33  ;;  %v4606_v16 = vmax.f32 %v4586_v4, 0.0  ;;  %v4585_v15 = vadd.f32 %v9654_v29, %v4558_v2  ;;  %v4561_v57 = vmul.f32 %v9647_v39, %v4534_v25  ;;  %v10154_v36 = vld [vmem:[#allocation10_spill] sm:$0xff] }
 0x298   : > { %v4533_v12 = vadd.f32 %v4474_v26, %v4263_v7  ;;  %v7645_v41 = vpop.f32.mrf.mxu0  ;;  %v5829_v3 = vld [vmem:[#allocation4 + $0x91] sm:$0xff] }
 0x299   : > { %4778 = vst.msk [vmem:[#allocation4 + $0x11] sm:$0xff] %vm2126_vm0, %v4677_v46  ;;  %4626 = vst.msk [vmem:[#allocation3 + $0x48] sm:$0xff] %vm2126_vm0, %v4606_v16  ;;  %v4605_v24 = vmax.f32 %v4585_v15, 0.0  ;;  %v4588_v22 = vadd.f32 %v9654_v29, %v4561_v57  ;;  %v4536_v10 = vadd.f32 %v7645_v41, %v4266_v48  ;;  %v10153_v48 = vld [vmem:[#allocation9_spill] sm:$0xff] }
 0x29a   : > { %v4560_v6 = vmul.f32 %v9647_v39, %v4533_v12  ;;  %v4484_v11 = vpop.f32.mrf.mxu0  ;;  %v4641_v60 = vld [vmem:[#allocation3 + $0x20] ss:$2 sm:$0xff]  ;;  %v4661_v18 = vld [vmem:[#allocation3 + $0x21] ss:$2 sm:$0xff] }
 0x29b   : > { %4625 = vst.msk [vmem:[#allocation3 + $0x40] sm:$0xff] %vm2126_vm0, %v4605_v24  ;;  %v4608_v37 = vmax.f32 %v4588_v22, 0.0  ;;  %v4563_v13 = vmul.f32 %v9647_v39, %v4536_v10  ;;  %v4535_v20 = vadd.f32 %v4484_v11, %v4265_v44  ;;  %v4678_v28 = vmax.f32 %v4641_v60, %v4661_v18 }
 0x29c   : > { %v4587_v21 = vadd.f32 %v9654_v29, %v4560_v6  ;;  %v7648_v56 = vpop.f32.mrf.mxu0 }
 0x29d   : > { %4628 = vst.msk [vmem:[#allocation3 + $0x58] sm:$0xff] %vm2126_vm0, %v4608_v37  ;;  %v4590_v43 = vadd.f32 %v9654_v29, %v4563_v13  ;;  %v4562_v49 = vmul.f32 %v9647_v39, %v4535_v20  ;;  %v4538_v5 = vadd.f32 %v7648_v56, %v4268_v50  ;;  %4779 = vst.msk [vmem:[#allocation4 + $0x21] sm:$0xff] %vm2126_vm0, %v4678_v28 }
 0x29e   : > { %v4607_v51 = vmax.f32 %v4587_v21, 0.0  ;;  %v4494_v19 = vpop.f32.mrf.mxu0  ;;  %v4643_v59 = vld [vmem:[#allocation3 + $0x30] ss:$2 sm:$0xff]  ;;  %v4663_v23 = vld [vmem:[#allocation3 + $0x31] ss:$2 sm:$0xff] }
 0x29f   : > { %v4610_v61 = vmax.f32 %v4590_v43, 0.0  ;;  %v4589_v47 = vadd.f32 %v9654_v29, %v4562_v49  ;;  %v4565_v42 = vmul.f32 %v9647_v39, %v4538_v5  ;;  %v4537_v58 = vadd.f32 %v4494_v19, %v4267_v32  ;;  %v4787_v43 = vld [vmem:[#allocation4] sm:$0xff] }
 0x2a0   : > { %4627 = vst.msk [vmem:[#allocation3 + $0x50] sm:$0xff] %vm2126_vm0, %v4607_v51  ;;  %v7651_v27 = vpop.f32.mrf.mxu0  ;;  %v9736_v30 = vld [vmem:[#allocation4 + $0x11] sm:$0xff]  ;;  %v4679_v53 = vmax.f32 %v4643_v59, %v4663_v23  ;;  %v7020_v51 = vld [vmem:[%s10121_s7 + $0x8] sm:$0x3] }
 0x2a1   : > { %v9738_v8 = vld [vmem:[#allocation4 + $0x10] sm:$0xff]  ;;  %4630 = vst.msk [vmem:[#allocation3 + $0x68] sm:$0xff] %vm2126_vm0, %v4610_v61  ;;  %v4609_v14 = vmax.f32 %v4589_v47, 0.0  ;;  %v4592_v33 = vadd.f32 %v9654_v29, %v4565_v42  ;;  %v4564_v4 = vmul.f32 %v9647_v39, %v4537_v58  ;;  %v4540_v2 = vadd.f32 %v7651_v27, %v4270_v54  ;;  %7658 = vmatmul.mubr.msk.f32.vlgmr.msra.gmra.mxu1 %vm2126_vm0, %v9736_v30  ;;  %v5070_v58 = vld [vmem:[#allocation4 + $0x2] sm:$0xff] }
 0x2a2   : > { %7699 = vmatprep.mubr.msk.f32.mxu0 %vm2126_vm0, %v9738_v8  ;;  %v4504_v25 = vpop.f32.mrf.mxu0  ;;  %4780 = vst.msk [vmem:[#allocation4 + $0x31] sm:$0xff] %vm2126_vm0, %v4679_v53  ;;  %v4645_v0 = vld [vmem:[#allocation3 + $0x40] ss:$2 sm:$0xff]  ;;  %v4665_v7 = vld [vmem:[#allocation3 + $0x41] ss:$2 sm:$0xff]  ;;  %7670 = vmatpush3.msk.msra.mxu1 %vm2254_vm2, %v10153_v48  ;;  %v5521_v19 = vld [vmem:[#allocation4 + $0x12] sm:$0xff] }
 0x2a3   : > { %4629 = vst.msk [vmem:[#allocation3 + $0x60] sm:$0xff] %vm2126_vm0, %v4609_v14  ;;  %v4612_v63 = vmax.f32 %v4592_v33, 0.0  ;;  %v4591_v34 = vadd.f32 %v9654_v29, %v4564_v4  ;;  %v4567_v62 = vmul.f32 %v9647_v39, %v4540_v2  ;;  %v4539_v26 = vadd.f32 %v4504_v25, %v4269_v17  ;;  %7683 = vmatprep.subr.msk.mxu1 %vm2254_vm2, %v9743_v35  ;;  %v7040_v53 = vld [vmem:[%s10121_s7 + $0xc] sm:$0x3]  ;;  %v7060_v14 = vld [vmem:[%s10121_s7 + $0x10] sm:$0x3] }
 0x2a4   : > { %v7654_v46 = vpop.f32.mrf.mxu0  ;;  %v9760_v16 = vld [vmem:[#allocation4 + $0x21] sm:$0xff]  ;;  %v4680_v57 = vmax.f32 %v4645_v0, %v4665_v7  ;;  %v10155_v47 = vmov 0.0   ;;  %v5979_v33 = vld [vmem:[#allocation4 + $0x92] sm:$0xff]  ;;  %v7080_v2 = vld [vmem:[%s10124_s10 + $0xc] sm:$0xf] }
 0x2a5   : > { %v9762_v15 = vld [vmem:[#allocation4 + $0x20] sm:$0xff]  ;;  %4632 = vst.msk [vmem:[#allocation3 + $0x78] sm:$0xff] %vm2126_vm0, %v4612_v63  ;;  %v4611_v44 = vmax.f32 %v4591_v34, 0.0  ;;  %v4594_v12 = vadd.f32 %v9654_v29, %v4567_v62  ;;  %v4566_v41 = vmul.f32 %v9647_v39, %v4539_v26  ;;  %7660 = vmatprep.mubr.msk.f32.mxu1 %vm2126_vm0, %v9760_v16 }
 0x2a6   : > { %7700 = vmatmul.mubr.msk.f32.vlgmr.msra.gmra.mxu0 %vm2126_vm0, %v9762_v15  ;;  %v4514_v31 = vpop.f32.mrf.mxu0  ;;  %4781 = vst.msk [vmem:[#allocation4 + $0x41] sm:$0xff] %vm2126_vm0, %v4680_v57  ;;  %v9845_v59 = vld [vmem:[#allocation4 + $0x22] sm:$0xff] }
 0x2a7   : > { %7726 = vmatpush3.msk.msra.mxu0 %vm2254_vm2, %v10154_v36  ;;  %4631 = vst.msk [vmem:[#allocation3 + $0x70] sm:$0xff] %vm2126_vm0, %v4611_v44  ;;  %v4614_v24 = vmax.f32 %v4594_v12, 0.0  ;;  %v4593_v22 = vadd.f32 %v9654_v29, %v4566_v41  ;;  %v4647_v10 = vld [vmem:[#allocation3 + $0x50] ss:$2 sm:$0xff]  ;;  %v4667_v55 = vld [vmem:[#allocation3 + $0x51] ss:$2 sm:$0xff] }
 0x2a8   : > { %7753 = vmatprep.subr.msk.mxu0 %vm2254_vm2, %v9767_v1  ;;  %v4681_v39 = vmax.f32 %v4647_v10, %v4667_v55  ;;  %v7072_v4 = vld [vmem:[%s10124_s10 + $0x4] sm:$0xf] }
 0x2a9   : > { %4634 = vst.msk [vmem:[#allocation3 + $0x88] sm:$0xff] %vm2126_vm0, %v4614_v24  ;;  %v4613_v50 = vmax.f32 %v4593_v22, 0.0  ;;  %v9784_v52 = vld [vmem:[#allocation4 + $0x31] sm:$0xff] }
 0x2aa   : > { %v9786_v9 = vld [vmem:[#allocation4 + $0x30] sm:$0xff]  ;;  %7661 = vmatmul.mubr.msk.f32.gmra.mxu1 %vm2126_vm0, %v9784_v52  ;;  %4782 = vst.msk [vmem:[#allocation4 + $0x51] sm:$0xff] %vm2126_vm0, %v4681_v39  ;;  %v4649_v29 = vld [vmem:[#allocation3 + $0x60] ss:$2 sm:$0xff]  ;;  %v4669_v6 = vld [vmem:[#allocation3 + $0x61] ss:$2 sm:$0xff] }
 0x2ab   : > { %7702 = vmatprep.mubr.msk.f32.mxu0 %vm2126_vm0, %v9786_v9  ;;  %4633 = vst.msk [vmem:[#allocation3 + $0x80] sm:$0xff] %vm2126_vm0, %v4613_v50  ;;  %v4682_v11 = vmax.f32 %v4649_v29, %v4669_v6  ;;  %v9851_v23 = vld [vmem:[#allocation4 + $0x32] sm:$0xff] }
 0x2ad   : > { %v9794_v60 = vld [vmem:[#allocation4 + $0x41] sm:$0xff]  ;;  %4783 = vst.msk [vmem:[#allocation4 + $0x61] sm:$0xff] %vm2126_vm0, %v4682_v11 }
 0x2ae   : > { %v9796_v18 = vld [vmem:[#allocation4 + $0x40] sm:$0xff]  ;;  %7663 = vmatprep.mubr.msk.f32.mxu1 %vm2126_vm0, %v9794_v60  ;;  %v4651_v37 = vld [vmem:[#allocation3 + $0x70] ss:$2 sm:$0xff]  ;;  %v4671_v13 = vld [vmem:[#allocation3 + $0x71] ss:$2 sm:$0xff] }
 0x2af   : > { %7703 = vmatmul.mubr.msk.f32.gmra.mxu0 %vm2126_vm0, %v9796_v18  ;;  %v4683_v20 = vmax.f32 %v4651_v37, %v4671_v13  ;;  %v5524_v61 = vld [vmem:[#allocation4 + $0x42] sm:$0xff] }
 0x2b1   : > { %v9803_v28 = vld [vmem:[#allocation4 + $0x51] sm:$0xff]  ;;  %4784 = vst.msk [vmem:[#allocation4 + $0x71] sm:$0xff] %vm2126_vm0, %v4683_v20 }
 0x2b2   : > { %v9805_v38 = vld [vmem:[#allocation4 + $0x50] sm:$0xff]  ;;  %7664 = vmatmul.mubr.msk.f32.gmra.mxu1 %vm2126_vm0, %v9803_v28  ;;  %v4653_v45 = vld [vmem:[#allocation3 + $0x80] ss:$2 sm:$0xff]  ;;  %v4673_v21 = vld [vmem:[#allocation3 + $0x81] ss:$2 sm:$0xff] }
 0x2b3   : > { %7705 = vmatprep.mubr.msk.f32.mxu0 %vm2126_vm0, %v9805_v38  ;;  %v4684_v56 = vmax.f32 %v4653_v45, %v4673_v21  ;;  %v5525_v42 = vld [vmem:[#allocation4 + $0x52] sm:$0xff] }
 0x2b4   : > { %v9812_v32 = vld [vmem:[#allocation4 + $0x61] sm:$0xff] }
 0x2b5   : > { %v9814_v40 = vld [vmem:[#allocation4 + $0x60] sm:$0xff]  ;;  %7666 = vmatprep.mubr.msk.f32.mxu1 %vm2126_vm0, %v9812_v32  ;;  %4785 = vst.msk [vmem:[#allocation4 + $0x81] sm:$0xff] %vm2126_vm0, %v4684_v56 }
 0x2b6   : > { %7706 = vmatmul.mubr.msk.f32.gmra.mxu0 %vm2126_vm0, %v9814_v40  ;;  %v5526_v17 = vld [vmem:[#allocation4 + $0x62] sm:$0xff] }
 0x2b8   : > { %v9821_v49 = vld [vmem:[#allocation4 + $0x71] sm:$0xff] }
 0x2b9   : > { %v9823_v5 = vld [vmem:[#allocation4 + $0x70] sm:$0xff]  ;;  %7667 = vmatmul.mubr.msk.f32.gmra.mxu1 %vm2126_vm0, %v9821_v49 }
 0x2ba   : > { %7708 = vmatprep.mubr.msk.f32.mxu0 %vm2126_vm0, %v9823_v5  ;;  %7671 = vmatprep.mubr.msk.f32.mxu1 %vm2126_vm0, %v4787_v43  ;;  %v5527_v27 = vld [vmem:[#allocation4 + $0x72] sm:$0xff] }
 0x2bc   : > { %v9830_v54 = vld [vmem:[#allocation4 + $0x80] sm:$0xff] }
 0x2bd   : > { %7672 = vmatmul.mubr.msk.f32.vlgmr.msra.gmra.mxu1 %vm2126_vm0, %v9738_v8  ;;  %7709 = vmatmul.mubr.msk.f32.gmra.mxu0 %vm2126_vm0, %v9830_v54  ;;  %v5528_v8 = vld [vmem:[#allocation4 + $0x82] sm:$0xff] }
 0x2be   : > { %7684 = vmatpush3.msk.msra.mxu1 %vm2254_vm2, %v9743_v35  ;;  %7674 = vmatprep.mubr.msk.f32.mxu1 %vm2126_vm0, %v9762_v15  ;;  %v5828_v35 = vld [vmem:[#allocation4 + $0x81] sm:$0xff] }
 0x2bf   : > { %7727 = vmatprep.mubr.msk.f32.mxu0 %vm2126_vm0, %v5521_v19  ;;  %7711 = vmatprep.subr.msk.mxu1 %vm2254_vm2, %v7020_v51 }
 0x2c1   : > { %7675 = vmatmul.mubr.msk.f32.gmra.mxu1 %vm2126_vm0, %v9786_v9  ;;  %7728 = vmatmul.mubr.msk.f32.vlgmr.msra.gmra.mxu0 %vm2126_vm0, %v9845_v59 }
 0x2c2   : > { %7677 = vmatprep.mubr.msk.f32.mxu1 %vm2126_vm0, %v9796_v18  ;;  %7730 = vmatprep.mubr.msk.f32.mxu0 %vm2126_vm0, %v9851_v23 }
 0x2c3   : > { %7754 = vmatpush3.msk.msra.mxu0 %vm2254_vm2, %v9767_v1 }
 0x2c4   : > { %7781 = vmatprep.subr.mxu0 %v10155_v47 }
 0x2c5   : > { %7678 = vmatmul.mubr.msk.f32.gmra.mxu1 %vm2126_vm0, %v9805_v38  ;;  %7731 = vmatmul.mubr.msk.f32.gmra.mxu0 %vm2126_vm0, %v5524_v61 }
 0x2c6   : > { %7680 = vmatprep.mubr.msk.f32.mxu1 %vm2126_vm0, %v9814_v40  ;;  %7733 = vmatprep.mubr.msk.f32.mxu0 %vm2126_vm0, %v5525_v42 }
 0x2c9   : > { %7681 = vmatmul.mubr.msk.f32.gmra.mxu1 %vm2126_vm0, %v9823_v5  ;;  %7734 = vmatmul.mubr.msk.f32.gmra.mxu0 %vm2126_vm0, %v5526_v17 }
 0x2ca   : > { %7736 = vmatprep.mubr.msk.f32.mxu0 %vm2126_vm0, %v5527_v27  ;;  %7685 = vmatprep.mubr.msk.f32.mxu1 %vm2126_vm0, %v5070_v58 }
 0x2cd   : > { %7686 = vmatmul.mubr.msk.f32.vlgmr.msra.gmra.mxu1 %vm2126_vm0, %v5521_v19  ;;  %7737 = vmatmul.mubr.msk.f32.gmra.mxu0 %vm2126_vm0, %v5528_v8 }
 0x2ce   : > { %7712 = vmatpush3.msk.msra.mxu1 %vm2254_vm2, %v7020_v51  ;;  %7688 = vmatprep.mubr.msk.f32.mxu1 %vm2126_vm0, %v9845_v59 }
 0x2cf   : > { %7755 = vmatprep.mubr.msk.f32.mxu0 %vm2126_vm0, %v9760_v16  ;;  %7739 = vmatprep.subr.msk.mxu1 %vm2254_vm2, %v7040_v53 }
 0x2d1   : > { %7689 = vmatmul.mubr.msk.f32.gmra.mxu1 %vm2126_vm0, %v9851_v23  ;;  %7756 = vmatmul.mubr.msk.f32.vlgmr.msra.gmra.mxu0 %vm2126_vm0, %v9784_v52 }
 0x2d2   : > { %7691 = vmatprep.mubr.msk.f32.mxu1 %vm2126_vm0, %v5524_v61  ;;  %7758 = vmatprep.mubr.msk.f32.mxu0 %vm2126_vm0, %v9794_v60 }
 0x2d3   : > { %7782 = vmatpush3.msk.msra.mxu0 %vm6251_vm5, %v7072_v4 }
 0x2d4   : > { %7786 = vmatprep.subr.mxu0 %v10155_v47 }
 0x2d5   : > { %7692 = vmatmul.mubr.msk.f32.gmra.mxu1 %vm2126_vm0, %v5525_v42  ;;  %7759 = vmatmul.mubr.msk.f32.gmra.mxu0 %vm2126_vm0, %v9803_v28 }
 0x2d6   : > { %7694 = vmatprep.mubr.msk.f32.mxu1 %vm2126_vm0, %v5526_v17  ;;  %7761 = vmatprep.mubr.msk.f32.mxu0 %vm2126_vm0, %v9812_v32 }
 0x2d9   : > { %7695 = vmatmul.mubr.msk.f32.gmra.mxu1 %vm2126_vm0, %v5527_v27  ;;  %7762 = vmatmul.mubr.msk.f32.gmra.mxu0 %vm2126_vm0, %v9821_v49 }
 0x2da   : > { %7713 = vmatprep.mubr.msk.f32.mxu1 %vm2126_vm0, %v9736_v30  ;;  %7764 = vmatprep.mubr.msk.f32.mxu0 %vm2126_vm0, %v5828_v35  ;;  %v5679_v30 = vld [vmem:[#allocation4 + $0x90] sm:$0xff] }
 0x2dd   : > { %7714 = vmatmul.mubr.msk.f32.vlgmr.msra.gmra.mxu1 %vm2126_vm0, %v9760_v16  ;;  %7765 = vmatmul.mubr.msk.f32.gmra.mxu0 %vm2126_vm0, %v5829_v3 }
 0x2de   : > { %7740 = vmatpush3.msk.msra.mxu1 %vm2254_vm2, %v7040_v53  ;;  %7716 = vmatprep.mubr.msk.f32.mxu1 %vm2126_vm0, %v9784_v52 }
 0x2df   : > { %7767 = vmatprep.subr.msk.mxu1 %vm2254_vm2, %v7060_v14  ;;  %7783 = vmatprep.mubr.msk.f32.mxu0 %vm7952_vm6, %v10155_v47 }
 0x2e1   : > { %7717 = vmatmul.mubr.msk.f32.gmra.mxu1 %vm2126_vm0, %v9794_v60 }
 0x2e2   : > { %7719 = vmatprep.mubr.msk.f32.mxu1 %vm2126_vm0, %v9803_v28 }
 0x2e5   : > { %7720 = vmatmul.mubr.msk.f32.gmra.mxu1 %vm2126_vm0, %v9812_v32 }
 0x2e6   : > { %7722 = vmatprep.mubr.msk.f32.mxu1 %vm2126_vm0, %v9821_v49 }
 0x2e9   : > { %7723 = vmatmul.mubr.msk.f32.gmra.mxu1 %vm2126_vm0, %v5828_v35 }
 0x2ea   : > { %7741 = vmatprep.mubr.msk.f32.mxu1 %vm2126_vm0, %v9762_v15 }
 0x2ed   : > { %7742 = vmatmul.mubr.msk.f32.vlgmr.msra.gmra.mxu1 %vm2126_vm0, %v9786_v9 }
 0x2ee   : > { %7768 = vmatpush3.msk.msra.mxu1 %vm2254_vm2, %v7060_v14  ;;  %7744 = vmatprep.mubr.msk.f32.mxu1 %vm2126_vm0, %v9796_v18 }
 0x2ef   : > { %7796 = vmatprep.subr.mxu1 %v10155_v47 }
 0x2f1   : > { %7745 = vmatmul.mubr.msk.f32.gmra.mxu1 %vm2126_vm0, %v9805_v38 }
 0x2f2   : > { %7747 = vmatprep.mubr.msk.f32.mxu1 %vm2126_vm0, %v9814_v40 }
 0x2f5   : > { %7748 = vmatmul.mubr.msk.f32.gmra.mxu1 %vm2126_vm0, %v9823_v5 }
 0x2f6   : > { %7750 = vmatprep.mubr.msk.f32.mxu1 %vm2126_vm0, %v9830_v54 }
 0x2f9   : > { %7751 = vmatmul.mubr.msk.f32.gmra.mxu1 %vm2126_vm0, %v5679_v30 }
 0x2fa   : > { %7769 = vmatprep.mubr.msk.f32.mxu1 %vm2126_vm0, %v9845_v59 }
 0x2fd   : > { %7770 = vmatmul.mubr.msk.f32.vlgmr.msra.gmra.mxu1 %vm2126_vm0, %v9851_v23 }
 0x2fe   : > { %7772 = vmatprep.mubr.msk.f32.mxu1 %vm2126_vm0, %v5524_v61  ;;  %7797 = vmatpush3.msk.msra.mxu1 %vm6251_vm5, %v7080_v2 }
 0x301   : > { %7773 = vmatmul.mubr.msk.f32.gmra.mxu1 %vm2126_vm0, %v5525_v42 }
 0x302   : > { %7775 = vmatprep.mubr.msk.f32.mxu1 %vm2126_vm0, %v5526_v17 }
 0x305   : > { %7776 = vmatmul.mubr.msk.f32.gmra.mxu1 %vm2126_vm0, %v5527_v27 }
 0x306   : > { %7778 = vmatprep.mubr.msk.f32.mxu1 %vm2126_vm0, %v5528_v8 }
 0x309   : > { %7779 = vmatmul.mubr.msk.f32.gmra.mxu1 %vm2126_vm0, %v5979_v33 }
 0x30a   : > { %7798 = vmatprep.mubr.msk.f32.mxu1 %vm7952_vm6, %v10155_v47 }
 0x361   : > { %v7659_v25 = vpop.f32.mrf.mxu1 }
 0x363   : > { %v4899_v0 = vpop.f32.mrf.mxu1 }
 0x366   : > { %v7701_v63 = vpop.f32.mrf.mxu0 }
 0x368   : > { %v5324_v62 = vpop.f32.mrf.mxu0 }
 0x36a   : > { %v7662_v7 = vpop.f32.mrf.mxu1 }
 0x36c   : > { %v4909_v48 = vpop.f32.mrf.mxu1 }
 0x36f   : > { %v7704_v46 = vpop.f32.mrf.mxu0 }
 0x371   : > { %v9962_v57 = vpop.f32.mrf.mxu0 }
 0x372   : > { %v7665_v34 = vpop.f32.mrf.mxu1 }
 0x374   : > { %v4919_v26 = vpop.f32.mrf.mxu1 }
 0x376   : > { %v9964_v44 = vpop.f32.mrf.mxu0 }
 0x378   : > { %v9966_v31 = vpop.f32.mrf.mxu0 }
 0x379   : > { %v7668_v16 = vpop.f32.mrf.mxu1 }
 0x37b   : > { %v9960_v15 = vpop.f32.mrf.mxu1 }
 0x37d   : > { %v7673_v1 = vpop.f32.mrf.mxu1  ;;  %v9968_v24 = vpop.f32.mrf.mxu0 }
 0x37e   : > { %v5037_v59 = vadd.f32 %v7673_v1, %v7659_v25 }
 0x37f   : > { %v5031_v12 = vpop.f32.mrf.mxu1  ;;  %v9970_v55 = vpop.f32.mrf.mxu0 }
 0x380   : > { %v5032_v61 = vadd.f32 %v5031_v12, %v4899_v0 }
 0x381   : > { %v7676_v41 = vpop.f32.mrf.mxu1  ;;  %v7729_v52 = vpop.f32.mrf.mxu0 }
 0x382   : > { %v5047_v27 = vadd.f32 %v7676_v41, %v7662_v7 }
 0x383   : > { %v5041_v36 = vpop.f32.mrf.mxu1  ;;  %v5624_v6 = vpop.f32.mrf.mxu0 }
 0x384   : > { %v5042_v35 = vadd.f32 %v5041_v36, %v4909_v48 }
 0x385   : > { %v7679_v22 = vpop.f32.mrf.mxu1  ;;  %v7732_v18 = vpop.f32.mrf.mxu0 }
 0x386   : > { %v5057_v33 = vadd.f32 %v7679_v22, %v7665_v34 }
 0x387   : > { %v5051_v10 = vpop.f32.mrf.mxu1  ;;  %v9972_v20 = vpop.f32.mrf.mxu0 }
 0x389   : > { %v7682_v39 = vpop.f32.mrf.mxu1  ;;  %v9974_v45 = vpop.f32.mrf.mxu0 }
 0x38b   : > { %v5061_v50 = vpop.f32.mrf.mxu1  ;;  %v9976_v32 = vpop.f32.mrf.mxu0 }
 0x38c   : > { %10156 = vst [vmem:[#allocation11_spill] sm:$0xff] %v9976_v32 }
 0x38d   : > { %v7687_v9 = vpop.f32.mrf.mxu1  ;;  %v9978_v49 = vpop.f32.mrf.mxu0 }
 0x38e   : > { %10157 = vst [vmem:[#allocation12_spill] sm:$0xff] %v9978_v49  ;;  %v5213_v42 = vadd.f32 %v7687_v9, %v5037_v59  ;;  %v5067_v9 = vadd.f32 %v7682_v39, %v7668_v16 }
 0x38f   : > { %v5173_v29 = vpop.f32.mrf.mxu1  ;;  %v9980_v51 = vpop.f32.mrf.mxu0 }
 0x390   : > { %10158 = vst [vmem:[#allocation9_spill] sm:$0xff] %v9980_v51  ;;  %v5212_v8 = vadd.f32 %v5173_v29, %v5032_v61  ;;  %v5364_v30 = vadd.f32 %v7701_v63, %v5213_v42  ;;  %v5052_v51 = vadd.f32 %v5051_v10, %v4919_v26  ;;  %v5062_v63 = vadd.f32 %v5061_v50, %v9960_v15 }
 0x391   : > { %v7690_v11 = vpop.f32.mrf.mxu1  ;;  %v7757_v58 = vpop.f32.mrf.mxu0 }
 0x392   : > { %v5215_v3 = vadd.f32 %v7690_v11, %v5047_v27  ;;  %v5363_v49 = vadd.f32 %v5324_v62, %v5212_v8 }
 0x393   : > { %v5183_v60 = vpop.f32.mrf.mxu1  ;;  %v5925_v14 = vpop.f32.mrf.mxu0 }
 0x394   : > { %v5214_v2 = vadd.f32 %v5183_v60, %v5042_v35  ;;  %v5366_v12 = vadd.f32 %v7704_v46, %v5215_v3 }
 0x395   : > { %v7693_v37 = vpop.f32.mrf.mxu1  ;;  %v7760_v1 = vpop.f32.mrf.mxu0  ;;  %v10160_v42 = vld [vmem:[#allocation12_spill] sm:$0xff] }
 0x396   : > { %v5217_v32 = vadd.f32 %v7693_v37, %v5057_v33  ;;  %v5365_v48 = vadd.f32 %v9962_v57, %v5214_v2 }
 0x397   : > { %v5193_v13 = vpop.f32.mrf.mxu1  ;;  %v5935_v62 = vpop.f32.mrf.mxu0 }
 0x398   : > { %v5216_v59 = vadd.f32 %v5193_v13, %v5052_v51  ;;  %v5368_v22 = vadd.f32 %v9964_v44, %v5217_v32 }
 0x399   : > { %v7696_v28 = vpop.f32.mrf.mxu1  ;;  %v7763_v15 = vpop.f32.mrf.mxu0 }
 0x39a   : > { %v5219_v34 = vadd.f32 %v7696_v28, %v5067_v9  ;;  %v5367_v46 = vadd.f32 %v9966_v31, %v5216_v59  ;;  %v9993_v31 = vld [vmem:[%s10122_s8] ss:$0 sm:$0xff] }
 0x39b   : > { %v5203_v38 = vpop.f32.mrf.mxu1 }
 0x39c   : > { %v5218_v60 = vadd.f32 %v5203_v38, %v5062_v63 }
 0x39d   : > { %v7715_v21 = vpop.f32.mrf.mxu1 }
 0x39e   : > { %v5514_v47 = vadd.f32 %v7715_v21, %v5364_v30 }
 0x39f   : > { %v5474_v56 = vpop.f32.mrf.mxu1 }
 0x3a0   : > { %v5513_v0 = vadd.f32 %v5474_v56, %v5363_v49  ;;  %v5664_v36 = vadd.f32 %v7729_v52, %v5514_v47  ;;  %v5370_v47 = vadd.f32 %v9968_v24, %v5219_v34  ;;  %v5369_v56 = vadd.f32 %v9970_v55, %v5218_v60  ;;  %v10159_v49 = vld [vmem:[#allocation11_spill] sm:$0xff] }
 0x3a1   : > { %v7718_v40 = vpop.f32.mrf.mxu1 }
 0x3a2   : > { %v5516_v41 = vadd.f32 %v7718_v40, %v5366_v12  ;;  %v5663_v11 = vadd.f32 %v5624_v6, %v5513_v0 }
 0x3a3   : > { %v5484_v43 = vpop.f32.mrf.mxu1 }
 0x3a4   : > { %v5515_v26 = vadd.f32 %v5484_v43, %v5365_v48  ;;  %v5666_v13 = vadd.f32 %v7732_v18, %v5516_v41 }
 0x3a5   : > { %v7721_v5 = vpop.f32.mrf.mxu1 }
 0x3a6   : > { %v5518_v37 = vadd.f32 %v7721_v5, %v5368_v22  ;;  %v5665_v44 = vadd.f32 %v9972_v20, %v5515_v26  ;;  %v9999_v20 = vld [vmem:[%s10123_s9] ss:$0 sm:$0xff] }
 0x3a7   : > { %v5494_v54 = vpop.f32.mrf.mxu1 }
 0x3a8   : > { %v5517_v21 = vadd.f32 %v5494_v54, %v5367_v46  ;;  %v5668_v6 = vadd.f32 %v9974_v45, %v5518_v37  ;;  %v5945_v45 = vpop.f32.mrf.mxu0 }
 0x3a9   : > { %v7724_v19 = vpop.f32.mrf.mxu1 }
 0x3aa   : > { %v5520_v28 = vadd.f32 %v7724_v19, %v5370_v47  ;;  %v5667_v5 = vadd.f32 %v10159_v49, %v5517_v21  ;;  %v7766_v27 = vpop.f32.mrf.mxu0 }
 0x3ab   : > { %v5504_v23 = vpop.f32.mrf.mxu1 }
 0x3ac   : > { %v5519_v40 = vadd.f32 %v5504_v23, %v5369_v56 }
 0x3ad   : > { %v7743_v17 = vpop.f32.mrf.mxu1 }
 0x3ae   : > { %v5815_v10 = vadd.f32 %v7743_v17, %v5664_v36 }
 0x3af   : > { %v5775_v53 = vpop.f32.mrf.mxu1 }
 0x3b0   : > { %v5814_v39 = vadd.f32 %v5775_v53, %v5663_v11  ;;  %v5965_v52 = vadd.f32 %v7757_v58, %v5815_v10  ;;  %v5670_v58 = vadd.f32 %v10160_v42, %v5520_v28 }
 0x3b1   : > { %v7746_v4 = vpop.f32.mrf.mxu1 }
 0x3b2   : > { %v5817_v50 = vadd.f32 %v7746_v4, %v5666_v13  ;;  %v5964_v24 = vadd.f32 %v5925_v14, %v5814_v39  ;;  %v10161_v14 = vld [vmem:[#allocation9_spill] sm:$0xff] }
 0x3b3   : > { %v5785_v25 = vpop.f32.mrf.mxu1  ;;  %v5669_v30 = vadd.f32 %v10161_v14, %v5519_v40 }
 0x3b4   : > { %v5816_v18 = vadd.f32 %v5785_v25, %v5665_v44  ;;  %v5967_v19 = vadd.f32 %v7760_v1, %v5817_v50 }
 0x3b5   : > { %v7749_v7 = vpop.f32.mrf.mxu1 }
 0x3b6   : > { %v5819_v43 = vadd.f32 %v7749_v7, %v5668_v6  ;;  %v5966_v35 = vadd.f32 %v5935_v62, %v5816_v18  ;;  %v5955_v7 = vpop.f32.mrf.mxu0 }
 0x3b7   : > { %v5795_v29 = vpop.f32.mrf.mxu1 }
 0x3b8   : > { %v5818_v61 = vadd.f32 %v5795_v29, %v5667_v5  ;;  %v5969_v4 = vadd.f32 %v7763_v15, %v5819_v43 }
 0x3b9   : > { %v7752_v16 = vpop.f32.mrf.mxu1 }
 0x3ba   : > { %v5821_v3 = vadd.f32 %v7752_v16, %v5670_v58  ;;  %v5968_v59 = vadd.f32 %v5945_v45, %v5818_v61 }
 0x3bb   : > { %v5805_v57 = vpop.f32.mrf.mxu1 }
 0x3bc   : > { %v5820_v12 = vadd.f32 %v5805_v57, %v5669_v30  ;;  %v5971_v34 = vadd.f32 %v7766_v27, %v5821_v3 }
 0x3bd   : > { %v7771_v38 = vpop.f32.mrf.mxu1 }
 0x3be   : > { %v6115_v32 = vadd.f32 %v7771_v38, %v5965_v52  ;;  %v5970_v11 = vadd.f32 %v5955_v7, %v5820_v12 }
 0x3bf   : > { %v6075_v55 = vpop.f32.mrf.mxu1 }
 0x3c0   : > { %v6130_v54 = vmul.f32 %v9993_v31, %v6115_v32  ;;  %v6114_v51 = vadd.f32 %v6075_v55, %v5964_v24 }
 0x3c1   : > { %v7774_v17 = vpop.f32.mrf.mxu1 }
 0x3c2   : > { %v6145_v23 = vadd.f32 %v9999_v20, %v6130_v54  ;;  %v6129_v8 = vmul.f32 %v9993_v31, %v6114_v51  ;;  %v6117_v53 = vadd.f32 %v7774_v17, %v5967_v19 }
 0x3c3   : > { %v6085_v33 = vpop.f32.mrf.mxu1 }
 0x3c4   : > { %v6153_v2 = vmax.f32 %v6145_v23, 0.0  ;;  %v6144_v25 = vadd.f32 %v9999_v20, %v6129_v8  ;;  %v6132_v1 = vmul.f32 %v9993_v31, %v6117_v53  ;;  %v6116_v0 = vadd.f32 %v6085_v33, %v5966_v35 }
 0x3c5   : > { %v7777_v9 = vpop.f32.mrf.mxu1 }
 0x3c6   : > { %6162 = vst.msk [vmem:[#allocation5 + $0x8] sm:$0xff] %vm6160_vm7, %v6153_v2  ;;  %v6152_v41 = vmax.f32 %v6144_v25, 0.0  ;;  %v6147_v48 = vadd.f32 %v9999_v20, %v6132_v1  ;;  %v6131_v36 = vmul.f32 %v9993_v31, %v6116_v0  ;;  %v6119_v63 = vadd.f32 %v7777_v9, %v5969_v4 }
 0x3c7   : > { %v6095_v22 = vpop.f32.mrf.mxu1 }
 0x3c8   : > { %6161 = vst.msk [vmem:[#allocation5] sm:$0xff] %vm6160_vm7, %v6152_v41  ;;  %v6155_v29 = vmax.f32 %v6147_v48, 0.0  ;;  %v6146_v62 = vadd.f32 %v9999_v20, %v6131_v36  ;;  %v6134_v26 = vmul.f32 %v9993_v31, %v6119_v63  ;;  %v6118_v10 = vadd.f32 %v6095_v22, %v5968_v59 }
 0x3c9   : > { %v7780_v60 = vpop.f32.mrf.mxu1 }
 0x3ca   : > { %6164 = vst.msk [vmem:[#allocation5 + $0x18] sm:$0xff] %vm6160_vm7, %v6155_v29  ;;  %v6154_v37 = vmax.f32 %v6146_v62, 0.0  ;;  %v6149_v46 = vadd.f32 %v9999_v20, %v6134_v26  ;;  %v6133_v16 = vmul.f32 %v9993_v31, %v6118_v10  ;;  %v6121_v39 = vadd.f32 %v7780_v60, %v5971_v34 }
 0x3cb   : > { %v6105_v13 = vpop.f32.mrf.mxu1 }
 0x3cc   : > { %6163 = vst.msk [vmem:[#allocation5 + $0x10] sm:$0xff] %vm6160_vm7, %v6154_v37  ;;  %v6157_v21 = vmax.f32 %v6149_v46, 0.0  ;;  %v6148_v47 = vadd.f32 %v9999_v20, %v6133_v16  ;;  %v6136_v57 = vmul.f32 %v9993_v31, %v6121_v39  ;;  %v6120_v15 = vadd.f32 %v6105_v13, %v5970_v11 }
 0x3cd   : > { %v6195_v50 = vld [vmem:[#allocation5 + $0xa] sm:$0x1]  ;;  %v6203_v44 = vld [vmem:[#allocation5 + $0xb] sm:$0x1]  ;;  %v6547_v52 = vld [vmem:[#allocation5 + $0xe] sm:$0x1] }
 0x3ce   : > { %6166 = vst.msk [vmem:[#allocation5 + $0x28] sm:$0xff] %vm6160_vm7, %v6157_v21  ;;  %v6156_v28 = vmax.f32 %v6148_v47, 0.0  ;;  %v6151_v56 = vadd.f32 %v9999_v20, %v6136_v57  ;;  %v6135_v6 = vmul.f32 %v9993_v31, %v6120_v15  ;;  %v6211_v38 = vmax.f32 %v6195_v50, %v6203_v44  ;;  %v6555_v18 = vld [vmem:[#allocation5 + $0xf] sm:$0x1]  ;;  %v6170_v46 = vld [vmem:[#allocation5 + $0x8] sm:$0x1] }
 0x3cf   : > { %v6194_v32 = vld [vmem:[#allocation5 + $0x2] sm:$0x1]  ;;  %v6202_v43 = vld [vmem:[#allocation5 + $0x3] sm:$0x1]  ;;  %v6546_v49 = vld [vmem:[#allocation5 + $0x6] sm:$0x1]  ;;  %v6563_v5 = vmax.f32 %v6547_v52, %v6555_v18 }
 0x3d0   : > { %6165 = vst.msk [vmem:[#allocation5 + $0x20] sm:$0xff] %vm6160_vm7, %v6156_v28  ;;  %v6159_v24 = vmax.f32 %v6151_v56, 0.0  ;;  %v6150_v40 = vadd.f32 %v9999_v20, %v6135_v6  ;;  %v6228_v19 = vrot.slane %v6211_v38, 7  ;;  %v6554_v61 = vld [vmem:[#allocation5 + $0x7] sm:$0x1]  ;;  %v6210_v27 = vmax.f32 %v6194_v32, %v6202_v43 }
 0x3d1   : > { %v6197_v55 = vld [vmem:[#allocation5 + $0x1a] sm:$0x1]  ;;  %v6205_v45 = vld [vmem:[#allocation5 + $0x1b] sm:$0x1]  ;;  %v6549_v54 = vld [vmem:[#allocation5 + $0x1e] sm:$0x1]  ;;  %v6562_v33 = vmax.f32 %v6546_v49, %v6554_v61 }
 0x3d2   : > { %6168 = vst.msk [vmem:[#allocation5 + $0x38] sm:$0xff] %vm6160_vm7, %v6159_v24  ;;  %v6158_v31 = vmax.f32 %v6150_v40, 0.0  ;;  %v6213_v51 = vmax.f32 %v6197_v55, %v6205_v45  ;;  %v6557_v42 = vld [vmem:[#allocation5 + $0x1f] sm:$0x1]  ;;  %v6580_v35 = vrot.slane %v6563_v5, 7  ;;  %v6230_v7 = vsel %vm6229_vm8, %v6228_v19, %v6210_v27 }
 0x3d3   : > { %v6196_v58 = vld [vmem:[#allocation5 + $0x12] sm:$0x1]  ;;  %v6204_v17 = vld [vmem:[#allocation5 + $0x13] sm:$0x1]  ;;  %v6548_v23 = vld [vmem:[#allocation5 + $0x16] sm:$0x1]  ;;  %v6565_v8 = vmax.f32 %v6549_v54, %v6557_v42 }
 0x3d4   : > { %6167 = vst.msk [vmem:[#allocation5 + $0x30] sm:$0xff] %vm6160_vm7, %v6158_v31  ;;  %v6212_v20 = vmax.f32 %v6196_v58, %v6204_v17  ;;  %v6556_v53 = vld [vmem:[#allocation5 + $0x17] sm:$0x1]  ;;  %v6234_v1 = vrot.slane %v6213_v51, 5  ;;  %v6581_v60 = vsel %vm6229_vm8, %v6580_v35, %v6562_v33  ;;  %v6169_v37 = vld [vmem:[#allocation5] sm:$0x1] }
 0x3d5   : > { %v6199_v3 = vld [vmem:[#allocation5 + $0x2a] sm:$0x1]  ;;  %v6207_v14 = vld [vmem:[#allocation5 + $0x2b] sm:$0x1]  ;;  %v6551_v30 = vld [vmem:[#allocation5 + $0x2e] sm:$0x1]  ;;  %v6564_v4 = vmax.f32 %v6548_v23, %v6556_v53 }
 0x3d6   : > { %v6215_v2 = vmax.f32 %v6199_v3, %v6207_v14  ;;  %v6231_v25 = vrot.slane %v6212_v20, 6  ;;  %v6559_v0 = vld [vmem:[#allocation5 + $0x2f] sm:$0x1]  ;;  %v6584_v12 = vrot.slane %v6565_v8, 5  ;;  %v6171_v57 = vld [vmem:[#allocation5 + $0x10] sm:$0x1] }
 0x3d7   : > { %v6198_v9 = vld [vmem:[#allocation5 + $0x22] sm:$0x1]  ;;  %v6206_v59 = vld [vmem:[#allocation5 + $0x23] sm:$0x1]  ;;  %v6550_v41 = vld [vmem:[#allocation5 + $0x26] sm:$0x1]  ;;  %v6567_v48 = vmax.f32 %v6551_v30, %v6559_v0 }
 0x3d8   : > { %v6214_v36 = vmax.f32 %v6198_v9, %v6206_v59  ;;  %v6233_v63 = vsel %vm6232_vm9, %v6231_v25, %v6230_v7  ;;  %v6240_v34 = vrot.slane %v6215_v2, 3  ;;  %v6558_v22 = vld [vmem:[#allocation5 + $0x27] sm:$0x1]  ;;  %v6582_v29 = vrot.slane %v6564_v4, 6  ;;  %v6172_v15 = vld [vmem:[#allocation5 + $0x18] sm:$0x1] }
 0x3d9   : > { %v6201_v62 = vld [vmem:[#allocation5 + $0x3a] sm:$0x1]  ;;  %v6209_v26 = vld [vmem:[#allocation5 + $0x3b] sm:$0x1]  ;;  %v6553_v10 = vld [vmem:[#allocation5 + $0x3e] sm:$0x1]  ;;  %v6566_v11 = vmax.f32 %v6550_v41, %v6558_v22  ;;  %v6236_v52 = vsel %vm6235_vm10, %v6234_v1, %v6233_v63 }
 0x3da   : > { %v6217_v16 = vmax.f32 %v6201_v62, %v6209_v26  ;;  %v6237_v39 = vrot.slane %v6214_v36, 4  ;;  %v6561_v13 = vld [vmem:[#allocation5 + $0x3f] sm:$0x1]  ;;  %v6583_v21 = vsel %vm6232_vm9, %v6582_v29, %v6581_v60  ;;  %v6588_v47 = vrot.slane %v6567_v48, 3  ;;  %v6173_v6 = vld [vmem:[#allocation5 + $0x20] sm:$0x1] }
 0x3db   : > { %v6200_v50 = vld [vmem:[#allocation5 + $0x32] sm:$0x1]  ;;  %v6208_v44 = vld [vmem:[#allocation5 + $0x33] sm:$0x1]  ;;  %v6552_v28 = vld [vmem:[#allocation5 + $0x36] sm:$0x1]  ;;  %v6569_v56 = vmax.f32 %v6553_v10, %v6561_v13  ;;  %v6585_v40 = vsel %vm6235_vm10, %v6584_v12, %v6583_v21 }
 0x3dc   : > { %v6174_v38 = vld [vmem:[#allocation5 + $0x28] sm:$0x1]  ;;  %v6216_v18 = vmax.f32 %v6200_v50, %v6208_v44  ;;  %v6239_v32 = vsel %vm6238_vm11, %v6237_v39, %v6236_v52  ;;  %v6560_v24 = vld [vmem:[#allocation5 + $0x37] sm:$0x1]  ;;  %v6586_v43 = vrot.slane %v6566_v11, 4  ;;  %v6246_v55 = vrot.slane %v6217_v16, 1 }
 0x3dd   : > { %v6175_v49 = vld [vmem:[#allocation5 + $0x30] sm:$0x1]  ;;  %v6242_v5 = vsel %vm6241_vm12, %v6240_v34, %v6239_v32  ;;  %v6568_v45 = vmax.f32 %v6552_v28, %v6560_v24  ;;  %v6592_v54 = vrot.slane %v6569_v56, 1  ;;  %v6176_v31 = vld [vmem:[#allocation5 + $0x38] sm:$0x1] }
 0x3de   : > { %v6177_v51 = vld [vmem:[#allocation5 + $0x1] sm:$0x1]  ;;  %v6178_v19 = vld [vmem:[#allocation5 + $0x9] sm:$0x1]  ;;  %v6243_v61 = vrot.slane %v6216_v18, 2  ;;  %v6587_v58 = vsel %vm6238_vm11, %v6586_v43, %v6585_v40 }
 0x3df   : > { %v6193_v42 = vld [vmem:[%s10124_s10] sm:$0xf]  ;;  %v6179_v17 = vld [vmem:[#allocation5 + $0x11] sm:$0x1]  ;;  %v6180_v27 = vld [vmem:[#allocation5 + $0x19] sm:$0x1]  ;;  %v6185_v23 = vmax.f32 %v6169_v37, %v6177_v51  ;;  %v6186_v8 = vmax.f32 %v6170_v46, %v6178_v19  ;;  %v6589_v20 = vsel %vm6241_vm12, %v6588_v47, %v6587_v58 }
 0x3e0   : > { %v6590_v53 = vrot.slane %v6568_v45, 2  ;;  %v6181_v35 = vld [vmem:[#allocation5 + $0x21] sm:$0x1]  ;;  %v6182_v3 = vld [vmem:[#allocation5 + $0x29] sm:$0x1]  ;;  %v6187_v14 = vmax.f32 %v6171_v57, %v6179_v17  ;;  %v6188_v30 = vmax.f32 %v6172_v15, %v6180_v27  ;;  %v6245_v33 = vsel %vm6244_vm13, %v6243_v61, %v6242_v5 }
 0x3e1   : > { %v6183_v4 = vld [vmem:[#allocation5 + $0x31] sm:$0x1]  ;;  %v6184_v2 = vld [vmem:[#allocation5 + $0x39] sm:$0x1]  ;;  %v6189_v25 = vmax.f32 %v6173_v6, %v6181_v35  ;;  %v6190_v1 = vmax.f32 %v6174_v38, %v6182_v3  ;;  %v6333_v0 = vrot.slane %v6186_v8, 7  ;;  %v6248_v12 = vsel %vm6247_vm14, %v6246_v55, %v6245_v33 }
 0x3e2   : > { %v6591_v9 = vsel %vm6244_vm13, %v6590_v53, %v6589_v20  ;;  %v6191_v59 = vmax.f32 %v6175_v49, %v6183_v4  ;;  %v6422_v7 = vld [vmem:[#allocation5 + $0x4] sm:$0x1]  ;;  %v6423_v41 = vld [vmem:[#allocation5 + $0xc] sm:$0x1]  ;;  %7784 = vmatmul.mubr.msk.f32.vlgmr.msra.gmra.mxu0 %vm6160_vm7, %v6248_v12  ;;  %v6192_v36 = vmax.f32 %v6176_v31, %v6184_v2  ;;  %v6335_v34 = vrot.slane %v6187_v14, 6 }
 0x3e3   : > { %v6593_v48 = vsel %vm6247_vm14, %v6592_v54, %v6591_v9  ;;  %v6334_v63 = vsel %vm6229_vm8, %v6333_v0, %v6185_v23  ;;  %v6424_v22 = vld [vmem:[#allocation5 + $0x14] sm:$0x1]  ;;  %v6425_v29 = vld [vmem:[#allocation5 + $0x1c] sm:$0x1]  ;;  %7787 = vmatpush3.msk.msra.mxu0 %vm6251_vm5, %v6193_v42  ;;  %v6337_v62 = vrot.slane %v6188_v30, 5  ;;  %v6339_v26 = vrot.slane %v6189_v25, 4 }
 0x3e4   : > { %7799 = vmatmul.mubr.msk.f32.vlgmr.msra.gmra.mxu1 %vm6160_vm7, %v6593_v48  ;;  %v6341_v10 = vrot.slane %v6190_v1, 3  ;;  %v6343_v11 = vrot.slane %v6191_v59, 2  ;;  %v6426_v60 = vld [vmem:[#allocation5 + $0x24] sm:$0x1]  ;;  %v10162_v37 = vmov 0.0   ;;  %v6336_v46 = vsel %vm6232_vm9, %v6335_v34, %v6334_v63 }
 0x3e5   : > { %7788 = vmatprep.mubr.msk.f32.mxu0 %vm7952_vm6, %v10162_v37  ;;  %7791 = vmatprep.subr.mxu0 %v10162_v37  ;;  %v6427_v16 = vld [vmem:[#allocation5 + $0x2c] sm:$0x1]  ;;  %v6428_v39 = vld [vmem:[#allocation5 + $0x34] sm:$0x1]  ;;  %v6430_v13 = vld [vmem:[#allocation5 + $0x5] sm:$0x1]  ;;  %v6338_v21 = vsel %vm6235_vm10, %v6337_v62, %v6336_v46 }
 0x3e6   : > { %v6431_v47 = vld [vmem:[#allocation5 + $0xd] sm:$0x1]  ;;  %v6432_v57 = vld [vmem:[#allocation5 + $0x15] sm:$0x1]  ;;  %v6433_v15 = vld [vmem:[#allocation5 + $0x1d] sm:$0x1]  ;;  %v6438_v50 = vmax.f32 %v6422_v7, %v6430_v13  ;;  %v6340_v44 = vsel %vm6238_vm11, %v6339_v26, %v6338_v21 }
 0x3e7   : > { %v6434_v52 = vld [vmem:[#allocation5 + $0x25] sm:$0x1]  ;;  %v6435_v28 = vld [vmem:[#allocation5 + $0x2d] sm:$0x1]  ;;  %v6436_v56 = vld [vmem:[#allocation5 + $0x35] sm:$0x1]  ;;  %v6439_v6 = vmax.f32 %v6423_v41, %v6431_v47  ;;  %v6440_v38 = vmax.f32 %v6424_v22, %v6432_v57  ;;  %v6441_v18 = vmax.f32 %v6425_v29, %v6433_v15  ;;  %v6342_v32 = vsel %vm6241_vm12, %v6341_v10, %v6340_v44 }
 0x3e8   : > { %v6345_v24 = vrot.slane %v6192_v36, 1  ;;  %v6429_v40 = vld [vmem:[#allocation5 + $0x3c] sm:$0x1]  ;;  %v6437_v43 = vld [vmem:[#allocation5 + $0x3d] sm:$0x1]  ;;  %v6442_v49 = vmax.f32 %v6426_v60, %v6434_v52  ;;  %v6444_v5 = vmax.f32 %v6428_v39, %v6436_v56  ;;  %v6344_v55 = vsel %vm6244_vm13, %v6343_v11, %v6342_v32 }
 0x3e9   : > { %v7077_v45 = vld [vmem:[%s10124_s10 + $0x8] sm:$0xf]  ;;  %v6443_v54 = vmax.f32 %v6427_v16, %v6435_v28  ;;  %v6456_v31 = vrot.slane %v6439_v6, 7  ;;  %v6458_v51 = vrot.slane %v6440_v38, 6  ;;  %v6445_v42 = vmax.f32 %v6429_v40, %v6437_v43  ;;  %v7083_v7 = vld [vmem:[%s10125_s11] ss:$0 sm:$0xff] }
 0x3ea   : > { %v6346_v19 = vsel %vm6247_vm14, %v6345_v24, %v6344_v55  ;;  %v6462_v61 = vrot.slane %v6442_v49, 4  ;;  %v6460_v17 = vrot.slane %v6441_v18, 5  ;;  %v6466_v23 = vrot.slane %v6444_v5, 2 }
 0x3eb   : > { %7789 = vmatmul.mubr.msk.f32.vlgmr.msra.gmra.mxu0 %vm6160_vm7, %v6346_v19  ;;  %v6457_v58 = vsel %vm6229_vm8, %v6456_v31, %v6438_v50  ;;  %v6464_v20 = vrot.slane %v6443_v54, 3  ;;  %v6468_v3 = vrot.slane %v6445_v42, 1 }
 0x3ec   : > { %7792 = vmatpush3.msk.msra.mxu0 %vm6251_vm5, %v7077_v45  ;;  %7793 = vmatprep.mubr.msk.f32.mxu0 %vm7952_vm6, %v10162_v37  ;;  %v6459_v27 = vsel %vm6232_vm9, %v6458_v51, %v6457_v58 }
 0x3ed   : > { %v6461_v8 = vsel %vm6235_vm10, %v6460_v17, %v6459_v27 }
 0x3ee   : > { %v6463_v53 = vsel %vm6238_vm11, %v6462_v61, %v6461_v8 }
 0x3ef   : > { %v6465_v35 = vsel %vm6241_vm12, %v6464_v20, %v6463_v53 }
 0x3f0   : > { %v6467_v14 = vsel %vm6244_vm13, %v6466_v23, %v6465_v35 }
 0x3f1   : > { %v6469_v30 = vsel %vm6247_vm14, %v6468_v3, %v6467_v14 }
 0x3f2   : > { %7794 = vmatmul.mubr.msk.f32.vlgmr.msra.gmra.mxu0 %vm6160_vm7, %v6469_v30 }
 0x4a2   : > { %v6321_v33 = vpop.f32.mrf.mxu0 }
 0x4a4   : > { %v6665_v4 = vpop.f32.mrf.mxu1  ;;  %v7785_v2 = vpop.f32.mrf.mxu0 }
 0x4a6   : > { %v7800_v25 = vpop.f32.mrf.mxu1 }
 0x4ab   : > { %v6418_v1 = vpop.f32.mrf.mxu0 }
 0x4ac   : > { %v6419_v12 = vadd.f32 %v6418_v1, %v6321_v33 }
 0x4ad   : > { %v7790_v0 = vpop.f32.mrf.mxu0 }
 0x4b2   : > { %v6541_v9 = vpop.f32.mrf.mxu0 }
 0x4b3   : > { %v6545_v59 = vadd.f32 %v6541_v9, %v6419_v12 }
 0x4b4   : > { %v7795_v41 = vpop.f32.mrf.mxu0 }
 0x4b5   : > { %v6669_v48 = vadd.f32 %v6665_v4, %v6545_v59 }
 0x4b7   : > { %v6677_v36 = vadd.f32 %v7083_v7, %v6669_v48 }
 0x4b9   : > { %6679 = vst.msk [vmem:[%s430_s30] sm:$0xff] %vm6678_vm15, %v6677_v36 }
 0x4ba   : > { %7886 = shalt.err (!%p7883_p5)
}
 0x4bb   : > { %s7887_s19 = scalar_lea.hbm %s6693_s1, 128  ;;  %s7891_s28 = scalar_lea.hbm %s10126_s12, 256 }
 0x4bc   : > { %p7888_p6 = scmp.ne.s32.totalorder %s6693_s1, %s7887_s19  ;;  %p7892_p10 = scmp.lt.s32.totalorder %s6693_s1, %s10126_s12 }
 0x4bd   : > { %p7893_p11 = scmp.lt.s32.totalorder %s7891_s28, %s7887_s19 }
 0x4be   : > { %p7889_p7 = pnand %p7888_p6, %p8059_p4 }
 0x4bf   : > { %p7894_p12 = por %p7893_p11, %p7892_p10 }
 0x4c0   : > { %p7890_p9 = pneg %p7889_p7 }
 0x4c2   : > { %p7895_p13 = pnand %p7894_p12, %p7890_p9 }
 0x4c4   : > { %7898 = shalt.err (!%p7895_p13)
}
 0x4c5   : > { %7801 = dma.vmem_to_hbm [thread:$0]  (%p8059_p4), %s6696_s14, 128, %s6693_s1, %s6681_s2  }
 0x4c6 PF: > { %p7807_p0 = scmp.ge.s32.totalorder %s7949_s26, 2  ;;  %s6707_s3 = sand.u32 1, %s7929_s21  }
 0x4c7   : > { %s6708_s20 = scalar_lea.sflag [#allocation7], %s6707_s3 }
 0x4c8   : > { %p7804_p1 = pnand %p7807_p0, %p8066_p8 }
 0x4ca   : > { %p7805_p2 = pneg %p7804_p1 }
 0x4cc   : > { %7924 = dma.done.wait (%p7805_p2), %s6708_s20, 128  }
 0x4cd   : > { %7926 = vsyncadd (%p7805_p2), %s6708_s20, 4294967168  ;;  %s25_s26 = sadd.s32 1, %s7949_s26   ;;  %s10163_s21 = smov %s7933_s22 }
 0x4ce   : > { %p22_p3 = scmp.ge.s32.totalorder %s25_s26, 4   ;;  %s10164_s22 = smov %s7937_s23 }
 0x4cf   : > { %s10165_s23 = smov %s8072_s16  ;;  %s10166_s24 = smov %s7945_s25 }
 0x4d0   : > { %s10167_s25 = smov %s10169_s29  ;;  %24 = sbr.rel (!%p22_p3) target bundleno = 9 (0x9), region = 145 }
 0x4d5   :  { %6713 = vsyncpa [#allocation7], 1 }
 0x4d6   :  { %6715 = vsyncpa [#allocation7 + $0x1], 1 }

</bundles_post_ra>
